<compile_context>
chip_gen: v6e
topology: v6e:2x2x1
jax: 0.10.0
libtpu: 0.0.40
codegen_flags: <defaults>
</compile_context>

<pallas_src>
import jax
import jax.numpy as jnp
from jax import lax
from jax.experimental import pallas as pl
from jax.experimental.pallas import tpu as pltpu

EPS = 1e-5  # nn.BatchNorm2d default eps


# ----------------------------------------------------------------------------
# Parameter construction (synthetic, deterministic; PyTorch-style layouts).
# ----------------------------------------------------------------------------
def init_params(key, in_ch=128, mid_ch=64, hidden=64, m=1):
    ks = jax.random.split(key, 12)
    p = {}
    p["w1"] = 0.05 * jax.random.normal(ks[0], (mid_ch, in_ch, 3, 3), jnp.float32)
    p["b1"] = 0.05 * jax.random.normal(ks[1], (mid_ch,), jnp.float32)
    p["g1"] = 1.0 + 0.1 * jax.random.normal(ks[2], (mid_ch,), jnp.float32)
    p["be1"] = 0.1 * jax.random.normal(ks[3], (mid_ch,), jnp.float32)
    p["rm1"] = jnp.zeros((mid_ch,), jnp.float32)
    p["rv1"] = jnp.ones((mid_ch,), jnp.float32)

    p["w2"] = 0.05 * jax.random.normal(ks[4], (mid_ch, mid_ch, 3, 3), jnp.float32)
    p["b2"] = 0.05 * jax.random.normal(ks[5], (mid_ch,), jnp.float32)
    p["g2"] = 1.0 + 0.1 * jax.random.normal(ks[6], (mid_ch,), jnp.float32)
    p["be2"] = 0.1 * jax.random.normal(ks[7], (mid_ch,), jnp.float32)
    p["rm2"] = jnp.zeros((mid_ch,), jnp.float32)
    p["rv2"] = jnp.ones((mid_ch,), jnp.float32)

    p["fw1"] = 0.05 * jax.random.normal(ks[8], (hidden, mid_ch * m * m), jnp.float32)
    p["fb1"] = 0.05 * jax.random.normal(ks[9], (hidden,), jnp.float32)
    p["fw2"] = 0.05 * jax.random.normal(ks[10], (1, hidden), jnp.float32)
    p["fb2"] = 0.05 * jax.random.normal(ks[11], (1,), jnp.float32)
    return p


def to_kernel_params(p, m):
    """Convert PyTorch-layout params to the kernel's layouts (done once, offline)."""
    mid = p["w1"].shape[0]
    in_ch = p["w1"].shape[1]
    hidden = p["fw1"].shape[0]

    def bn_terms(b, g, be, rm, rv):
        # TODO(synk): BatchNorm is implemented in eval mode (running statistics);
        # training-mode per-batch statistics / momentum update are not in-kernel.
        s = g / jnp.sqrt(rv + EPS)
        return s, (b - rm) * s + be

    s1, c1 = bn_terms(p["b1"], p["g1"], p["be1"], p["rm1"], p["rv1"])
    s2, c2 = bn_terms(p["b2"], p["g2"], p["be2"], p["rm2"], p["rv2"])

    # (Cout, Cin, kh, kw) -> (kh, kw, Cin, Cout), fold BN scale into Cout,
    # reshape to per-tap (9, Cin, Cout), store bf16 (single-pass MXU matmuls).
    w1k = (jnp.transpose(p["w1"], (2, 3, 1, 0)) * s1).reshape(9, in_ch, mid)
    w2k = (jnp.transpose(p["w2"], (2, 3, 1, 0)) * s2).reshape(9, mid, mid)
    w1k = w1k.astype(jnp.bfloat16)
    w2k = w2k.astype(jnp.bfloat16)

    # fc1: PyTorch flatten order is (c, h, w); the kernel flattens as (h, w, c).
    fw1k = jnp.transpose(p["fw1"].reshape(hidden, mid, m, m), (0, 2, 3, 1))
    fw1k = fw1k.reshape(hidden, m * m * mid).T.astype(jnp.float32)  # (m*m*mid, hidden)

    # Pack all tiny per-channel tensors into one (8,128) f32 block:
    #   row 0: conv1 BN shift   row 1: conv2 BN shift
    #   row 2: fc1 bias         row 3: fc2 weight row     row 4[0]: fc2 bias
    small = jnp.zeros((8, 128), jnp.float32)
    small = small.at[0, :mid].set(c1)
    small = small.at[1, :mid].set(c2)
    small = small.at[2, :hidden].set(p["fb1"])
    small = small.at[3, :hidden].set(p["fw2"][0])
    small = small.at[4, 0].set(p["fb2"][0])

    return dict(w1=w1k, w2=w2k, fw1=fw1k, small=small)


# ----------------------------------------------------------------------------
# Pallas kernel + wrapper.
# ----------------------------------------------------------------------------
def _default_batch_block(n):
    """Per-chip grid sizing (perf review):
    v7x has 2 TensorCores -> two 'parallel' grid steps, one per TC.
    v5e/v6e are single-TC -> one grid step (max MXU fill, no per-step overhead)."""
    kind = ""
    try:
        kind = jax.devices()[0].device_kind.lower()
    except Exception:
        pass
    two_cores = ("v7" in kind) or ("tpu7" in kind)
    if two_cores and n % 2 == 0 and (n // 2) % 8 == 0 and (n // 2) <= 64:
        return n // 2
    for tb in (64, 32, 16, 8):
        if n % tb == 0:
            return tb
    return n


def relation_network_pallas(x_nchw, kp, batch_block=None):
    N, C1, H, W = x_nchw.shape
    C2 = kp["w1"].shape[2]
    HID = kp["fw1"].shape[1]
    H1, W1 = H // 2, W // 2
    H2, W2 = H1 // 2, W1 // 2
    TB = batch_block if batch_block is not None else _default_batch_block(N)
    assert N % TB == 0
    NB = N // TB

    # glue: NCHW -> (H*W, N, C) float32: spatial leading so each per-position
    # slice inside the kernel is a contiguous (TB, C) tile.
    x_k = jnp.transpose(x_nchw, (2, 3, 0, 1)).reshape(H * W, N, C1).astype(jnp.float32)

    def kernel(x_ref, w1_ref, w2_ref, fw1_ref, small_ref, o_ref):

        def conv_bn_relu(act, w_ref_, bias_row):
            # act: (h, w, TB, Cin) f32.  3x3 conv (padding=1) with the BN scale
            # pre-folded into the weights: 9 per-tap matmuls accumulated in f32
            # (no im2col slab), then +shift and ReLU once on the accumulator.
            hh, ww, tb, cin = act.shape
            cout = w_ref_.shape[2]
            zrow = jnp.zeros((1, ww + 2, tb, cin), act.dtype)
            zcol = jnp.zeros((hh, 1, tb, cin), act.dtype)
            padded = jnp.concatenate([zcol, act, zcol], axis=1)     # (h, w+2, ...)
            padded = jnp.concatenate([zrow, padded, zrow], axis=0)  # (h+2, w+2, ...)
            m_rows = hh * ww * tb
            acc = None
            t = 0
            for dy in (-1, 0, 1):            # tap order matches (kh, kw) weight layout
                for dx in (-1, 0, 1):
                    tap = padded[1 + dy:1 + dy + hh, 1 + dx:1 + dx + ww]
                    tap = tap.reshape(m_rows, cin).astype(jnp.bfloat16)
                    contrib = jnp.dot(tap, w_ref_[t],
                                      preferred_element_type=jnp.float32)
                    acc = contrib if acc is None else acc + contrib
                    t += 1
            y = jnp.maximum(acc + bias_row, 0.0)                    # BN shift + ReLU
            return y.reshape(hh, ww, tb, cout)

        def maxpool2(act):
            # MaxPool2d(2,2): leading-dim reshape + elementwise maxes (VPU);
            # last two dims (TB, C) untouched -> no lane/sublane relayout.
            hh, ww, tb, c = act.shape
            a = act.reshape(hh // 2, 2, ww // 2, 2, tb, c)
            return jnp.max(jnp.max(a, axis=3), axis=1)

        bias1 = small_ref[0:1, :C2]      # (1, C2)
        bias2 = small_ref[1:2, :C2]      # (1, C2)
        fb1 = small_ref[2:3, :HID]       # (1, HID)
        fw2_row = small_ref[3:4, :HID]   # (1, HID)
        fb2 = small_ref[4:5, 0:1]        # (1, 1)

        act0 = x_ref[...].reshape(H, W, TB, C1)
        act1 = maxpool2(conv_bn_relu(act0, w1_ref, bias1))          # (H1,W1,TB,C2)
        act2 = maxpool2(conv_bn_relu(act1, w2_ref, bias2))          # (H2,W2,TB,C2)

        # flatten in (h, w, c) order (fc1 weights were permuted to match)
        pieces = [act2[h, w] for h in range(H2) for w in range(W2)]
        feat = pieces[0] if len(pieces) == 1 else jnp.concatenate(pieces, axis=-1)

        h1 = jnp.maximum(
            jnp.dot(feat, fw1_ref[...], preferred_element_type=jnp.float32,
                    precision=lax.Precision.HIGHEST) + fb1, 0.0)    # (TB, HID)

        # fc2 on VPU/XLU (an M=1 MXU matmul wastes a push/drain), exact f32.
        logits = jnp.sum(h1 * fw2_row, axis=-1, keepdims=True) + fb2   # (TB, 1)
        # Exact sigmoid (final, tolerance-checked value).
        o_ref[...] = 1.0 / (1.0 + jnp.exp(-logits))

    weights = [kp["w1"], kp["w2"], kp["fw1"], kp["small"]]

    # Constant index_maps -> weights are not re-fetched across grid steps.
    def full_spec(arr):
        nd = arr.ndim
        return pl.BlockSpec(arr.shape, lambda i, _nd=nd: (0,) * _nd)

    in_specs = ([pl.BlockSpec((H * W, TB, C1), lambda i: (0, i, 0))]
                + [full_spec(w) for w in weights])
    out_specs = pl.BlockSpec((TB, 1), lambda i: (i, 0))

    out = pl.pallas_call(
        kernel,
        out_shape=jax.ShapeDtypeStruct((N, 1), jnp.float32),
        grid=(NB,),
        in_specs=in_specs,
        out_specs=out_specs,
        compiler_params=pltpu.CompilerParams(
            dimension_semantics=("parallel",),     # shards blocks across v7x's 2 TCs
            vmem_limit_bytes=32 * 1024 * 1024),    # footprint ~1-2 MiB; safe everywhere
    )(x_k, *weights)
    return out


# ----------------------------------------------------------------------------
# Pure-JAX reference (mirrors the PyTorch forward, BN in eval mode).
# ----------------------------------------------------------------------------
def reference_forward(x, p):
    HI = lax.Precision.HIGHEST

    def conv(x, w, b):
        y = lax.conv_general_dilated(x, w, (1, 1), ((1, 1), (1, 1)),
                                     dimension_numbers=("NCHW", "OIHW", "NCHW"),
                                     precision=HI)
        return y + b[None, :, None, None]

    def bn(x, g, be, rm, rv):
        return ((x - rm[None, :, None, None])
                / jnp.sqrt(rv[None, :, None, None] + EPS)
                * g[None, :, None, None] + be[None, :, None, None])

    def pool(x):
        return lax.reduce_window(x, -jnp.inf, lax.max,
                                 (1, 1, 2, 2), (1, 1, 2, 2), "VALID")

    y = pool(jax.nn.relu(bn(conv(x, p["w1"], p["b1"]),
                            p["g1"], p["be1"], p["rm1"], p["rv1"])))
    y = pool(jax.nn.relu(bn(conv(y, p["w2"], p["b2"]),
                            p["g2"], p["be2"], p["rm2"], p["rv2"])))
    y = y.reshape(y.shape[0], -1)
    y = jax.nn.relu(jnp.dot(y, p["fw1"].T, precision=HI) + p["fb1"])
    return jax.nn.sigmoid(jnp.dot(y, p["fw2"].T, precision=HI) + p["fb2"])


if __name__ == "__main__":
    key = jax.random.PRNGKey(0)
    kx, kparam = jax.random.split(key)

    # Module config: input_size=64, hidden_size=64, image_dim=32 -> multiplier m=1.
    # Relation-net input: concatenated 64+64 channel feature maps, spatial 4x4,
    # which the two 2x2 max-pools reduce to 1x1 (matching fc1 = 64*1*1 -> 64).
    N, C1, H, W = 16, 128, 4, 4
    hidden, m = 64, 1

    x = jax.random.normal(kx, (N, C1, H, W), jnp.float32)
    params = init_params(kparam, in_ch=C1, mid_ch=64, hidden=hidden, m=m)
    kparams = to_kernel_params(params, m)

    out = jax.block_until_ready(relation_network_pallas(x, kparams))
    ref = jax.block_until_ready(reference_forward(x, params))

    assert out.shape == (N, 1), out.shape
    max_err = float(jnp.max(jnp.abs(out - ref)))
    # Kernel convs run single-pass bf16 (per perf review) vs the f32/HIGHEST
    # reference; expected |err| on the sigmoid output is a few e-4, so 2e-3
    # keeps comfortable margin while still pinning forward-pass semantics.
    assert max_err < 2e-3, f"mismatch vs reference: max_err={max_err}"

    print("KERNEL_OK")
</pallas_src>

<mosaic_0001>
module attributes {stable_mosaic.version = 11 : i64} {
  func.func @kernel(%arg0: i32, %arg1: memref<16x16x128xf32, #tpu.memory_space<vmem>>, %arg2: memref<9x128x64xbf16, #tpu.memory_space<vmem>>, %arg3: memref<9x64x64xbf16, #tpu.memory_space<vmem>>, %arg4: memref<64x64xf32, #tpu.memory_space<vmem>>, %arg5: memref<8x128xf32, #tpu.memory_space<vmem>>, %arg6: memref<16x1xf32, #tpu.memory_space<vmem>>) attributes {dimension_semantics = [#tpu.dimension_semantics<parallel>], iteration_bounds = array<i64: 1>, scalar_prefetch = 0 : i64, scratch_operands = 0 : i64, tpu.core_type = #tpu.core_type<tc>, window_params = [{transform_indices = @transform_0, window_bounds = array<i64: 16, 16, 128>}, {pipeline_mode = #tpu.pipeline_mode<synchronous>, transform_indices = @transform_1, window_bounds = array<i64: 9, 128, 64>}, {pipeline_mode = #tpu.pipeline_mode<synchronous>, transform_indices = @transform_2, window_bounds = array<i64: 9, 64, 64>}, {pipeline_mode = #tpu.pipeline_mode<synchronous>, transform_indices = @transform_3, window_bounds = array<i64: 64, 64>}, {pipeline_mode = #tpu.pipeline_mode<synchronous>, transform_indices = @transform_4, window_bounds = array<i64: 8, 128>}, {transform_indices = @transform_5, window_bounds = array<i64: 16, 1>}]} {
    %c0 = arith.constant 0 : index
    %c0_0 = arith.constant 0 : index
    %0 = vector.load %arg5[%c0, %c0_0] : memref<8x128xf32, #tpu.memory_space<vmem>>, vector<1x64xf32>
    %c1 = arith.constant 1 : index
    %c0_1 = arith.constant 0 : index
    %1 = vector.load %arg5[%c1, %c0_1] : memref<8x128xf32, #tpu.memory_space<vmem>>, vector<1x64xf32>
    %c2 = arith.constant 2 : index
    %c0_2 = arith.constant 0 : index
    %2 = vector.load %arg5[%c2, %c0_2] : memref<8x128xf32, #tpu.memory_space<vmem>>, vector<1x64xf32>
    %c3 = arith.constant 3 : index
    %c0_3 = arith.constant 0 : index
    %3 = vector.load %arg5[%c3, %c0_3] : memref<8x128xf32, #tpu.memory_space<vmem>>, vector<1x64xf32>
    %c4 = arith.constant 4 : index
    %c0_4 = arith.constant 0 : index
    %4 = vector.load %arg5[%c4, %c0_4] : memref<8x128xf32, #tpu.memory_space<vmem>>, vector<1x1xf32>
    %c0_5 = arith.constant 0 : index
    %c0_6 = arith.constant 0 : index
    %c0_7 = arith.constant 0 : index
    %5 = vector.load %arg1[%c0_5, %c0_6, %c0_7] : memref<16x16x128xf32, #tpu.memory_space<vmem>>, vector<16x16x128xf32>
    %6 = vector.shape_cast %5 : vector<16x16x128xf32> to vector<4x4x16x128xf32>
    %cst = arith.constant 0.000000e+00 : f32
    %7 = vector.broadcast %cst : f32 to vector<1x6x16x128xf32>
    %cst_8 = arith.constant 0.000000e+00 : f32
    %8 = vector.broadcast %cst_8 : f32 to vector<4x1x16x128xf32>
    %9 = tpu.concatenate %8, %6, %8 in 1 : vector<4x1x16x128xf32>, vector<4x4x16x128xf32>, vector<4x1x16x128xf32> -> vector<4x6x16x128xf32>
    %10 = tpu.concatenate %7, %9, %7 in 0 : vector<1x6x16x128xf32>, vector<4x6x16x128xf32>, vector<1x6x16x128xf32> -> vector<6x6x16x128xf32>
    %11 = vector.extract_strided_slice %10 {offsets = [0, 0, 0, 0], sizes = [4, 4, 16, 128], strides = [1, 1, 1, 1]} : vector<6x6x16x128xf32> to vector<4x4x16x128xf32>
    %12 = vector.shape_cast %11 : vector<4x4x16x128xf32> to vector<256x128xf32>
    %13 = arith.truncf %12 : vector<256x128xf32> to vector<256x128xbf16>
    %c0_9 = arith.constant 0 : index
    %c0_10 = arith.constant 0 : index
    %c0_11 = arith.constant 0 : index
    %14 = vector.load %arg2[%c0_9, %c0_10, %c0_11] : memref<9x128x64xbf16, #tpu.memory_space<vmem>>, vector<1x128x64xbf16>
    %15 = vector.shape_cast %14 : vector<1x128x64xbf16> to vector<128x64xbf16>
    %cst_12 = arith.constant dense<0.000000e+00> : vector<256x64xf32>
    %16 = tpu.matmul %13, %15, %cst_12 {dimension_numbers = #tpu.dot_dimension_numbers<[1], [0], [0], [1], [0, 0, 1, 1], [], []>} : vector<256x128xbf16>, vector<128x64xbf16>, vector<256x64xf32> -> vector<256x64xf32>
    %17 = vector.extract_strided_slice %10 {offsets = [0, 1, 0, 0], sizes = [4, 4, 16, 128], strides = [1, 1, 1, 1]} : vector<6x6x16x128xf32> to vector<4x4x16x128xf32>
    %18 = vector.shape_cast %17 : vector<4x4x16x128xf32> to vector<256x128xf32>
    %19 = arith.truncf %18 : vector<256x128xf32> to vector<256x128xbf16>
    %c1_13 = arith.constant 1 : index
    %c0_14 = arith.constant 0 : index
    %c0_15 = arith.constant 0 : index
    %20 = vector.load %arg2[%c1_13, %c0_14, %c0_15] : memref<9x128x64xbf16, #tpu.memory_space<vmem>>, vector<1x128x64xbf16>
    %21 = vector.shape_cast %20 : vector<1x128x64xbf16> to vector<128x64xbf16>
    %cst_16 = arith.constant dense<0.000000e+00> : vector<256x64xf32>
    %22 = tpu.matmul %19, %21, %cst_16 {dimension_numbers = #tpu.dot_dimension_numbers<[1], [0], [0], [1], [0, 0, 1, 1], [], []>} : vector<256x128xbf16>, vector<128x64xbf16>, vector<256x64xf32> -> vector<256x64xf32>
    %23 = arith.addf %16, %22 : vector<256x64xf32>
    %24 = vector.extract_strided_slice %10 {offsets = [0, 2, 0, 0], sizes = [4, 4, 16, 128], strides = [1, 1, 1, 1]} : vector<6x6x16x128xf32> to vector<4x4x16x128xf32>
    %25 = vector.shape_cast %24 : vector<4x4x16x128xf32> to vector<256x128xf32>
    %26 = arith.truncf %25 : vector<256x128xf32> to vector<256x128xbf16>
    %c2_17 = arith.constant 2 : index
    %c0_18 = arith.constant 0 : index
    %c0_19 = arith.constant 0 : index
    %27 = vector.load %arg2[%c2_17, %c0_18, %c0_19] : memref<9x128x64xbf16, #tpu.memory_space<vmem>>, vector<1x128x64xbf16>
    %28 = vector.shape_cast %27 : vector<1x128x64xbf16> to vector<128x64xbf16>
    %cst_20 = arith.constant dense<0.000000e+00> : vector<256x64xf32>
    %29 = tpu.matmul %26, %28, %cst_20 {dimension_numbers = #tpu.dot_dimension_numbers<[1], [0], [0], [1], [0, 0, 1, 1], [], []>} : vector<256x128xbf16>, vector<128x64xbf16>, vector<256x64xf32> -> vector<256x64xf32>
    %30 = arith.addf %23, %29 : vector<256x64xf32>
    %31 = vector.extract_strided_slice %10 {offsets = [1, 0, 0, 0], sizes = [4, 4, 16, 128], strides = [1, 1, 1, 1]} : vector<6x6x16x128xf32> to vector<4x4x16x128xf32>
    %32 = vector.shape_cast %31 : vector<4x4x16x128xf32> to vector<256x128xf32>
    %33 = arith.truncf %32 : vector<256x128xf32> to vector<256x128xbf16>
    %c3_21 = arith.constant 3 : index
    %c0_22 = arith.constant 0 : index
    %c0_23 = arith.constant 0 : index
    %34 = vector.load %arg2[%c3_21, %c0_22, %c0_23] : memref<9x128x64xbf16, #tpu.memory_space<vmem>>, vector<1x128x64xbf16>
    %35 = vector.shape_cast %34 : vector<1x128x64xbf16> to vector<128x64xbf16>
    %cst_24 = arith.constant dense<0.000000e+00> : vector<256x64xf32>
    %36 = tpu.matmul %33, %35, %cst_24 {dimension_numbers = #tpu.dot_dimension_numbers<[1], [0], [0], [1], [0, 0, 1, 1], [], []>} : vector<256x128xbf16>, vector<128x64xbf16>, vector<256x64xf32> -> vector<256x64xf32>
    %37 = arith.addf %30, %36 : vector<256x64xf32>
    %38 = vector.extract_strided_slice %10 {offsets = [1, 1, 0, 0], sizes = [4, 4, 16, 128], strides = [1, 1, 1, 1]} : vector<6x6x16x128xf32> to vector<4x4x16x128xf32>
    %39 = vector.shape_cast %38 : vector<4x4x16x128xf32> to vector<256x128xf32>
    %40 = arith.truncf %39 : vector<256x128xf32> to vector<256x128xbf16>
    %c4_25 = arith.constant 4 : index
    %c0_26 = arith.constant 0 : index
    %c0_27 = arith.constant 0 : index
    %41 = vector.load %arg2[%c4_25, %c0_26, %c0_27] : memref<9x128x64xbf16, #tpu.memory_space<vmem>>, vector<1x128x64xbf16>
    %42 = vector.shape_cast %41 : vector<1x128x64xbf16> to vector<128x64xbf16>
    %cst_28 = arith.constant dense<0.000000e+00> : vector<256x64xf32>
    %43 = tpu.matmul %40, %42, %cst_28 {dimension_numbers = #tpu.dot_dimension_numbers<[1], [0], [0], [1], [0, 0, 1, 1], [], []>} : vector<256x128xbf16>, vector<128x64xbf16>, vector<256x64xf32> -> vector<256x64xf32>
    %44 = arith.addf %37, %43 : vector<256x64xf32>
    %45 = vector.extract_strided_slice %10 {offsets = [1, 2, 0, 0], sizes = [4, 4, 16, 128], strides = [1, 1, 1, 1]} : vector<6x6x16x128xf32> to vector<4x4x16x128xf32>
    %46 = vector.shape_cast %45 : vector<4x4x16x128xf32> to vector<256x128xf32>
    %47 = arith.truncf %46 : vector<256x128xf32> to vector<256x128xbf16>
    %c5 = arith.constant 5 : index
    %c0_29 = arith.constant 0 : index
    %c0_30 = arith.constant 0 : index
    %48 = vector.load %arg2[%c5, %c0_29, %c0_30] : memref<9x128x64xbf16, #tpu.memory_space<vmem>>, vector<1x128x64xbf16>
    %49 = vector.shape_cast %48 : vector<1x128x64xbf16> to vector<128x64xbf16>
    %cst_31 = arith.constant dense<0.000000e+00> : vector<256x64xf32>
    %50 = tpu.matmul %47, %49, %cst_31 {dimension_numbers = #tpu.dot_dimension_numbers<[1], [0], [0], [1], [0, 0, 1, 1], [], []>} : vector<256x128xbf16>, vector<128x64xbf16>, vector<256x64xf32> -> vector<256x64xf32>
    %51 = arith.addf %44, %50 : vector<256x64xf32>
    %52 = vector.extract_strided_slice %10 {offsets = [2, 0, 0, 0], sizes = [4, 4, 16, 128], strides = [1, 1, 1, 1]} : vector<6x6x16x128xf32> to vector<4x4x16x128xf32>
    %53 = vector.shape_cast %52 : vector<4x4x16x128xf32> to vector<256x128xf32>
    %54 = arith.truncf %53 : vector<256x128xf32> to vector<256x128xbf16>
    %c6 = arith.constant 6 : index
    %c0_32 = arith.constant 0 : index
    %c0_33 = arith.constant 0 : index
    %55 = vector.load %arg2[%c6, %c0_32, %c0_33] : memref<9x128x64xbf16, #tpu.memory_space<vmem>>, vector<1x128x64xbf16>
    %56 = vector.shape_cast %55 : vector<1x128x64xbf16> to vector<128x64xbf16>
    %cst_34 = arith.constant dense<0.000000e+00> : vector<256x64xf32>
    %57 = tpu.matmul %54, %56, %cst_34 {dimension_numbers = #tpu.dot_dimension_numbers<[1], [0], [0], [1], [0, 0, 1, 1], [], []>} : vector<256x128xbf16>, vector<128x64xbf16>, vector<256x64xf32> -> vector<256x64xf32>
    %58 = arith.addf %51, %57 : vector<256x64xf32>
    %59 = vector.extract_strided_slice %10 {offsets = [2, 1, 0, 0], sizes = [4, 4, 16, 128], strides = [1, 1, 1, 1]} : vector<6x6x16x128xf32> to vector<4x4x16x128xf32>
    %60 = vector.shape_cast %59 : vector<4x4x16x128xf32> to vector<256x128xf32>
    %61 = arith.truncf %60 : vector<256x128xf32> to vector<256x128xbf16>
    %c7 = arith.constant 7 : index
    %c0_35 = arith.constant 0 : index
    %c0_36 = arith.constant 0 : index
    %62 = vector.load %arg2[%c7, %c0_35, %c0_36] : memref<9x128x64xbf16, #tpu.memory_space<vmem>>, vector<1x128x64xbf16>
    %63 = vector.shape_cast %62 : vector<1x128x64xbf16> to vector<128x64xbf16>
    %cst_37 = arith.constant dense<0.000000e+00> : vector<256x64xf32>
    %64 = tpu.matmul %61, %63, %cst_37 {dimension_numbers = #tpu.dot_dimension_numbers<[1], [0], [0], [1], [0, 0, 1, 1], [], []>} : vector<256x128xbf16>, vector<128x64xbf16>, vector<256x64xf32> -> vector<256x64xf32>
    %65 = arith.addf %58, %64 : vector<256x64xf32>
    %66 = vector.extract_strided_slice %10 {offsets = [2, 2, 0, 0], sizes = [4, 4, 16, 128], strides = [1, 1, 1, 1]} : vector<6x6x16x128xf32> to vector<4x4x16x128xf32>
    %67 = vector.shape_cast %66 : vector<4x4x16x128xf32> to vector<256x128xf32>
    %68 = arith.truncf %67 : vector<256x128xf32> to vector<256x128xbf16>
    %c8 = arith.constant 8 : index
    %c0_38 = arith.constant 0 : index
    %c0_39 = arith.constant 0 : index
    %69 = vector.load %arg2[%c8, %c0_38, %c0_39] : memref<9x128x64xbf16, #tpu.memory_space<vmem>>, vector<1x128x64xbf16>
    %70 = vector.shape_cast %69 : vector<1x128x64xbf16> to vector<128x64xbf16>
    %cst_40 = arith.constant dense<0.000000e+00> : vector<256x64xf32>
    %71 = tpu.matmul %68, %70, %cst_40 {dimension_numbers = #tpu.dot_dimension_numbers<[1], [0], [0], [1], [0, 0, 1, 1], [], []>} : vector<256x128xbf16>, vector<128x64xbf16>, vector<256x64xf32> -> vector<256x64xf32>
    %72 = arith.addf %65, %71 : vector<256x64xf32>
    %73 = vector.broadcast %0 : vector<1x64xf32> to vector<256x64xf32>
    %74 = arith.addf %72, %73 : vector<256x64xf32>
    %cst_41 = arith.constant 0.000000e+00 : f32
    %75 = vector.broadcast %cst_41 : f32 to vector<256x64xf32>
    %76 = arith.maximumf %74, %75 : vector<256x64xf32>
    %77 = vector.shape_cast %76 : vector<256x64xf32> to vector<4x4x16x64xf32>
    %78 = vector.shape_cast %77 : vector<4x4x16x64xf32> to vector<2x2x2x2x16x64xf32>
    %cst_42 = arith.constant dense<0xFF800000> : vector<2x2x2x16x64xf32>
    %79 = vector.multi_reduction <maximumf>, %78, %cst_42 [3] : vector<2x2x2x2x16x64xf32> to vector<2x2x2x16x64xf32>
    %cst_43 = arith.constant dense<0xFF800000> : vector<2x2x16x64xf32>
    %80 = vector.multi_reduction <maximumf>, %79, %cst_43 [1] : vector<2x2x2x16x64xf32> to vector<2x2x16x64xf32>
    %cst_44 = arith.constant 0.000000e+00 : f32
    %81 = vector.broadcast %cst_44 : f32 to vector<1x4x16x64xf32>
    %cst_45 = arith.constant 0.000000e+00 : f32
    %82 = vector.broadcast %cst_45 : f32 to vector<2x1x16x64xf32>
    %83 = tpu.concatenate %82, %80, %82 in 1 : vector<2x1x16x64xf32>, vector<2x2x16x64xf32>, vector<2x1x16x64xf32> -> vector<2x4x16x64xf32>
    %84 = tpu.concatenate %81, %83, %81 in 0 : vector<1x4x16x64xf32>, vector<2x4x16x64xf32>, vector<1x4x16x64xf32> -> vector<4x4x16x64xf32>
    %85 = vector.extract_strided_slice %84 {offsets = [0, 0, 0, 0], sizes = [2, 2, 16, 64], strides = [1, 1, 1, 1]} : vector<4x4x16x64xf32> to vector<2x2x16x64xf32>
    %86 = vector.shape_cast %85 : vector<2x2x16x64xf32> to vector<64x64xf32>
    %87 = arith.truncf %86 : vector<64x64xf32> to vector<64x64xbf16>
    %c0_46 = arith.constant 0 : index
    %c0_47 = arith.constant 0 : index
    %c0_48 = arith.constant 0 : index
    %88 = vector.load %arg3[%c0_46, %c0_47, %c0_48] : memref<9x64x64xbf16, #tpu.memory_space<vmem>>, vector<1x64x64xbf16>
    %89 = vector.shape_cast %88 : vector<1x64x64xbf16> to vector<64x64xbf16>
    %cst_49 = arith.constant dense<0.000000e+00> : vector<64x64xf32>
    %90 = tpu.matmul %87, %89, %cst_49 {dimension_numbers = #tpu.dot_dimension_numbers<[1], [0], [0], [1], [0, 0, 1, 1], [], []>} : vector<64x64xbf16>, vector<64x64xbf16>, vector<64x64xf32> -> vector<64x64xf32>
    %91 = vector.extract_strided_slice %84 {offsets = [0, 1, 0, 0], sizes = [2, 2, 16, 64], strides = [1, 1, 1, 1]} : vector<4x4x16x64xf32> to vector<2x2x16x64xf32>
    %92 = vector.shape_cast %91 : vector<2x2x16x64xf32> to vector<64x64xf32>
    %93 = arith.truncf %92 : vector<64x64xf32> to vector<64x64xbf16>
    %c1_50 = arith.constant 1 : index
    %c0_51 = arith.constant 0 : index
    %c0_52 = arith.constant 0 : index
    %94 = vector.load %arg3[%c1_50, %c0_51, %c0_52] : memref<9x64x64xbf16, #tpu.memory_space<vmem>>, vector<1x64x64xbf16>
    %95 = vector.shape_cast %94 : vector<1x64x64xbf16> to vector<64x64xbf16>
    %cst_53 = arith.constant dense<0.000000e+00> : vector<64x64xf32>
    %96 = tpu.matmul %93, %95, %cst_53 {dimension_numbers = #tpu.dot_dimension_numbers<[1], [0], [0], [1], [0, 0, 1, 1], [], []>} : vector<64x64xbf16>, vector<64x64xbf16>, vector<64x64xf32> -> vector<64x64xf32>
    %97 = arith.addf %90, %96 : vector<64x64xf32>
    %98 = vector.extract_strided_slice %84 {offsets = [0, 2, 0, 0], sizes = [2, 2, 16, 64], strides = [1, 1, 1, 1]} : vector<4x4x16x64xf32> to vector<2x2x16x64xf32>
    %99 = vector.shape_cast %98 : vector<2x2x16x64xf32> to vector<64x64xf32>
    %100 = arith.truncf %99 : vector<64x64xf32> to vector<64x64xbf16>
    %c2_54 = arith.constant 2 : index
    %c0_55 = arith.constant 0 : index
    %c0_56 = arith.constant 0 : index
    %101 = vector.load %arg3[%c2_54, %c0_55, %c0_56] : memref<9x64x64xbf16, #tpu.memory_space<vmem>>, vector<1x64x64xbf16>
    %102 = vector.shape_cast %101 : vector<1x64x64xbf16> to vector<64x64xbf16>
    %cst_57 = arith.constant dense<0.000000e+00> : vector<64x64xf32>
    %103 = tpu.matmul %100, %102, %cst_57 {dimension_numbers = #tpu.dot_dimension_numbers<[1], [0], [0], [1], [0, 0, 1, 1], [], []>} : vector<64x64xbf16>, vector<64x64xbf16>, vector<64x64xf32> -> vector<64x64xf32>
    %104 = arith.addf %97, %103 : vector<64x64xf32>
    %105 = vector.extract_strided_slice %84 {offsets = [1, 0, 0, 0], sizes = [2, 2, 16, 64], strides = [1, 1, 1, 1]} : vector<4x4x16x64xf32> to vector<2x2x16x64xf32>
    %106 = vector.shape_cast %105 : vector<2x2x16x64xf32> to vector<64x64xf32>
    %107 = arith.truncf %106 : vector<64x64xf32> to vector<64x64xbf16>
    %c3_58 = arith.constant 3 : index
    %c0_59 = arith.constant 0 : index
    %c0_60 = arith.constant 0 : index
    %108 = vector.load %arg3[%c3_58, %c0_59, %c0_60] : memref<9x64x64xbf16, #tpu.memory_space<vmem>>, vector<1x64x64xbf16>
    %109 = vector.shape_cast %108 : vector<1x64x64xbf16> to vector<64x64xbf16>
    %cst_61 = arith.constant dense<0.000000e+00> : vector<64x64xf32>
    %110 = tpu.matmul %107, %109, %cst_61 {dimension_numbers = #tpu.dot_dimension_numbers<[1], [0], [0], [1], [0, 0, 1, 1], [], []>} : vector<64x64xbf16>, vector<64x64xbf16>, vector<64x64xf32> -> vector<64x64xf32>
    %111 = arith.addf %104, %110 : vector<64x64xf32>
    %112 = vector.extract_strided_slice %84 {offsets = [1, 1, 0, 0], sizes = [2, 2, 16, 64], strides = [1, 1, 1, 1]} : vector<4x4x16x64xf32> to vector<2x2x16x64xf32>
    %113 = vector.shape_cast %112 : vector<2x2x16x64xf32> to vector<64x64xf32>
    %114 = arith.truncf %113 : vector<64x64xf32> to vector<64x64xbf16>
    %c4_62 = arith.constant 4 : index
    %c0_63 = arith.constant 0 : index
    %c0_64 = arith.constant 0 : index
    %115 = vector.load %arg3[%c4_62, %c0_63, %c0_64] : memref<9x64x64xbf16, #tpu.memory_space<vmem>>, vector<1x64x64xbf16>
    %116 = vector.shape_cast %115 : vector<1x64x64xbf16> to vector<64x64xbf16>
    %cst_65 = arith.constant dense<0.000000e+00> : vector<64x64xf32>
    %117 = tpu.matmul %114, %116, %cst_65 {dimension_numbers = #tpu.dot_dimension_numbers<[1], [0], [0], [1], [0, 0, 1, 1], [], []>} : vector<64x64xbf16>, vector<64x64xbf16>, vector<64x64xf32> -> vector<64x64xf32>
    %118 = arith.addf %111, %117 : vector<64x64xf32>
    %119 = vector.extract_strided_slice %84 {offsets = [1, 2, 0, 0], sizes = [2, 2, 16, 64], strides = [1, 1, 1, 1]} : vector<4x4x16x64xf32> to vector<2x2x16x64xf32>
    %120 = vector.shape_cast %119 : vector<2x2x16x64xf32> to vector<64x64xf32>
    %121 = arith.truncf %120 : vector<64x64xf32> to vector<64x64xbf16>
    %c5_66 = arith.constant 5 : index
    %c0_67 = arith.constant 0 : index
    %c0_68 = arith.constant 0 : index
    %122 = vector.load %arg3[%c5_66, %c0_67, %c0_68] : memref<9x64x64xbf16, #tpu.memory_space<vmem>>, vector<1x64x64xbf16>
    %123 = vector.shape_cast %122 : vector<1x64x64xbf16> to vector<64x64xbf16>
    %cst_69 = arith.constant dense<0.000000e+00> : vector<64x64xf32>
    %124 = tpu.matmul %121, %123, %cst_69 {dimension_numbers = #tpu.dot_dimension_numbers<[1], [0], [0], [1], [0, 0, 1, 1], [], []>} : vector<64x64xbf16>, vector<64x64xbf16>, vector<64x64xf32> -> vector<64x64xf32>
    %125 = arith.addf %118, %124 : vector<64x64xf32>
    %126 = vector.extract_strided_slice %84 {offsets = [2, 0, 0, 0], sizes = [2, 2, 16, 64], strides = [1, 1, 1, 1]} : vector<4x4x16x64xf32> to vector<2x2x16x64xf32>
    %127 = vector.shape_cast %126 : vector<2x2x16x64xf32> to vector<64x64xf32>
    %128 = arith.truncf %127 : vector<64x64xf32> to vector<64x64xbf16>
    %c6_70 = arith.constant 6 : index
    %c0_71 = arith.constant 0 : index
    %c0_72 = arith.constant 0 : index
    %129 = vector.load %arg3[%c6_70, %c0_71, %c0_72] : memref<9x64x64xbf16, #tpu.memory_space<vmem>>, vector<1x64x64xbf16>
    %130 = vector.shape_cast %129 : vector<1x64x64xbf16> to vector<64x64xbf16>
    %cst_73 = arith.constant dense<0.000000e+00> : vector<64x64xf32>
    %131 = tpu.matmul %128, %130, %cst_73 {dimension_numbers = #tpu.dot_dimension_numbers<[1], [0], [0], [1], [0, 0, 1, 1], [], []>} : vector<64x64xbf16>, vector<64x64xbf16>, vector<64x64xf32> -> vector<64x64xf32>
    %132 = arith.addf %125, %131 : vector<64x64xf32>
    %133 = vector.extract_strided_slice %84 {offsets = [2, 1, 0, 0], sizes = [2, 2, 16, 64], strides = [1, 1, 1, 1]} : vector<4x4x16x64xf32> to vector<2x2x16x64xf32>
    %134 = vector.shape_cast %133 : vector<2x2x16x64xf32> to vector<64x64xf32>
    %135 = arith.truncf %134 : vector<64x64xf32> to vector<64x64xbf16>
    %c7_74 = arith.constant 7 : index
    %c0_75 = arith.constant 0 : index
    %c0_76 = arith.constant 0 : index
    %136 = vector.load %arg3[%c7_74, %c0_75, %c0_76] : memref<9x64x64xbf16, #tpu.memory_space<vmem>>, vector<1x64x64xbf16>
    %137 = vector.shape_cast %136 : vector<1x64x64xbf16> to vector<64x64xbf16>
    %cst_77 = arith.constant dense<0.000000e+00> : vector<64x64xf32>
    %138 = tpu.matmul %135, %137, %cst_77 {dimension_numbers = #tpu.dot_dimension_numbers<[1], [0], [0], [1], [0, 0, 1, 1], [], []>} : vector<64x64xbf16>, vector<64x64xbf16>, vector<64x64xf32> -> vector<64x64xf32>
    %139 = arith.addf %132, %138 : vector<64x64xf32>
    %140 = vector.extract_strided_slice %84 {offsets = [2, 2, 0, 0], sizes = [2, 2, 16, 64], strides = [1, 1, 1, 1]} : vector<4x4x16x64xf32> to vector<2x2x16x64xf32>
    %141 = vector.shape_cast %140 : vector<2x2x16x64xf32> to vector<64x64xf32>
    %142 = arith.truncf %141 : vector<64x64xf32> to vector<64x64xbf16>
    %c8_78 = arith.constant 8 : index
    %c0_79 = arith.constant 0 : index
    %c0_80 = arith.constant 0 : index
    %143 = vector.load %arg3[%c8_78, %c0_79, %c0_80] : memref<9x64x64xbf16, #tpu.memory_space<vmem>>, vector<1x64x64xbf16>
    %144 = vector.shape_cast %143 : vector<1x64x64xbf16> to vector<64x64xbf16>
    %cst_81 = arith.constant dense<0.000000e+00> : vector<64x64xf32>
    %145 = tpu.matmul %142, %144, %cst_81 {dimension_numbers = #tpu.dot_dimension_numbers<[1], [0], [0], [1], [0, 0, 1, 1], [], []>} : vector<64x64xbf16>, vector<64x64xbf16>, vector<64x64xf32> -> vector<64x64xf32>
    %146 = arith.addf %139, %145 : vector<64x64xf32>
    %147 = vector.broadcast %1 : vector<1x64xf32> to vector<64x64xf32>
    %148 = arith.addf %146, %147 : vector<64x64xf32>
    %cst_82 = arith.constant 0.000000e+00 : f32
    %149 = vector.broadcast %cst_82 : f32 to vector<64x64xf32>
    %150 = arith.maximumf %148, %149 : vector<64x64xf32>
    %151 = vector.shape_cast %150 : vector<64x64xf32> to vector<2x2x16x64xf32>
    %152 = vector.shape_cast %151 : vector<2x2x16x64xf32> to vector<1x2x1x2x16x64xf32>
    %cst_83 = arith.constant dense<0xFF800000> : vector<1x2x1x16x64xf32>
    %153 = vector.multi_reduction <maximumf>, %152, %cst_83 [3] : vector<1x2x1x2x16x64xf32> to vector<1x2x1x16x64xf32>
    %cst_84 = arith.constant dense<0xFF800000> : vector<1x1x16x64xf32>
    %154 = vector.multi_reduction <maximumf>, %153, %cst_84 [1] : vector<1x2x1x16x64xf32> to vector<1x1x16x64xf32>
    %155 = vector.shape_cast %154 : vector<1x1x16x64xf32> to vector<16x64xf32>
    %c0_85 = arith.constant 0 : index
    %c0_86 = arith.constant 0 : index
    %156 = vector.load %arg4[%c0_85, %c0_86] : memref<64x64xf32, #tpu.memory_space<vmem>>, vector<64x64xf32>
    %cst_87 = arith.constant dense<0.000000e+00> : vector<16x64xf32>
    %157 = tpu.matmul %155, %156, %cst_87 {dimension_numbers = #tpu.dot_dimension_numbers<[1], [0], [0], [1], [0, 0, 1, 1], [], []>, precision = #tpu.contract_precision<fp32>} : vector<16x64xf32>, vector<64x64xf32>, vector<16x64xf32> -> vector<16x64xf32>
    %158 = vector.broadcast %2 : vector<1x64xf32> to vector<16x64xf32>
    %159 = arith.addf %157, %158 : vector<16x64xf32>
    %cst_88 = arith.constant 0.000000e+00 : f32
    %160 = vector.broadcast %cst_88 : f32 to vector<16x64xf32>
    %161 = arith.maximumf %159, %160 : vector<16x64xf32>
    %162 = vector.broadcast %3 : vector<1x64xf32> to vector<16x64xf32>
    %163 = arith.mulf %161, %162 : vector<16x64xf32>
    %cst_89 = arith.constant dense<0.000000e+00> : vector<16xf32>
    %164 = vector.multi_reduction <add>, %163, %cst_89 [1] : vector<16x64xf32> to vector<16xf32>
    %165 = vector.shape_cast %164 : vector<16xf32> to vector<16x1xf32>
    %166 = vector.broadcast %4 : vector<1x1xf32> to vector<16x1xf32>
    %167 = arith.addf %165, %166 : vector<16x1xf32>
    %cst_90 = arith.constant 0.000000e+00 : f32
    %168 = vector.broadcast %cst_90 : f32 to vector<16x1xf32>
    %169 = arith.subf %168, %167 : vector<16x1xf32>
    %170 = math.exp %169 : vector<16x1xf32>
    %cst_91 = arith.constant 1.000000e+00 : f32
    %171 = vector.broadcast %cst_91 : f32 to vector<16x1xf32>
    %172 = arith.addf %171, %170 : vector<16x1xf32>
    %cst_92 = arith.constant 1.000000e+00 : f32
    %173 = vector.broadcast %cst_92 : f32 to vector<16x1xf32>
    %174 = arith.divf %173, %172 : vector<16x1xf32>
    %c0_93 = arith.constant 0 : index
    %c0_94 = arith.constant 0 : index
    %175 = vector.load %arg6[%c0_93, %c0_94] : memref<16x1xf32, #tpu.memory_space<vmem>>, vector<16x1xf32>
    tpu.vector_store %arg6[%c0_93, %c0_94], %174 {strides = array<i32>} : memref<16x1xf32, #tpu.memory_space<vmem>>, vector<16x1xf32>,
    return
  }
  func.func @transform_0(%arg0: i32) -> (i32, i32, i32) {
    %c0_i32 = arith.constant 0 : i32
    %c0_i32_0 = arith.constant 0 : i32
    %c0_i32_1 = arith.constant 0 : i32
    return %c0_i32, %arg0, %c0_i32_0 : i32, i32, i32
  }
  func.func @transform_1(%arg0: i32) -> (i32, i32, i32) {
    %c0_i32 = arith.constant 0 : i32
    %c0_i32_0 = arith.constant 0 : i32
    %c0_i32_1 = arith.constant 0 : i32
    %c0_i32_2 = arith.constant 0 : i32
    return %c0_i32, %c0_i32_0, %c0_i32_1 : i32, i32, i32
  }
  func.func @transform_2(%arg0: i32) -> (i32, i32, i32) {
    %c0_i32 = arith.constant 0 : i32
    %c0_i32_0 = arith.constant 0 : i32
    %c0_i32_1 = arith.constant 0 : i32
    %c0_i32_2 = arith.constant 0 : i32
    return %c0_i32, %c0_i32_0, %c0_i32_1 : i32, i32, i32
  }
  func.func @transform_3(%arg0: i32) -> (i32, i32) {
    %c0_i32 = arith.constant 0 : i32
    %c0_i32_0 = arith.constant 0 : i32
    %c0_i32_1 = arith.constant 0 : i32
    return %c0_i32, %c0_i32_0 : i32, i32
  }
  func.func @transform_4(%arg0: i32) -> (i32, i32) {
    %c0_i32 = arith.constant 0 : i32
    %c0_i32_0 = arith.constant 0 : i32
    %c0_i32_1 = arith.constant 0 : i32
    return %c0_i32, %c0_i32_0 : i32, i32
  }
  func.func @transform_5(%arg0: i32) -> (i32, i32) {
    %c0_i32 = arith.constant 0 : i32
    %c0_i32_0 = arith.constant 0 : i32
    return %arg0, %c0_i32 : i32, i32
  }
}

</mosaic_0001>

<bundles_post_ra>
// kernel: tpu_custom_call.1
= control target key start
LH: loop header
LB: loop body
LE: loop exit
PB: predicated region body
PF: predicated region fallthrough
CT: control target
= control target key end

     0   :  { %v7242_v1 = vmov 0.0|0.0   ;;  %vm2400_vm0 = vcmask 523264   ;;  %vm4097_vm1 = vcmask 7168   ;;  %s7236_s1 = inlined_call_operand.vmem [shape: bf16[9,128,64], index: 1, kind: input, shape index: {}]   ;;  %s7237_s0 = inlined_call_operand.vmem [shape: f32[16,16,128], index: 0, kind: input, shape index: {}]   ;;  %s7238_s2 = inlined_call_operand.vmem [shape: bf16[9,64,64], index: 2, kind: input, shape index: {}]   ;;  %s7239_s4 = inlined_call_operand.vmem [shape: f32[8,128], index: 4, kind: input, shape index: {}]   ;;  %s7240_s3 = inlined_call_operand.vmem [shape: f32[64,64], index: 3, kind: input, shape index: {}]   ;;  %s7241_s5 = inlined_call_operand.vmem [shape: f32[16,1], index: 5, kind: output, shape index: {}]  }
   0x1   :  { %v5464_v0 = vld [vmem:[%s7236_s1 + $0x78] sm:$0xff]   ;;  %4789 = vmatprep.mubr.bf16.mxu0 %v7242_v1  ;;  %4837 = vmatprep.mubr.bf16.mxu1 %v7242_v1  ;;  %v5466_v3 = vld [vmem:[%s7236_s1 + $0x70] sm:$0xff]   ;;  %v5468_v5 = vld [vmem:[%s7236_s1 + $0x68] sm:$0xff]  }
   0x2   :  { %v5465_v2 = vld [vmem:[%s7236_s1 + $0x38] sm:$0xff]   ;;  %4773 = vmatprep.subr.bf16.mxu0 %v5464_v0  ;;  %v5467_v4 = vld [vmem:[%s7236_s1 + $0x30] sm:$0xff]   ;;  %v5469_v6 = vld [vmem:[%s7236_s1 + $0x28] sm:$0xff]  }
   0x3   :  { %4821 = vmatprep.subr.bf16.mxu1 %v5465_v2  ;;  %4774 = vmatpush3.bf16.msra.mxu0 %v5464_v0  ;;  %v5470_v7 = vld [vmem:[%s7236_s1 + $0x60] sm:$0xff]   ;;  %v5472_v9 = vld [vmem:[%s7236_s1 + $0x58] sm:$0xff]   ;;  %v5474_v11 = vld [vmem:[%s7236_s1 + $0x50] sm:$0xff]  }
   0x4   :  { %4822 = vmatpush3.bf16.msra.mxu1 %v5465_v2  ;;  %4775 = vmatprep.subr.bf16.mxu0 %v5466_v3  ;;  %v5471_v8 = vld [vmem:[%s7236_s1 + $0x20] sm:$0xff]   ;;  %v5473_v10 = vld [vmem:[%s7236_s1 + $0x18] sm:$0xff]   ;;  %v5475_v12 = vld [vmem:[%s7236_s1 + $0x10] sm:$0xff]  }
   0x5   :  { %4823 = vmatprep.subr.bf16.mxu1 %v5467_v4  ;;  %v5476_v13 = vld [vmem:[%s7236_s1 + $0x48] sm:$0xff]   ;;  %v5478_v15 = vld [vmem:[%s7236_s1 + $0x40] sm:$0xff]   ;;  %v5480_v17 = vld [vmem:[%s7236_s1 + $0xb8] sm:$0xff]  }
   0x6   :  { %v5477_v14 = vld [vmem:[%s7236_s1 + $0x8] sm:$0xff]   ;;  %v5479_v16 = vld [vmem:[%s7236_s1] sm:$0xff]   ;;  %v5485_v18 = vld [vmem:[%s7236_s1 + $0xf8] sm:$0xff]  }
   0x7   :  { %4776 = vmatpush3.bf16.msra.mxu0 %v5466_v3  ;;  %v5481_v19 = vld [vmem:[%s7236_s1 + $0xb0] sm:$0xff]   ;;  %v26_v21 = vld [vmem:[%s7237_s0] sm:$0xff]  ;;  %v27_v22 = vld [vmem:[%s7237_s0 + $0x8] sm:$0xff] }
   0x8   :  { %4824 = vmatpush3.bf16.msra.mxu1 %v5467_v4  ;;  %4777 = vmatprep.subr.bf16.mxu0 %v5468_v5  ;;  %v5486_v20 = vld [vmem:[%s7236_s1 + $0xf0] sm:$0xff]   ;;  %v5482_v23 = vld [vmem:[%s7236_s1 + $0xa8] sm:$0xff]   ;;  %v5689_v25 = vpack.c.bf16 %v27_v22, %v26_v21  ;;  %v29_v27 = vld [vmem:[%s7237_s0 + $0x18] sm:$0xff] }
   0x9   :  { %4825 = vmatprep.subr.bf16.mxu1 %v5469_v6  ;;  %v5488_v24 = vld [vmem:[%s7236_s1 + $0xe8] sm:$0xff]   ;;  %v28_v26 = vld [vmem:[%s7237_s0 + $0x10] sm:$0xff]  ;;  %v5483_v28 = vld [vmem:[%s7236_s1 + $0xa0] sm:$0xff]  }
   0xa   :  { %v5489_v29 = vld [vmem:[%s7236_s1 + $0xe0] sm:$0xff]   ;;  %v31_v31 = vld [vmem:[%s7237_s0 + $0x28] sm:$0xff]  ;;  %v5484_v32 = vld [vmem:[%s7236_s1 + $0x98] sm:$0xff]   ;;  %v5716_v33 = vpack.c.bf16 %v29_v27, %v28_v26 }
   0xb   :  { %4778 = vmatpush3.bf16.msra.mxu0 %v5468_v5  ;;  %v30_v30 = vld [vmem:[%s7237_s0 + $0x20] sm:$0xff]  ;;  %v5491_v34 = vld [vmem:[%s7236_s1 + $0xd8] sm:$0xff]   ;;  %v32_v36 = vld [vmem:[%s7237_s0 + $0x30] sm:$0xff] }
   0xc   :  { %4826 = vmatpush3.bf16.msra.mxu1 %v5469_v6  ;;  %4779 = vmatprep.subr.bf16.mxu0 %v5470_v7  ;;  %v5721_v35 = vpack.c.bf16 %v31_v31, %v30_v30  ;;  %v5487_v37 = vld [vmem:[%s7236_s1 + $0x90] sm:$0xff]   ;;  %v33_v39 = vld [vmem:[%s7237_s0 + $0x38] sm:$0xff]  ;;  %v34_v40 = vld [vmem:[%s7237_s0 + $0x40] sm:$0xff] }
   0xd   :  { %4827 = vmatprep.subr.bf16.mxu1 %v5471_v8  ;;  %v5492_v38 = vld [vmem:[%s7236_s1 + $0xd0] sm:$0xff]   ;;  %v35_v41 = vld [vmem:[%s7237_s0 + $0x48] sm:$0xff]  ;;  %v5748_v43 = vpack.c.bf16 %v33_v39, %v32_v36  ;;  %v37_v47 = vld [vmem:[%s7237_s0 + $0x58] sm:$0xff] }
   0xe   :  { %v5490_v42 = vld [vmem:[%s7236_s1 + $0x88] sm:$0xff]   ;;  %v5753_v45 = vpack.c.bf16 %v35_v41, %v34_v40  ;;  %v36_v46 = vld [vmem:[%s7237_s0 + $0x50] sm:$0xff]  ;;  %v5493_v48 = vld [vmem:[%s7236_s1 + $0x80] sm:$0xff]  }
   0xf   :  { %4780 = vmatpush3.bf16.msra.mxu0 %v5470_v7  ;;  %v5494_v44 = vld [vmem:[%s7236_s1 + $0xc8] sm:$0xff]   ;;  %v38_v49 = vld [vmem:[%s7237_s0 + $0x60] sm:$0xff]  ;;  %v5496_v52 = vld [vmem:[%s7236_s1 + $0x138] sm:$0xff]   ;;  %v5783_v54 = vpack.c.bf16 %v37_v47, %v36_v46 }
  0x10   :  { %4828 = vmatpush3.bf16.msra.mxu1 %v5471_v8  ;;  %4781 = vmatprep.subr.bf16.mxu0 %v5472_v9  ;;  %v5495_v50 = vld [vmem:[%s7236_s1 + $0xc0] sm:$0xff]   ;;  %v39_v51 = vld [vmem:[%s7237_s0 + $0x68] sm:$0xff]  ;;  %v5501_v53 = vld [vmem:[%s7236_s1 + $0x178] sm:$0xff]  }
  0x11   :  { %4829 = vmatprep.subr.bf16.mxu1 %v5473_v10  ;;  %v5785_v55 = vpack.c.bf16 %v39_v51, %v38_v49  ;;  %v40_v56 = vld [vmem:[%s7237_s0 + $0x70] sm:$0xff]  ;;  %v41_v57 = vld [vmem:[%s7237_s0 + $0x78] sm:$0xff]  ;;  %v42_v58 = vld [vmem:[%s7237_s0 + $0x80] sm:$0xff] }
  0x12   :  { %v43_v59 = vld [vmem:[%s7237_s0 + $0x88] sm:$0xff]  ;;  %v5803_v60 = vpack.c.bf16 %v41_v57, %v40_v56  ;;  %v44_v62 = vld [vmem:[%s7237_s0 + $0x90] sm:$0xff]  ;;  %v45_v63 = vld [vmem:[%s7237_s0 + $0x98] sm:$0xff] }
  0x13   :  { %4782 = vmatpush3.bf16.msra.mxu0 %v5472_v9  ;;  %v5805_v61 = vpack.c.bf16 %v43_v59, %v42_v58  ;;  %v46_v0 = vld [vmem:[%s7237_s0 + $0xa0] sm:$0xff]  ;;  %v47_v2 = vld [vmem:[%s7237_s0 + $0xa8] sm:$0xff]  ;;  %v5823_v3 = vpack.c.bf16 %v45_v63, %v44_v62  ;;  %v48_v5 = vld [vmem:[%s7237_s0 + $0xb0] sm:$0xff] }
  0x14   :  { %4830 = vmatpush3.bf16.msra.mxu1 %v5473_v10  ;;  %4783 = vmatprep.subr.bf16.mxu0 %v5474_v11  ;;  %v5825_v4 = vpack.c.bf16 %v47_v2, %v46_v0  ;;  %v49_v6 = vld [vmem:[%s7237_s0 + $0xb8] sm:$0xff]  ;;  %v5497_v8 = vld [vmem:[%s7236_s1 + $0x130] sm:$0xff]   ;;  %v5498_v10 = vld [vmem:[%s7236_s1 + $0x128] sm:$0xff]  }
  0x15   :  { %4831 = vmatprep.subr.bf16.mxu1 %v5475_v12  ;;  %v5837_v7 = vpack.c.bf16 %v49_v6, %v48_v5  ;;  %v5502_v9 = vld [vmem:[%s7236_s1 + $0x170] sm:$0xff]   ;;  %v5511_v21 = vld [vmem:[%s7236_s1 + $0x140] sm:$0xff]   ;;  %v5512_v22 = vld [vmem:[%s7236_s1 + $0x1b8] sm:$0xff]  }
  0x16   :  { %v51_v26 = vld [vmem:[%s7237_s0 + $0xc8] sm:$0xff]  ;;  %v52_v27 = vld [vmem:[%s7237_s0 + $0xd0] sm:$0xff]  ;;  %v54_v31 = vld [vmem:[%s7237_s0 + $0xe0] sm:$0xff] }
  0x17   :  { %4784 = vmatpush3.bf16.msra.mxu0 %v5474_v11  ;;  %v5504_v11 = vld [vmem:[%s7236_s1 + $0x168] sm:$0xff]   ;;  %v5513_v36 = vld [vmem:[%s7236_s1 + $0x1b0] sm:$0xff]   ;;  %v5516_v39 = vld [vmem:[%s7236_s1 + $0x198] sm:$0xff]  }
  0x18   :  { %4832 = vmatpush3.bf16.msra.mxu1 %v5475_v12  ;;  %4785 = vmatprep.subr.bf16.mxu0 %v5476_v13  ;;  %v5499_v12 = vld [vmem:[%s7236_s1 + $0x120] sm:$0xff]   ;;  %v5523_v40 = vld [vmem:[%s7236_s1 + $0x1d8] sm:$0xff]   ;;  %v5519_v41 = vld [vmem:[%s7236_s1 + $0x190] sm:$0xff]  }
  0x19   :  { %4833 = vmatprep.subr.bf16.mxu1 %v5477_v14  ;;  %v5525_v46 = vld [vmem:[%s7236_s1 + $0x180] sm:$0xff]   ;;  %v56_v49 = vld [vmem:[%s7237_s0 + $0xf0] sm:$0xff]  ;;  %v5530_v59 = vld [vmem:[%s7236_s1 + $0x228] sm:$0xff]  }
  0x1a   :  { %v5527_v47 = vld [vmem:[%s7236_s1 + $0x1c0] sm:$0xff]  }
  0x1b   :  { %4786 = vmatpush3.bf16.msra.mxu0 %v5476_v13  ;;  %v5505_v13 = vld [vmem:[%s7236_s1 + $0x160] sm:$0xff]  }
  0x1c   :  { %4834 = vmatpush3.bf16.msra.mxu1 %v5477_v14  ;;  %4787 = vmatprep.subr.bf16.mxu0 %v5478_v15  ;;  %v5500_v14 = vld [vmem:[%s7236_s1 + $0x118] sm:$0xff]  }
  0x1d   :  { %4835 = vmatprep.subr.bf16.mxu1 %v5479_v16 }
  0x1f   :  { %4788 = vmatpush3.bf16.msra.mxu0 %v5478_v15  ;;  %v5507_v15 = vld [vmem:[%s7236_s1 + $0x158] sm:$0xff]  }
  0x20   :  { %4836 = vmatpush3.bf16.msra.mxu1 %v5479_v16  ;;  %4869 = vmatprep.subr.bf16.mxu0 %v5480_v17  ;;  %v5503_v16 = vld [vmem:[%s7236_s1 + $0x110] sm:$0xff]  }
  0x21   :  { %4917 = vmatprep.subr.bf16.mxu1 %v5485_v18 }
  0x22   :  { %4790 = vmatmul.mubr.bf16.vlgmr.msra.gmra.mxu0 %v7242_v1 }
  0x23   :  { %4838 = vmatmul.mubr.bf16.vlgmr.msra.gmra.mxu1 %v7242_v1  ;;  %4870 = vmatpush3.bf16.msra.mxu0 %v5480_v17  ;;  %v5508_v17 = vld [vmem:[%s7236_s1 + $0x150] sm:$0xff]  }
  0x24   :  { %4793 = vmatprep.mubr.bf16.mxu0 %v7242_v1  ;;  %4841 = vmatprep.mubr.bf16.mxu1 %v7242_v1 }
  0x25   :  { %4871 = vmatprep.subr.bf16.mxu0 %v5481_v19  ;;  %4918 = vmatpush3.bf16.msra.mxu1 %v5485_v18  ;;  %v5506_v18 = vld [vmem:[%s7236_s1 + $0x108] sm:$0xff]  }
  0x26   :  { %4919 = vmatprep.subr.bf16.mxu1 %v5486_v20 }
  0x27   :  { %4872 = vmatpush3.bf16.msra.mxu0 %v5481_v19  ;;  %v5510_v19 = vld [vmem:[%s7236_s1 + $0x148] sm:$0xff]  }
  0x28   :  { %4873 = vmatprep.subr.bf16.mxu0 %v5482_v23 }
  0x29   :  { %4920 = vmatpush3.bf16.msra.mxu1 %v5486_v20  ;;  %v5509_v20 = vld [vmem:[%s7236_s1 + $0x100] sm:$0xff]  }
  0x2a   :  { %4794 = vmatmul.mubr.bf16.gmra.mxu0 %v7242_v1  ;;  %4921 = vmatprep.subr.bf16.mxu1 %v5488_v24 }
  0x2b   :  { %4842 = vmatmul.mubr.bf16.gmra.mxu1 %v7242_v1  ;;  %4797 = vmatprep.mubr.bf16.mxu0 %v5689_v25 }
  0x2c   :  { %4845 = vmatprep.mubr.bf16.mxu1 %v7242_v1  ;;  %4874 = vmatpush3.bf16.msra.mxu0 %v5482_v23  ;;  %v5517_v23 = vld [vmem:[%s7236_s1 + $0x1f8] sm:$0xff]  }
  0x2d   :  { %4875 = vmatprep.subr.bf16.mxu0 %v5483_v28  ;;  %4922 = vmatpush3.bf16.msra.mxu1 %v5488_v24  ;;  %v50_v24 = vld [vmem:[%s7237_s0 + $0xc0] sm:$0xff] }
  0x2e   :  { %4923 = vmatprep.subr.bf16.mxu1 %v5489_v29 }
  0x30   :  { %4876 = vmatpush3.bf16.msra.mxu0 %v5483_v28  ;;  %v53_v28 = vld [vmem:[%s7237_s0 + $0xd8] sm:$0xff] }
  0x31   :  { %4877 = vmatprep.subr.bf16.mxu0 %v5484_v32  ;;  %4924 = vmatpush3.bf16.msra.mxu1 %v5489_v29  ;;  %v5927_v29 = vpack.c.bf16 %v51_v26, %v50_v24  ;;  %v5929_v30 = vpack.c.bf16 %v53_v28, %v52_v27 }
  0x32   :  { %4798 = vmatmul.mubr.bf16.gmra.mxu0 %v5716_v33  ;;  %4925 = vmatprep.subr.bf16.mxu1 %v5491_v34 }
  0x33   :  { %4846 = vmatmul.mubr.bf16.gmra.mxu1 %v5689_v25  ;;  %4801 = vmatprep.mubr.bf16.mxu0 %v5721_v35 }
  0x34   :  { %4849 = vmatprep.mubr.bf16.mxu1 %v5716_v33  ;;  %4878 = vmatpush3.bf16.msra.mxu0 %v5484_v32  ;;  %v55_v32 = vld [vmem:[%s7237_s0 + $0xe8] sm:$0xff] }
  0x35   :  { %4879 = vmatprep.subr.bf16.mxu0 %v5487_v37  ;;  %4926 = vmatpush3.bf16.msra.mxu1 %v5491_v34  ;;  %v5941_v34 = vpack.c.bf16 %v55_v32, %v54_v31  ;;  %v5534_v32 = vld [vmem:[%s7236_s1 + $0x208] sm:$0xff]  }
  0x36   :  { %4927 = vmatprep.subr.bf16.mxu1 %v5492_v38 }
  0x38   :  { %4880 = vmatpush3.bf16.msra.mxu0 %v5487_v37  ;;  %v5518_v37 = vld [vmem:[%s7236_s1 + $0x1f0] sm:$0xff]  }
  0x39   :  { %4881 = vmatprep.subr.bf16.mxu0 %v5490_v42  ;;  %4928 = vmatpush3.bf16.msra.mxu1 %v5492_v38  ;;  %v5515_v38 = vld [vmem:[%s7236_s1 + $0x1a0] sm:$0xff]  }
  0x3a   :  { %4802 = vmatmul.mubr.bf16.gmra.mxu0 %v5748_v43  ;;  %4929 = vmatprep.subr.bf16.mxu1 %v5494_v44 }
  0x3b   :  { %4850 = vmatmul.mubr.bf16.gmra.mxu1 %v5721_v35  ;;  %4805 = vmatprep.mubr.bf16.mxu0 %v5753_v45 }
  0x3c   :  { %4853 = vmatprep.mubr.bf16.mxu1 %v7242_v1  ;;  %4882 = vmatpush3.bf16.msra.mxu0 %v5490_v42  ;;  %v5524_v42 = vld [vmem:[%s7236_s1 + $0x1d0] sm:$0xff]  }
  0x3d   :  { %4883 = vmatprep.subr.bf16.mxu0 %v5493_v48  ;;  %4930 = vmatpush3.bf16.msra.mxu1 %v5494_v44  ;;  %v5526_v44 = vld [vmem:[%s7236_s1 + $0x1c8] sm:$0xff]  }
  0x3e   :  { %4931 = vmatprep.subr.bf16.mxu1 %v5495_v50 }
  0x40   :  { %4884 = vmatpush3.bf16.msra.mxu0 %v5493_v48  ;;  %v5528_v48 = vld [vmem:[%s7236_s1 + $0x238] sm:$0xff]  }
  0x41   :  { %4932 = vmatpush3.bf16.msra.mxu1 %v5495_v50  ;;  %4965 = vmatprep.subr.bf16.mxu0 %v5496_v52  ;;  %v57_v50 = vld [vmem:[%s7237_s0 + $0xf8] sm:$0xff] }
  0x42   :  { %4806 = vmatmul.mubr.bf16.gmra.mxu0 %v5783_v54  ;;  %5013 = vmatprep.subr.bf16.mxu1 %v5501_v53  ;;  %v6022_v51 = vpack.c.bf16 %v57_v50, %v56_v49 }
  0x43   :  { %4854 = vmatmul.mubr.bf16.gmra.mxu1 %v5753_v45  ;;  %4809 = vmatprep.mubr.bf16.mxu0 %v5785_v55 }
  0x44   :  { %4857 = vmatprep.mubr.bf16.mxu1 %v5783_v54 }
  0x4a   :  { %4810 = vmatmul.mubr.bf16.gmra.mxu0 %v5803_v60 }
  0x4b   :  { %4858 = vmatmul.mubr.bf16.gmra.mxu1 %v5785_v55  ;;  %4813 = vmatprep.mubr.bf16.mxu0 %v5805_v61 }
  0x4c   :  { %4861 = vmatprep.mubr.bf16.mxu1 %v7242_v1 }
  0x52   :  { %4814 = vmatmul.mubr.bf16.gmra.mxu0 %v5823_v3 }
  0x53   :  { %4862 = vmatmul.mubr.bf16.gmra.mxu1 %v5805_v61  ;;  %4817 = vmatprep.mubr.bf16.mxu0 %v5825_v4 }
  0x54   :  { %4865 = vmatprep.mubr.bf16.mxu1 %v5823_v3 }
  0x5a   :  { %4818 = vmatmul.mubr.bf16.gmra.mxu0 %v5837_v7 }
  0x5b   :  { %4866 = vmatmul.mubr.bf16.gmra.mxu1 %v5825_v4  ;;  %4885 = vmatprep.mubr.bf16.mxu0 %v7242_v1 }
  0x5c   :  { %4933 = vmatprep.mubr.bf16.mxu1 %v7242_v1 }
  0x62   :  { %4886 = vmatmul.mubr.bf16.vlgmr.msra.gmra.mxu0 %v7242_v1 }
  0x63   :  { %4966 = vmatpush3.bf16.msra.mxu0 %v5496_v52  ;;  %4934 = vmatmul.mubr.bf16.vlgmr.msra.gmra.mxu1 %v5689_v25  ;;  %v5529_v52 = vld [vmem:[%s7236_s1 + $0x230] sm:$0xff]  }
  0x64   :  { %4889 = vmatprep.mubr.bf16.mxu0 %v7242_v1  ;;  %4967 = vmatprep.subr.bf16.mxu0 %v5497_v8 }
  0x65   :  { %4937 = vmatprep.mubr.bf16.mxu1 %v5716_v33  ;;  %5014 = vmatpush3.bf16.msra.mxu1 %v5501_v53 }
  0x66   :  { %5015 = vmatprep.subr.bf16.mxu1 %v5502_v9 }
  0x67   :  { %4968 = vmatpush3.bf16.msra.mxu0 %v5497_v8  ;;  %v5531_v8 = vld [vmem:[%s7236_s1 + $0x220] sm:$0xff]  }
  0x68   :  { %4969 = vmatprep.subr.bf16.mxu0 %v5498_v10 }
  0x69   :  { %5016 = vmatpush3.bf16.msra.mxu1 %v5502_v9 }
  0x6a   :  { %4890 = vmatmul.mubr.bf16.gmra.mxu0 %v7242_v1  ;;  %5017 = vmatprep.subr.bf16.mxu1 %v5504_v11 }
  0x6b   :  { %4938 = vmatmul.mubr.bf16.gmra.mxu1 %v5721_v35  ;;  %4893 = vmatprep.mubr.bf16.mxu0 %v5716_v33 }
  0x6c   :  { %4941 = vmatprep.mubr.bf16.mxu1 %v7242_v1  ;;  %4970 = vmatpush3.bf16.msra.mxu0 %v5498_v10 }
  0x6d   :  { %4971 = vmatprep.subr.bf16.mxu0 %v5499_v12  ;;  %5018 = vmatpush3.bf16.msra.mxu1 %v5504_v11 }
  0x6e   :  { %5019 = vmatprep.subr.bf16.mxu1 %v5505_v13 }
  0x70   :  { %4972 = vmatpush3.bf16.msra.mxu0 %v5499_v12 }
  0x71   :  { %4973 = vmatprep.subr.bf16.mxu0 %v5500_v14  ;;  %5020 = vmatpush3.bf16.msra.mxu1 %v5505_v13 }
  0x72   :  { %4894 = vmatmul.mubr.bf16.gmra.mxu0 %v5721_v35  ;;  %5021 = vmatprep.subr.bf16.mxu1 %v5507_v15 }
  0x73   :  { %4942 = vmatmul.mubr.bf16.gmra.mxu1 %v5753_v45  ;;  %4897 = vmatprep.mubr.bf16.mxu0 %v5748_v43 }
  0x74   :  { %4945 = vmatprep.mubr.bf16.mxu1 %v5783_v54  ;;  %4974 = vmatpush3.bf16.msra.mxu0 %v5500_v14 }
  0x75   :  { %4975 = vmatprep.subr.bf16.mxu0 %v5503_v16  ;;  %5022 = vmatpush3.bf16.msra.mxu1 %v5507_v15  ;;  %v5532_v15 = vld [vmem:[%s7236_s1 + $0x218] sm:$0xff]  }
  0x76   :  { %5023 = vmatprep.subr.bf16.mxu1 %v5508_v17 }
  0x78   :  { %4976 = vmatpush3.bf16.msra.mxu0 %v5503_v16 }
  0x79   :  { %4977 = vmatprep.subr.bf16.mxu0 %v5506_v18  ;;  %5024 = vmatpush3.bf16.msra.mxu1 %v5508_v17 }
  0x7a   :  { %4898 = vmatmul.mubr.bf16.gmra.mxu0 %v7242_v1  ;;  %5025 = vmatprep.subr.bf16.mxu1 %v5510_v19 }
  0x7b   :  { %4946 = vmatmul.mubr.bf16.gmra.mxu1 %v5785_v55  ;;  %4901 = vmatprep.mubr.bf16.mxu0 %v5783_v54 }
  0x7c   :  { %4949 = vmatprep.mubr.bf16.mxu1 %v7242_v1  ;;  %4978 = vmatpush3.bf16.msra.mxu0 %v5506_v18 }
  0x7d   :  { %4979 = vmatprep.subr.bf16.mxu0 %v5509_v20  ;;  %5026 = vmatpush3.bf16.msra.mxu1 %v5510_v19 }
  0x7e   :  { %5027 = vmatprep.subr.bf16.mxu1 %v5511_v21 }
  0x80   :  { %4980 = vmatpush3.bf16.msra.mxu0 %v5509_v20 }
  0x81   :  { %5028 = vmatpush3.bf16.msra.mxu1 %v5511_v21  ;;  %5061 = vmatprep.subr.bf16.mxu0 %v5512_v22 }
  0x82   :  { %4902 = vmatmul.mubr.bf16.gmra.mxu0 %v5785_v55  ;;  %5109 = vmatprep.subr.bf16.mxu1 %v5517_v23 }
  0x83   :  { %4950 = vmatmul.mubr.bf16.gmra.mxu1 %v5805_v61  ;;  %4905 = vmatprep.mubr.bf16.mxu0 %v5803_v60 }
  0x84   :  { %4953 = vmatprep.mubr.bf16.mxu1 %v5823_v3 }
  0x8a   :  { %4906 = vmatmul.mubr.bf16.gmra.mxu0 %v7242_v1 }
  0x8b   :  { %4954 = vmatmul.mubr.bf16.gmra.mxu1 %v5825_v4  ;;  %4909 = vmatprep.mubr.bf16.mxu0 %v5823_v3 }
  0x8c   :  { %4957 = vmatprep.mubr.bf16.mxu1 %v7242_v1 }
  0x92   :  { %4910 = vmatmul.mubr.bf16.gmra.mxu0 %v5825_v4 }
  0x93   :  { %4958 = vmatmul.mubr.bf16.gmra.mxu1 %v5927_v29  ;;  %4913 = vmatprep.mubr.bf16.mxu0 %v5837_v7 }
  0x94   :  { %4961 = vmatprep.mubr.bf16.mxu1 %v5929_v30 }
  0x9a   :  { %4914 = vmatmul.mubr.bf16.gmra.mxu0 %v7242_v1 }
  0x9b   :  { %4962 = vmatmul.mubr.bf16.gmra.mxu1 %v5941_v34  ;;  %4981 = vmatprep.mubr.bf16.mxu0 %v5689_v25  ;;  %v5514_v25 = vld [vmem:[%s7236_s1 + $0x1a8] sm:$0xff]  }
  0x9c   :  { %5029 = vmatprep.mubr.bf16.mxu1 %v5716_v33 }
  0xa2   :  { %4982 = vmatmul.mubr.bf16.vlgmr.msra.gmra.mxu0 %v5716_v33  ;;  %v5520_v33 = vld [vmem:[%s7236_s1 + $0x1e8] sm:$0xff]  }
  0xa3   :  { %5062 = vmatpush3.bf16.msra.mxu0 %v5512_v22  ;;  %5030 = vmatmul.mubr.bf16.vlgmr.msra.gmra.mxu1 %v5721_v35  ;;  %v5533_v22 = vld [vmem:[%s7236_s1 + $0x210] sm:$0xff]  }
  0xa4   :  { %4985 = vmatprep.mubr.bf16.mxu0 %v5721_v35  ;;  %5063 = vmatprep.subr.bf16.mxu0 %v5513_v36  ;;  %v5521_v35 = vld [vmem:[%s7236_s1 + $0x1e0] sm:$0xff]  }
  0xa5   :  { %5033 = vmatprep.mubr.bf16.mxu1 %v5748_v43  ;;  %5110 = vmatpush3.bf16.msra.mxu1 %v5517_v23 }
  0xa6   :  { %5111 = vmatprep.subr.bf16.mxu1 %v5518_v37 }
  0xa7   :  { %5064 = vmatpush3.bf16.msra.mxu0 %v5513_v36 }
  0xa8   :  { %5065 = vmatprep.subr.bf16.mxu0 %v5514_v25 }
  0xa9   :  { %5112 = vmatpush3.bf16.msra.mxu1 %v5518_v37 }
  0xaa   :  { %4986 = vmatmul.mubr.bf16.gmra.mxu0 %v5748_v43  ;;  %5113 = vmatprep.subr.bf16.mxu1 %v5520_v33  ;;  %v5522_v43 = vld [vmem:[%s7236_s1 + $0x188] sm:$0xff]  }
  0xab   :  { %5034 = vmatmul.mubr.bf16.gmra.mxu1 %v7242_v1  ;;  %4989 = vmatprep.mubr.bf16.mxu0 %v5753_v45 }
  0xac   :  { %5037 = vmatprep.mubr.bf16.mxu1 %v5783_v54  ;;  %5066 = vmatpush3.bf16.msra.mxu0 %v5514_v25 }
  0xad   :  { %5067 = vmatprep.subr.bf16.mxu0 %v5515_v38  ;;  %5114 = vmatpush3.bf16.msra.mxu1 %v5520_v33 }
  0xae   :  { %5115 = vmatprep.subr.bf16.mxu1 %v5521_v35 }
  0xb0   :  { %5068 = vmatpush3.bf16.msra.mxu0 %v5515_v38 }
  0xb1   :  { %5069 = vmatprep.subr.bf16.mxu0 %v5516_v39  ;;  %5116 = vmatpush3.bf16.msra.mxu1 %v5521_v35  ;;  %v5535_v35 = vld [vmem:[%s7236_s1 + $0x200] sm:$0xff]  }
  0xb2   :  { %4990 = vmatmul.mubr.bf16.gmra.mxu0 %v5783_v54  ;;  %5117 = vmatprep.subr.bf16.mxu1 %v5523_v40 }
  0xb3   :  { %5038 = vmatmul.mubr.bf16.gmra.mxu1 %v5785_v55  ;;  %4993 = vmatprep.mubr.bf16.mxu0 %v5785_v55 }
  0xb4   :  { %5041 = vmatprep.mubr.bf16.mxu1 %v5803_v60  ;;  %5070 = vmatpush3.bf16.msra.mxu0 %v5516_v39 }
  0xb5   :  { %5071 = vmatprep.subr.bf16.mxu0 %v5519_v41  ;;  %5118 = vmatpush3.bf16.msra.mxu1 %v5523_v40 }
  0xb6   :  { %5119 = vmatprep.subr.bf16.mxu1 %v5524_v42 }
  0xb8   :  { %5072 = vmatpush3.bf16.msra.mxu0 %v5519_v41 }
  0xb9   :  { %5073 = vmatprep.subr.bf16.mxu0 %v5522_v43  ;;  %5120 = vmatpush3.bf16.msra.mxu1 %v5524_v42 }
  0xba   :  { %4994 = vmatmul.mubr.bf16.gmra.mxu0 %v5803_v60  ;;  %5121 = vmatprep.subr.bf16.mxu1 %v5526_v44 }
  0xbb   :  { %5042 = vmatmul.mubr.bf16.gmra.mxu1 %v7242_v1  ;;  %4997 = vmatprep.mubr.bf16.mxu0 %v5805_v61 }
  0xbc   :  { %5045 = vmatprep.mubr.bf16.mxu1 %v5823_v3  ;;  %5074 = vmatpush3.bf16.msra.mxu0 %v5522_v43 }
  0xbd   :  { %5075 = vmatprep.subr.bf16.mxu0 %v5525_v46  ;;  %5122 = vmatpush3.bf16.msra.mxu1 %v5526_v44 }
  0xbe   :  { %5123 = vmatprep.subr.bf16.mxu1 %v5527_v47 }
  0xc0   :  { %5076 = vmatpush3.bf16.msra.mxu0 %v5525_v46 }
  0xc1   :  { %5124 = vmatpush3.bf16.msra.mxu1 %v5527_v47  ;;  %5157 = vmatprep.subr.bf16.mxu0 %v5528_v48 }
  0xc2   :  { %4998 = vmatmul.mubr.bf16.gmra.mxu0 %v5823_v3 }
  0xc3   :  { %5046 = vmatmul.mubr.bf16.gmra.mxu1 %v5825_v4  ;;  %5001 = vmatprep.mubr.bf16.mxu0 %v5825_v4 }
  0xc4   :  { %5049 = vmatprep.mubr.bf16.mxu1 %v5837_v7 }
  0xca   :  { %5002 = vmatmul.mubr.bf16.gmra.mxu0 %v5837_v7 }
  0xcb   :  { %5050 = vmatmul.mubr.bf16.gmra.mxu1 %v7242_v1  ;;  %5005 = vmatprep.mubr.bf16.mxu0 %v5927_v29 }
  0xcc   :  { %5053 = vmatprep.mubr.bf16.mxu1 %v5929_v30 }
  0xd2   :  { %5006 = vmatmul.mubr.bf16.gmra.mxu0 %v5929_v30 }
  0xd3   :  { %5054 = vmatmul.mubr.bf16.gmra.mxu1 %v5941_v34  ;;  %5009 = vmatprep.mubr.bf16.mxu0 %v5941_v34 }
  0xd4   :  { %5057 = vmatprep.mubr.bf16.mxu1 %v6022_v51 }
  0xda   :  { %5010 = vmatmul.mubr.bf16.gmra.mxu0 %v6022_v51 }
  0xdb   :  { %5058 = vmatmul.mubr.bf16.gmra.mxu1 %v7242_v1  ;;  %5077 = vmatprep.mubr.bf16.mxu0 %v7242_v1 }
  0xdc   :  { %5125 = vmatprep.mubr.bf16.mxu1 %v5753_v45 }
  0xe2   :  { %v4791_v53 = vpop.f32.mrf.mxu0  ;;  %5078 = vmatmul.mubr.bf16.vlgmr.msra.gmra.mxu0 %v5753_v45 }
  0xe3   :  { %v4839_v56 = vpop.f32.mrf.mxu1  ;;  %5158 = vmatpush3.bf16.msra.mxu0 %v5528_v48  ;;  %5126 = vmatmul.mubr.bf16.vlgmr.msra.gmra.mxu1 %v5783_v54 }
  0xe4   :  { %v6037_v57 = vadd.f32 %v4839_v56, %v4791_v53  ;;  %v186_v58 = vpop.f32.mrf.mxu0  ;;  %5081 = vmatprep.mubr.bf16.mxu0 %v5783_v54  ;;  %5159 = vmatprep.subr.bf16.mxu0 %v5529_v52 }
  0xe5   :  { %v395_v62 = vpop.f32.mrf.mxu1  ;;  %5129 = vmatprep.mubr.bf16.mxu1 %v5785_v55 }
  0xe6   :  { %v6044_v63 = vadd.f32 %v395_v62, %v186_v58  ;;  %v4792_v45 = vpop.f32.mrf.mxu0 }
  0xe7   :  { %v4840_v0 = vpop.f32.mrf.mxu1  ;;  %5160 = vmatpush3.bf16.msra.mxu0 %v5529_v52 }
  0xe8   :  { %v6046_v2 = vadd.f32 %v4840_v0, %v4792_v45  ;;  %v189_v5 = vpop.f32.mrf.mxu0  ;;  %5161 = vmatprep.subr.bf16.mxu0 %v5530_v59 }
  0xe9   :  { %v398_v6 = vpop.f32.mrf.mxu1 }
  0xea   :  { %v6051_v9 = vadd.f32 %v398_v6, %v189_v5  ;;  %v4795_v10 = vpop.f32.mrf.mxu0  ;;  %5082 = vmatmul.mubr.bf16.gmra.mxu0 %v5785_v55 }
  0xeb   :  { %v4843_v11 = vpop.f32.mrf.mxu1  ;;  %5130 = vmatmul.mubr.bf16.gmra.mxu1 %v5803_v60  ;;  %5085 = vmatprep.mubr.bf16.mxu0 %v7242_v1 }
  0xec   :  { %v6056_v12 = vadd.f32 %v4843_v11, %v4795_v10  ;;  %v202_v13 = vpop.f32.mrf.mxu0  ;;  %5133 = vmatprep.mubr.bf16.mxu1 %v5805_v61  ;;  %5162 = vmatpush3.bf16.msra.mxu0 %v5530_v59 }
  0xed   :  { %v411_v14 = vpop.f32.mrf.mxu1  ;;  %5163 = vmatprep.subr.bf16.mxu0 %v5531_v8 }
  0xee   :  { %v6062_v16 = vadd.f32 %v411_v14, %v202_v13  ;;  %v4796_v17 = vpop.f32.mrf.mxu0 }
  0xef   :  { %v4844_v18 = vpop.f32.mrf.mxu1 }
  0xf0   :  { %v6064_v19 = vadd.f32 %v4844_v18, %v4796_v17  ;;  %v205_v20 = vpop.f32.mrf.mxu0  ;;  %5164 = vmatpush3.bf16.msra.mxu0 %v5531_v8 }
  0xf1   :  { %v414_v21 = vpop.f32.mrf.mxu1  ;;  %5165 = vmatprep.subr.bf16.mxu0 %v5532_v15 }
  0xf2   :  { %v6069_v23 = vadd.f32 %v414_v21, %v205_v20  ;;  %v4799_v24 = vpop.f32.mrf.mxu0  ;;  %5086 = vmatmul.mubr.bf16.gmra.mxu0 %v5805_v61 }
  0xf3   :  { %v4847_v26 = vpop.f32.mrf.mxu1  ;;  %5134 = vmatmul.mubr.bf16.gmra.mxu1 %v5823_v3  ;;  %5089 = vmatprep.mubr.bf16.mxu0 %v5823_v3 }
  0xf4   :  { %v6074_v27 = vadd.f32 %v4847_v26, %v4799_v24  ;;  %v218_v28 = vpop.f32.mrf.mxu0  ;;  %5137 = vmatprep.mubr.bf16.mxu1 %v5825_v4  ;;  %5166 = vmatpush3.bf16.msra.mxu0 %v5532_v15 }
  0xf5   :  { %v427_v31 = vpop.f32.mrf.mxu1  ;;  %5167 = vmatprep.subr.bf16.mxu0 %v5533_v22 }
  0xf6   :  { %v6080_v36 = vadd.f32 %v427_v31, %v218_v28  ;;  %v4800_v61 = vpop.f32.mrf.mxu0 }
  0xf7   :  { %v4848_v37 = vpop.f32.mrf.mxu1 }
  0xf8   :  { %v6082_v25 = vadd.f32 %v4848_v37, %v4800_v61  ;;  %v221_v33 = vpop.f32.mrf.mxu0  ;;  %5168 = vmatpush3.bf16.msra.mxu0 %v5533_v22 }
  0xf9   :  { %v430_v38 = vpop.f32.mrf.mxu1  ;;  %5169 = vmatprep.subr.bf16.mxu0 %v5534_v32 }
  0xfa   :  { %v6087_v39 = vadd.f32 %v430_v38, %v221_v33  ;;  %v4803_v40 = vpop.f32.mrf.mxu0  ;;  %5090 = vmatmul.mubr.bf16.gmra.mxu0 %v5825_v4 }
  0xfb   :  { %v4851_v41 = vpop.f32.mrf.mxu1  ;;  %5138 = vmatmul.mubr.bf16.gmra.mxu1 %v5837_v7  ;;  %5093 = vmatprep.mubr.bf16.mxu0 %v7242_v1 }
  0xfc   :  { %v6092_v42 = vadd.f32 %v4851_v41, %v4803_v40  ;;  %v234_v43 = vpop.f32.mrf.mxu0  ;;  %5141 = vmatprep.mubr.bf16.mxu1 %v5927_v29  ;;  %5170 = vmatpush3.bf16.msra.mxu0 %v5534_v32 }
  0xfd   :  { %v443_v44 = vpop.f32.mrf.mxu1  ;;  %5171 = vmatprep.subr.bf16.mxu0 %v5535_v35 }
  0xfe   :  { %v6095_v46 = vadd.f32 %v443_v44, %v234_v43  ;;  %v4804_v47 = vpop.f32.mrf.mxu0 }
  0xff   :  { %v4852_v48 = vpop.f32.mrf.mxu1 }
 0x100   :  { %v6097_v49 = vadd.f32 %v4852_v48, %v4804_v47  ;;  %v237_v50 = vpop.f32.mrf.mxu0  ;;  %5172 = vmatpush3.bf16.msra.mxu0 %v5535_v35 }
 0x101   :  { %v446_v52 = vpop.f32.mrf.mxu1 }
 0x102   :  { %v6099_v53 = vadd.f32 %v446_v52, %v237_v50  ;;  %v4807_v56 = vpop.f32.mrf.mxu0  ;;  %5094 = vmatmul.mubr.bf16.gmra.mxu0 %v5927_v29 }
 0x103   :  { %v4855_v58 = vpop.f32.mrf.mxu1  ;;  %5142 = vmatmul.mubr.bf16.gmra.mxu1 %v5929_v30  ;;  %5097 = vmatprep.mubr.bf16.mxu0 %v5929_v30 }
 0x104   :  { %v6104_v59 = vadd.f32 %v4855_v58, %v4807_v56  ;;  %v250_v62 = vpop.f32.mrf.mxu0  ;;  %5145 = vmatprep.mubr.bf16.mxu1 %v5941_v34 }
 0x105   :  { %v459_v45 = vpop.f32.mrf.mxu1 }
 0x106   :  { %v6107_v0 = vadd.f32 %v459_v45, %v250_v62  ;;  %v4808_v5 = vpop.f32.mrf.mxu0 }
 0x107   :  { %v4856_v6 = vpop.f32.mrf.mxu1 }
 0x108   :  { %v6109_v8 = vadd.f32 %v4856_v6, %v4808_v5  ;;  %v6111_v10 = vpop.f32.mrf.mxu0 }
 0x109   :  { %v6113_v29 = vpop.f32.mrf.mxu1 }
 0x10a   :  { %v4811_v11 = vpop.f32.mrf.mxu0  ;;  %5098 = vmatmul.mubr.bf16.gmra.mxu0 %v5941_v34 }
 0x10b   :  { %v4859_v13 = vpop.f32.mrf.mxu1  ;;  %5146 = vmatmul.mubr.bf16.gmra.mxu1 %v6022_v51  ;;  %5101 = vmatprep.mubr.bf16.mxu0 %v7242_v1 }
 0x10c   :  { %v6118_v14 = vadd.f32 %v4859_v13, %v4811_v11  ;;  %v266_v15 = vpop.f32.mrf.mxu0  ;;  %5149 = vmatprep.mubr.bf16.mxu1 %v7242_v1 }
 0x10d   :  { %v475_v17 = vpop.f32.mrf.mxu1 }
 0x10e   :  { %v6121_v18 = vadd.f32 %v475_v17, %v266_v15  ;;  %v4812_v20 = vpop.f32.mrf.mxu0 }
 0x10f   :  { %v4860_v21 = vpop.f32.mrf.mxu1 }
 0x110   :  { %v6123_v22 = vadd.f32 %v4860_v21, %v4812_v20  ;;  %v6125_v24 = vpop.f32.mrf.mxu0 }
 0x111   :  { %v6127_v26 = vpop.f32.mrf.mxu1 }
 0x112   :  { %v4815_v28 = vpop.f32.mrf.mxu0  ;;  %5102 = vmatmul.mubr.bf16.gmra.mxu0 %v7242_v1 }
 0x113   :  { %v4863_v31 = vpop.f32.mrf.mxu1  ;;  %5150 = vmatmul.mubr.bf16.gmra.mxu1 %v7242_v1  ;;  %5105 = vmatprep.mubr.bf16.mxu0 %v7242_v1 }
 0x114   :  { %v6132_v32 = vadd.f32 %v4863_v31, %v4815_v28  ;;  %v282_v61 = vpop.f32.mrf.mxu0  ;;  %5153 = vmatprep.mubr.bf16.mxu1 %v7242_v1 }
 0x115   :  { %v491_v37 = vpop.f32.mrf.mxu1 }
 0x116   :  { %v6135_v33 = vadd.f32 %v491_v37, %v282_v61  ;;  %v4816_v38 = vpop.f32.mrf.mxu0 }
 0x117   :  { %v4864_v35 = vpop.f32.mrf.mxu1 }
 0x118   :  { %v6137_v40 = vadd.f32 %v4864_v35, %v4816_v38  ;;  %v6139_v41 = vpop.f32.mrf.mxu0 }
 0x119   :  { %v6141_v43 = vpop.f32.mrf.mxu1 }
 0x11a   :  { %v4819_v44 = vpop.f32.mrf.mxu0  ;;  %5106 = vmatmul.mubr.bf16.gmra.mxu0 %v7242_v1 }
 0x11b   :  { %v4867_v47 = vpop.f32.mrf.mxu1  ;;  %5154 = vmatmul.mubr.bf16.gmra.mxu1 %v7242_v1  ;;  %5173 = vmatprep.mubr.bf16.mxu0 %v5783_v54 }
 0x11c   :  { %v6146_v48 = vadd.f32 %v4867_v47, %v4819_v44  ;;  %v298_v50 = vpop.f32.mrf.mxu0  ;;  %5213 = vmatprep.mubr.bf16.mxu1 %v7242_v1 }
 0x11d   :  { %v507_v52 = vpop.f32.mrf.mxu1 }
 0x11e   :  { %v6149_v56 = vadd.f32 %v507_v52, %v298_v50  ;;  %v4820_v58 = vpop.f32.mrf.mxu0 }
 0x11f   :  { %v4868_v62 = vpop.f32.mrf.mxu1 }
 0x120   :  { %v6151_v45 = vadd.f32 %v4868_v62, %v4820_v58  ;;  %v6153_v5 = vpop.f32.mrf.mxu0 }
 0x121   :  { %v6155_v6 = vpop.f32.mrf.mxu1 }
 0x122   :  { %v4887_v11 = vpop.f32.mrf.mxu0  ;;  %5174 = vmatmul.mubr.bf16.vlgmr.msra.gmra.mxu0 %v5785_v55 }
 0x123   :  { %v750_v54 = vadd.f32 %v4887_v11, %v6037_v57  ;;  %v4935_v13 = vpop.f32.mrf.mxu1  ;;  %5177 = vmatprep.mubr.bf16.mxu0 %v5803_v60 }
 0x124   :  { %v621_v15 = vpop.f32.mrf.mxu0 }
 0x125   :  { %v748_v17 = vadd.f32 %v621_v15, %v6044_v63  ;;  %v6161_v20 = vadd.f32 %v4935_v13, %v750_v54  ;;  %v882_v21 = vpop.f32.mrf.mxu1 }
 0x126   :  { %v4888_v28 = vpop.f32.mrf.mxu0 }
 0x127   :  { %v751_v31 = vadd.f32 %v4888_v28, %v6046_v2  ;;  %v6164_v61 = vadd.f32 %v882_v21, %v748_v17  ;;  %v4936_v37 = vpop.f32.mrf.mxu1 }
 0x128   :  { %v624_v38 = vpop.f32.mrf.mxu0 }
 0x129   :  { %v6167_v55 = vadd.f32 %v624_v38, %v6051_v9  ;;  %v6169_v57 = vadd.f32 %v4936_v37, %v751_v31  ;;  %v6171_v35 = vpop.f32.mrf.mxu1 }
 0x12a   :  { %v4891_v60 = vpop.f32.mrf.mxu0  ;;  %5178 = vmatmul.mubr.bf16.gmra.mxu0 %v7242_v1 }
 0x12b   :  { %v754_v63 = vadd.f32 %v4891_v60, %v6056_v12  ;;  %v4939_v44 = vpop.f32.mrf.mxu1  ;;  %5181 = vmatprep.mubr.bf16.mxu0 %v5823_v3 }
 0x12c   :  { %v637_v2 = vpop.f32.mrf.mxu0 }
 0x12d   :  { %v752_v47 = vadd.f32 %v637_v2, %v6062_v16  ;;  %v6177_v50 = vadd.f32 %v4939_v44, %v754_v63  ;;  %v898_v52 = vpop.f32.mrf.mxu1 }
 0x12e   :  { %v4892_v9 = vpop.f32.mrf.mxu0 }
 0x12f   :  { %v755_v58 = vadd.f32 %v4892_v9, %v6064_v19  ;;  %v6180_v62 = vadd.f32 %v898_v52, %v752_v47  ;;  %v4940_v11 = vpop.f32.mrf.mxu1 }
 0x130   :  { %v640_v54 = vpop.f32.mrf.mxu0 }
 0x131   :  { %v6183_v13 = vadd.f32 %v640_v54, %v6069_v23  ;;  %v6185_v12 = vadd.f32 %v4940_v11, %v755_v58  ;;  %v6187_v15 = vpop.f32.mrf.mxu1 }
 0x132   :  { %v4895_v3 = vpop.f32.mrf.mxu0  ;;  %5182 = vmatmul.mubr.bf16.gmra.mxu0 %v5825_v4 }
 0x133   :  { %v758_v16 = vadd.f32 %v4895_v3, %v6074_v27  ;;  %v4943_v17 = vpop.f32.mrf.mxu1  ;;  %5185 = vmatprep.mubr.bf16.mxu0 %v5837_v7 }
 0x134   :  { %v653_v19 = vpop.f32.mrf.mxu0 }
 0x135   :  { %v756_v21 = vadd.f32 %v653_v19, %v6080_v36  ;;  %v6193_v28 = vadd.f32 %v4943_v17, %v758_v16  ;;  %v914_v31 = vpop.f32.mrf.mxu1 }
 0x136   :  { %v4896_v23 = vpop.f32.mrf.mxu0 }
 0x137   :  { %v759_v37 = vadd.f32 %v4896_v23, %v6082_v25  ;;  %v6196_v38 = vadd.f32 %v914_v31, %v756_v21  ;;  %v4944_v60 = vpop.f32.mrf.mxu1 }
 0x138   :  { %v656_v63 = vpop.f32.mrf.mxu0 }
 0x139   :  { %v6199_v4 = vadd.f32 %v656_v63, %v6087_v39  ;;  %v6201_v27 = vadd.f32 %v4944_v60, %v759_v37  ;;  %v6203_v44 = vpop.f32.mrf.mxu1 }
 0x13a   :  { %7294 = vst [vmem:[#allocation3_spill] sm:$0xff] %v6203_v44  ;;  %v4899_v7 = vpop.f32.mrf.mxu0  ;;  %5186 = vmatmul.mubr.bf16.gmra.mxu0 %v7242_v1 }
 0x13b   :  { %7293 = vst [vmem:[#allocation2_spill] sm:$0xff] %v6199_v4  ;;  %v762_v36 = vadd.f32 %v4899_v7, %v6092_v42  ;;  %v4947_v2 = vpop.f32.mrf.mxu1  ;;  %5189 = vmatprep.mubr.bf16.mxu0 %v5929_v30 }
 0x13c   :  { %v669_v25 = vpop.f32.mrf.mxu0 }
 0x13d   :  { %v760_v47 = vadd.f32 %v669_v25, %v6095_v46  ;;  %v6209_v52 = vadd.f32 %v4947_v2, %v762_v36  ;;  %v930_v9 = vpop.f32.mrf.mxu1 }
 0x13e   :  { %v4900_v39 = vpop.f32.mrf.mxu0 }
 0x13f   :  { %v763_v58 = vadd.f32 %v4900_v39, %v6097_v49  ;;  %v6212_v11 = vadd.f32 %v930_v9, %v760_v47  ;;  %v4948_v54 = vpop.f32.mrf.mxu1 }
 0x140   :  { %v672_v3 = vpop.f32.mrf.mxu0 }
 0x141   :  { %v6215_v16 = vadd.f32 %v672_v3, %v6099_v53  ;;  %v6217_v42 = vadd.f32 %v4948_v54, %v763_v58  ;;  %v6219_v17 = vpop.f32.mrf.mxu1 }
 0x142   :  { %v4903_v30 = vpop.f32.mrf.mxu0  ;;  %5190 = vmatmul.mubr.bf16.gmra.mxu0 %v5941_v34  ;;  %v5536_v34 = vld [vmem:[%s7238_s2 + $0x38] sm:$0xff]  }
 0x143   :  { %v766_v46 = vadd.f32 %v4903_v30, %v6104_v59  ;;  %v4951_v19 = vpop.f32.mrf.mxu1  ;;  %5193 = vmatprep.mubr.bf16.mxu0 %v6022_v51  ;;  %5205 = vmatprep.subr.bf16.mxu1 %v5536_v34 }
 0x144   :  { %v685_v49 = vpop.f32.mrf.mxu0  ;;  %5206 = vmatpush3.bf16.msra.mxu1 %v5536_v34 }
 0x145   :  { %v764_v21 = vadd.f32 %v685_v49, %v6107_v0  ;;  %v6225_v31 = vadd.f32 %v4951_v19, %v766_v46  ;;  %v946_v23 = vpop.f32.mrf.mxu1 }
 0x146   :  { %v4904_v53 = vpop.f32.mrf.mxu0 }
 0x147   :  { %v767_v37 = vadd.f32 %v4904_v53, %v6109_v8  ;;  %v6228_v60 = vadd.f32 %v946_v23, %v764_v21  ;;  %v4952_v63 = vpop.f32.mrf.mxu1 }
 0x148   :  { %v6230_v7 = vpop.f32.mrf.mxu0 }
 0x149   :  { %v6235_v59 = vadd.f32 %v4952_v63, %v767_v37  ;;  %v6237_v51 = vpop.f32.mrf.mxu1 }
 0x14a   :  { %v4907_v0 = vpop.f32.mrf.mxu0  ;;  %5194 = vmatmul.mubr.bf16.gmra.mxu0 %v7242_v1 }
 0x14b   :  { %v770_v36 = vadd.f32 %v4907_v0, %v6118_v14  ;;  %v4955_v8 = vpop.f32.mrf.mxu1  ;;  %5197 = vmatprep.mubr.bf16.mxu0 %v7242_v1 }
 0x14c   :  { %v701_v2 = vpop.f32.mrf.mxu0 }
 0x14d   :  { %v768_v25 = vadd.f32 %v701_v2, %v6121_v18  ;;  %v6243_v47 = vadd.f32 %v4955_v8, %v770_v36  ;;  %v962_v9 = vpop.f32.mrf.mxu1  ;;  %v5537_v36 = vld [vmem:[%s7238_s2 + $0x30] sm:$0xff]  }
 0x14e   :  { %v4908_v39 = vpop.f32.mrf.mxu0  ;;  %5207 = vmatprep.subr.bf16.mxu1 %v5537_v36 }
 0x14f   :  { %v771_v58 = vadd.f32 %v4908_v39, %v6123_v22  ;;  %v6246_v54 = vadd.f32 %v962_v9, %v768_v25  ;;  %v4956_v3 = vpop.f32.mrf.mxu1  ;;  %5208 = vmatpush3.bf16.msra.mxu1 %v5537_v36 }
 0x150   :  { %v6248_v30 = vpop.f32.mrf.mxu0 }
 0x151   :  { %v6250_v46 = vadd.f32 %v4956_v3, %v771_v58  ;;  %v6252_v14 = vpop.f32.mrf.mxu1 }
 0x152   :  { %v4911_v19 = vpop.f32.mrf.mxu0  ;;  %5198 = vmatmul.mubr.bf16.gmra.mxu0 %v7242_v1 }
 0x153   :  { %v774_v18 = vadd.f32 %v4911_v19, %v6132_v32  ;;  %v4959_v49 = vpop.f32.mrf.mxu1  ;;  %5201 = vmatprep.mubr.bf16.mxu0 %v7242_v1 }
 0x154   :  { %v717_v21 = vpop.f32.mrf.mxu0 }
 0x155   :  { %v772_v22 = vadd.f32 %v717_v21, %v6135_v33  ;;  %v6258_v23 = vadd.f32 %v4959_v49, %v774_v18  ;;  %v978_v53 = vpop.f32.mrf.mxu1 }
 0x156   :  { %v4912_v37 = vpop.f32.mrf.mxu0 }
 0x157   :  { %v775_v63 = vadd.f32 %v4912_v37, %v6137_v40  ;;  %v6261_v34 = vadd.f32 %v978_v53, %v772_v22  ;;  %v4960_v0 = vpop.f32.mrf.mxu1 }
 0x158   :  { %v6266_v32 = vpop.f32.mrf.mxu0 }
 0x159   :  { %v6268_v8 = vadd.f32 %v4960_v0, %v775_v63  ;;  %v6270_v2 = vpop.f32.mrf.mxu1 }
 0x15a   :  { %v4915_v33 = vpop.f32.mrf.mxu0  ;;  %5202 = vmatmul.mubr.bf16.gmra.mxu0 %v7242_v1 }
 0x15b   :  { %v778_v40 = vadd.f32 %v4915_v33, %v6146_v48  ;;  %v4963_v25 = vpop.f32.mrf.mxu1 }
 0x15c   :  { %v733_v9 = vpop.f32.mrf.mxu0 }
 0x15d   :  { %v776_v39 = vadd.f32 %v733_v9, %v6149_v56  ;;  %v6275_v58 = vadd.f32 %v4963_v25, %v778_v40  ;;  %v994_v3 = vpop.f32.mrf.mxu1 }
 0x15e   :  { %v4916_v19 = vpop.f32.mrf.mxu0 }
 0x15f   :  { %v779_v18 = vadd.f32 %v4916_v19, %v6151_v45  ;;  %v6278_v49 = vadd.f32 %v994_v3, %v776_v39  ;;  %v4964_v21 = vpop.f32.mrf.mxu1 }
 0x160   :  { %v6280_v22 = vpop.f32.mrf.mxu0 }
 0x161   :  { %v6282_v53 = vadd.f32 %v4964_v21, %v779_v18  ;;  %v6284_v37 = vpop.f32.mrf.mxu1 }
 0x162   :  { %v4983_v48 = vpop.f32.mrf.mxu0 }
 0x163   :  { %v1270_v63 = vadd.f32 %v4983_v48, %v6161_v20  ;;  %v5031_v0 = vpop.f32.mrf.mxu1 }
 0x164   :  { %v1141_v56 = vpop.f32.mrf.mxu0 }
 0x165   :  { %v6288_v36 = vadd.f32 %v1141_v56, %v6164_v61  ;;  %v6290_v33 = vadd.f32 %v5031_v0, %v1270_v63  ;;  %v6292_v45 = vpop.f32.mrf.mxu1  ;;  %v5538_v56 = vld [vmem:[%s7238_s2 + $0x28] sm:$0xff]  }
 0x166   :  { %v4984_v40 = vpop.f32.mrf.mxu0  ;;  %5209 = vmatprep.subr.bf16.mxu1 %v5538_v56 }
 0x167   :  { %v1271_v25 = vadd.f32 %v4984_v40, %v6169_v57  ;;  %v5032_v9 = vpop.f32.mrf.mxu1  ;;  %v1014_v40 = vadd.f32 %v6187_v15, %v6183_v13  ;;  %5210 = vmatpush3.bf16.msra.mxu1 %v5538_v56 }
 0x168   :  { %v6295_v39 = vpop.f32.mrf.mxu0 }
 0x169   :  { %v6297_v3 = vadd.f32 %v5032_v9, %v1271_v25  ;;  %v6299_v19 = vpop.f32.mrf.mxu1 }
 0x16a   :  { %v4987_v20 = vpop.f32.mrf.mxu0 }
 0x16b   :  { %v1274_v18 = vadd.f32 %v4987_v20, %v6177_v50  ;;  %v5035_v21 = vpop.f32.mrf.mxu1 }
 0x16c   :  { %v1157_v61 = vpop.f32.mrf.mxu0 }
 0x16d   :  { %v6303_v48 = vadd.f32 %v1157_v61, %v6180_v62  ;;  %v6305_v63 = vadd.f32 %v5035_v21, %v1274_v18  ;;  %v6307_v0 = vpop.f32.mrf.mxu1 }
 0x16e   :  { %v4988_v57 = vpop.f32.mrf.mxu0 }
 0x16f   :  { %7295 = vst [vmem:[#allocation4_spill] sm:$0xff] %v6305_v63  ;;  %v1275_v25 = vadd.f32 %v4988_v57, %v6185_v12  ;;  %v5036_v50 = vpop.f32.mrf.mxu1 }
 0x170   :  { %v1160_v9 = vpop.f32.mrf.mxu0 }
 0x171   :  { %v1273_v20 = vadd.f32 %v1160_v9, %v1014_v40  ;;  %v6315_v62 = vadd.f32 %v5036_v50, %v1275_v25  ;;  %v1418_v18 = vpop.f32.mrf.mxu1 }
 0x172   :  { %v4991_v21 = vpop.f32.mrf.mxu0 }
 0x173   :  { %v1278_v61 = vadd.f32 %v4991_v21, %v6193_v28  ;;  %v6318_v1 = vadd.f32 %v1418_v18, %v1273_v20  ;;  %v5039_v44 = vpop.f32.mrf.mxu1  ;;  %v5540_v21 = vld [vmem:[%s7238_s2 + $0x98] sm:$0xff]  }
 0x174   :  { %v1173_v4 = vpop.f32.mrf.mxu0  ;;  %5269 = vmatprep.subr.bf16.mxu0 %v5540_v21 }
 0x175   :  { %v1276_v63 = vadd.f32 %v1173_v4, %v6196_v38  ;;  %v6321_v13 = vadd.f32 %v5039_v44, %v1278_v61  ;;  %v1431_v12 = vpop.f32.mrf.mxu1  ;;  %v5539_v4 = vld [vmem:[%s7238_s2 + $0x20] sm:$0xff]   ;;  %5270 = vmatpush3.bf16.msra.mxu0 %v5540_v21 }
 0x176   :  { %v4992_v15 = vpop.f32.mrf.mxu0  ;;  %5211 = vmatprep.subr.bf16.mxu1 %v5539_v4 }
 0x177   :  { %v6324_v57 = vadd.f32 %v4992_v15, %v6201_v27  ;;  %v6326_v40 = vadd.f32 %v1431_v12, %v1276_v63  ;;  %v6328_v25 = vpop.f32.mrf.mxu1  ;;  %5212 = vmatpush3.bf16.msra.mxu1 %v5539_v4 }
 0x178   :  { %v6330_v56 = vpop.f32.mrf.mxu0 }
 0x179   :  { %v6332_v28 = vpop.f32.mrf.mxu1 }
 0x17a   :  { %v4995_v50 = vpop.f32.mrf.mxu0 }
 0x17b   :  { %v1282_v9 = vadd.f32 %v4995_v50, %v6209_v52  ;;  %v5043_v20 = vpop.f32.mrf.mxu1  ;;  %v1022_v52 = vadd.f32 %v6219_v17, %v6215_v16  ;;  %v463_v50 = vadd.f32 %v6113_v29, %v6111_v10  ;;  %v7296_v16 = vmov 0.0|0.0  }
 0x17c   :  { %v1189_v38 = vpop.f32.mrf.mxu0  ;;  %5214 = vmatmul.mubr.bf16.vlgmr.msra.gmra.mxu1 %v7296_v16 }
 0x17d   :  { %v1280_v27 = vadd.f32 %v1189_v38, %v6212_v11  ;;  %v6339_v44 = vadd.f32 %v5043_v20, %v1282_v9  ;;  %v1447_v63 = vpop.f32.mrf.mxu1  ;;  %v765_v17 = vadd.f32 %v6230_v7, %v463_v50  ;;  %v5543_v7 = vld [vmem:[%s7238_s2 + $0x88] sm:$0xff]  }
 0x17e   :  { %v4996_v18 = vpop.f32.mrf.mxu0 }
 0x17f   :  { %v6347_v61 = vadd.f32 %v4996_v18, %v6217_v42  ;;  %v6349_v12 = vadd.f32 %v1447_v63, %v1280_v27  ;;  %v6351_v15 = vpop.f32.mrf.mxu1  ;;  %v5541_v42 = vld [vmem:[%s7238_s2 + $0x90] sm:$0xff]  }
 0x180   :  { %v1192_v11 = vpop.f32.mrf.mxu0  ;;  %5271 = vmatprep.subr.bf16.mxu0 %v5541_v42 }
 0x181   :  { %v6355_v9 = vadd.f32 %v1192_v11, %v1022_v52  ;;  %v6357_v20 = vpop.f32.mrf.mxu1  ;;  %5272 = vmatpush3.bf16.msra.mxu0 %v5541_v42  ;;  %v5542_v52 = vld [vmem:[%s7238_s2 + $0x18] sm:$0xff]   ;;  %v479_v42 = vadd.f32 %v6127_v26, %v6125_v24 }
 0x182   :  { %v4999_v38 = vpop.f32.mrf.mxu0  ;;  %5221 = vmatprep.subr.bf16.mxu1 %v5542_v52  ;;  %5273 = vmatprep.subr.bf16.mxu0 %v5543_v7 }
 0x183   :  { %v1286_v4 = vadd.f32 %v4999_v38, %v6225_v31  ;;  %v5047_v27 = vpop.f32.mrf.mxu1  ;;  %v1026_v31 = vadd.f32 %v6237_v51, %v765_v17  ;;  %5222 = vmatpush3.bf16.msra.mxu1 %v5542_v52  ;;  %v5545_v51 = vld [vmem:[%s7238_s2 + $0x80] sm:$0xff]   ;;  %v769_v17 = vadd.f32 %v6248_v30, %v479_v42  ;;  %v5546_v30 = vld [vmem:[%s7238_s2 + $0x8] sm:$0xff]  }
 0x184   :  { %v1205_v63 = vpop.f32.mrf.mxu0 }
 0x185   :  { %v1284_v10 = vadd.f32 %v1205_v63, %v6228_v60  ;;  %v6366_v29 = vadd.f32 %v5047_v27, %v1286_v4  ;;  %v1463_v18 = vpop.f32.mrf.mxu1  ;;  %5274 = vmatpush3.bf16.msra.mxu0 %v5543_v7 }
 0x186   :  { %v5000_v21 = vpop.f32.mrf.mxu0  ;;  %5275 = vmatprep.subr.bf16.mxu0 %v5545_v51 }
 0x187   :  { %v1287_v11 = vadd.f32 %v5000_v21, %v6235_v59  ;;  %v6376_v50 = vadd.f32 %v1463_v18, %v1284_v10  ;;  %v5048_v60 = vpop.f32.mrf.mxu1  ;;  %v5544_v59 = vld [vmem:[%s7238_s2 + $0x10] sm:$0xff]  }
 0x188   :  { %v1208_v38 = vpop.f32.mrf.mxu0  ;;  %5223 = vmatprep.subr.bf16.mxu1 %v5544_v59 }
 0x189   :  { %v1285_v4 = vadd.f32 %v1208_v38, %v1026_v31  ;;  %v6380_v27 = vadd.f32 %v5048_v60, %v1287_v11  ;;  %v1466_v63 = vpop.f32.mrf.mxu1  ;;  %5224 = vmatpush3.bf16.msra.mxu1 %v5544_v59  ;;  %5276 = vmatpush3.bf16.msra.mxu0 %v5545_v51 }
 0x18a   :  { %v5003_v16 = vpop.f32.mrf.mxu0  ;;  %5225 = vmatprep.subr.bf16.mxu1 %v5546_v30 }
 0x18b   :  { %v1290_v10 = vadd.f32 %v5003_v16, %v6243_v47  ;;  %v6390_v24 = vadd.f32 %v1466_v63, %v1285_v4  ;;  %v5051_v26 = vpop.f32.mrf.mxu1  ;;  %v1030_v47 = vadd.f32 %v6252_v14, %v769_v17  ;;  %v5547_v14 = vld [vmem:[%s7238_s2] sm:$0xff]  }
 0x18c   :  { %v1221_v18 = vpop.f32.mrf.mxu0 }
 0x18d   :  { %v1288_v21 = vadd.f32 %v1221_v18, %v6246_v54  ;;  %v6393_v52 = vadd.f32 %v5051_v26, %v1290_v10  ;;  %v1479_v7 = vpop.f32.mrf.mxu1  ;;  %v495_v54 = vadd.f32 %v6141_v43, %v6139_v41  ;;  %5226 = vmatpush3.bf16.msra.mxu1 %v5546_v30 }
 0x18e   :  { %v5004_v31 = vpop.f32.mrf.mxu0  ;;  %5227 = vmatprep.subr.bf16.mxu1 %v5547_v14 }
 0x18f   :  { %v1291_v16 = vadd.f32 %v5004_v31, %v6250_v46  ;;  %v6400_v11 = vadd.f32 %v1479_v7, %v1288_v21  ;;  %v5052_v60 = vpop.f32.mrf.mxu1  ;;  %v773_v46 = vadd.f32 %v6266_v32, %v495_v54  ;;  %v6419_v7 = vld [vmem:[%s7238_s2 + $0x58] sm:$0xff]  }
 0x190   :  { %v1224_v38 = vpop.f32.mrf.mxu0  ;;  %7297 = vst [vmem:[#allocation5_spill] sm:$0xff] %v6419_v7 }
 0x191   :  { %v1289_v42 = vadd.f32 %v1224_v38, %v1030_v47  ;;  %v6404_v4 = vadd.f32 %v5052_v60, %v1291_v16  ;;  %v1482_v63 = vpop.f32.mrf.mxu1  ;;  %5228 = vmatpush3.bf16.msra.mxu1 %v5547_v14  ;;  %v1034_v32 = vadd.f32 %v6270_v2, %v773_v46  ;;  %v511_v47 = vadd.f32 %v6155_v6, %v6153_v5 }
 0x192   :  { %v5007_v59 = vpop.f32.mrf.mxu0  ;;  %5237 = vmatprep.subr.bf16.mxu1 %v6419_v7 }
 0x193   :  { %v1294_v51 = vadd.f32 %v5007_v59, %v6258_v23  ;;  %v6411_v17 = vadd.f32 %v1482_v63, %v1289_v42  ;;  %v5055_v10 = vpop.f32.mrf.mxu1  ;;  %v777_v2 = vadd.f32 %v6280_v22, %v511_v47 }
 0x194   :  { %v1237_v26 = vpop.f32.mrf.mxu0 }
 0x195   :  { %v1292_v41 = vadd.f32 %v1237_v26, %v6261_v34  ;;  %v6414_v43 = vadd.f32 %v5055_v10, %v1294_v51  ;;  %v1495_v18 = vpop.f32.mrf.mxu1  ;;  %v1038_v51 = vadd.f32 %v6284_v37, %v777_v2 }
 0x196   :  { %v5008_v21 = vpop.f32.mrf.mxu0 }
 0x197   :  { %v6423_v23 = vadd.f32 %v5008_v21, %v6268_v8  ;;  %v6425_v31 = vadd.f32 %v1495_v18, %v1292_v41  ;;  %v6427_v30 = vpop.f32.mrf.mxu1  ;;  %v1526_v18 = vadd.f32 %v6292_v45, %v6288_v36 }
 0x198   :  { %v1240_v34 = vpop.f32.mrf.mxu0 }
 0x199   :  { %v6432_v16 = vadd.f32 %v1240_v34, %v1034_v32  ;;  %v6434_v60 = vpop.f32.mrf.mxu1 }
 0x19a   :  { %7299 = vst [vmem:[#allocation7_spill] sm:$0xff] %v6434_v60  ;;  %v5011_v38 = vpop.f32.mrf.mxu0 }
 0x19b   :  { %7298 = vst [vmem:[#allocation6_spill] sm:$0xff] %v6432_v16  ;;  %v1298_v8 = vadd.f32 %v5011_v38, %v6275_v58  ;;  %v5059_v54 = vpop.f32.mrf.mxu1  ;;  %v1010_v58 = vadd.f32 %v6171_v35, %v6167_v55  ;;  %v6470_v35 = vld [vmem:[%s7238_s2 + $0xd8] sm:$0xff]  }
 0x19c   :  { %v1253_v42 = vpop.f32.mrf.mxu0  ;;  %7304 = vst [vmem:[#allocation12_spill] sm:$0xff] %v6470_v35  ;;  %5301 = vmatprep.subr.bf16.mxu0 %v6470_v35 }
 0x19d   :  { %v1296_v63 = vadd.f32 %v1253_v42, %v6278_v49  ;;  %v6439_v59 = vadd.f32 %v5059_v54, %v1298_v8  ;;  %v1511_v14 = vpop.f32.mrf.mxu1  ;;  %v1269_v37 = vadd.f32 %v6295_v39, %v1010_v58  ;;  %v1530_v8 = vadd.f32 %v6307_v0, %v6303_v48  ;;  %v7305_v54 = vld [vmem:[#allocation4_spill] sm:$0xff] }
 0x19e   :  { %v5012_v46 = vpop.f32.mrf.mxu0 }
 0x19f   :  { %v6443_v5 = vadd.f32 %v5012_v46, %v6282_v53  ;;  %v6445_v6 = vadd.f32 %v1511_v14, %v1296_v63  ;;  %v6447_v10 = vpop.f32.mrf.mxu1  ;;  %v1527_v36 = vadd.f32 %v6299_v19, %v1269_v37 }
 0x1a0   :  { %7301 = vst [vmem:[#allocation9_spill] sm:$0xff] %v6447_v10  ;;  %v1256_v22 = vpop.f32.mrf.mxu0 }
 0x1a1   :  { %7300 = vst [vmem:[#allocation8_spill] sm:$0xff] %v6443_v5  ;;  %v6451_v26 = vadd.f32 %v1256_v22, %v1038_v51  ;;  %v6453_v49 = vpop.f32.mrf.mxu1 }
 0x1a2   :  { %7303 = vst [vmem:[#allocation11_spill] sm:$0xff] %v6453_v49  ;;  %v5079_v41 = vpop.f32.mrf.mxu0 }
 0x1a3   :  { %7302 = vst [vmem:[#allocation10_spill] sm:$0xff] %v6451_v26  ;;  %v6459_v53 = vadd.f32 %v5079_v41, %v6290_v33  ;;  %v6461_v21 = vpop.f32.mrf.mxu1 }
 0x1a4   :  { %v1657_v32 = vpop.f32.mrf.mxu0 }
 0x1a5   :  { %v6463_v34 = vadd.f32 %v1657_v32, %v1526_v18  ;;  %v6465_v47 = vpop.f32.mrf.mxu1 }
 0x1a6   :  { %v5080_v55 = vpop.f32.mrf.mxu0 }
 0x1a7   :  { %v6474_v45 = vadd.f32 %v5080_v55, %v6297_v3  ;;  %v6476_v33 = vpop.f32.mrf.mxu1 }
 0x1a8   :  { %v1660_v39 = vpop.f32.mrf.mxu0 }
 0x1a9   :  { %v6479_v38 = vadd.f32 %v1660_v39, %v1527_v36  ;;  %v6486_v63 = vpop.f32.mrf.mxu1 }
 0x1aa   :  { %v5083_v2 = vpop.f32.mrf.mxu0 }
 0x1ab   :  { %v6484_v42 = vadd.f32 %v5083_v2, %v7305_v54  ;;  %v6490_v46 = vpop.f32.mrf.mxu1 }
 0x1ac   :  { %v1673_v19 = vpop.f32.mrf.mxu0 }
 0x1ad   :  { %v6488_v14 = vadd.f32 %v1673_v19, %v1530_v8  ;;  %v6498_v48 = vpop.f32.mrf.mxu1 }
 0x1ae   :  { %v5084_v3 = vpop.f32.mrf.mxu0 }
 0x1af   :  { %v6493_v51 = vadd.f32 %v5084_v3, %v6315_v62  ;;  %v6508_v55 = vpop.f32.mrf.mxu1 }
 0x1b0   :  { %v1676_v22 = vpop.f32.mrf.mxu0 }
 0x1b1   :  { %v6496_v58 = vadd.f32 %v1676_v22, %v6318_v1  ;;  %v6512_v39 = vpop.f32.mrf.mxu1 }
 0x1b2   :  { %v5087_v41 = vpop.f32.mrf.mxu0 }
 0x1b3   :  { %v6501_v0 = vadd.f32 %v5087_v41, %v6321_v13 }
 0x1b4   :  { %v1689_v18 = vpop.f32.mrf.mxu0 }
 0x1b5   :  { %v6504_v37 = vadd.f32 %v1689_v18, %v6326_v40  ;;  %v6522_v40 = vpop.f32.mrf.mxu1 }
 0x1b6   :  { %v6506_v32 = vpop.f32.mrf.mxu0 }
 0x1b7   :  { %v6526_v3 = vpop.f32.mrf.mxu1 }
 0x1b8   :  { %v6510_v62 = vpop.f32.mrf.mxu0 }
 0x1ba   :  { %v5091_v36 = vpop.f32.mrf.mxu0 }
 0x1bb   :  { %v6515_v1 = vadd.f32 %v5091_v36, %v6339_v44  ;;  %v6534_v36 = vpop.f32.mrf.mxu1 }
 0x1bc   :  { %v1705_v2 = vpop.f32.mrf.mxu0 }
 0x1bd   :  { %v6518_v13 = vadd.f32 %v1705_v2, %v6349_v12  ;;  %v6542_v26 = vpop.f32.mrf.mxu1 }
 0x1be   :  { %v6520_v8 = vpop.f32.mrf.mxu0 }
 0x1bf   :  { %v6550_v10 = vpop.f32.mrf.mxu1 }
 0x1c0   :  { %v6524_v54 = vpop.f32.mrf.mxu0 }
 0x1c1   :  { %v6558_v5 = vpop.f32.mrf.mxu1 }
 0x1c2   :  { %v5095_v19 = vpop.f32.mrf.mxu0 }
 0x1c3   :  { %v6529_v22 = vadd.f32 %v5095_v19, %v6366_v29  ;;  %v6568_v35 = vpop.f32.mrf.mxu1 }
 0x1c4   :  { %v1721_v41 = vpop.f32.mrf.mxu0 }
 0x1c5   :  { %v6532_v44 = vadd.f32 %v1721_v41, %v6376_v50  ;;  %v6572_v60 = vpop.f32.mrf.mxu1 }
 0x1c6   :  { %v5096_v18 = vpop.f32.mrf.mxu0 }
 0x1c7   :  { %v6537_v12 = vadd.f32 %v5096_v18, %v6380_v27 }
 0x1c8   :  { %v1724_v2 = vpop.f32.mrf.mxu0 }
 0x1c9   :  { %v6540_v7 = vadd.f32 %v1724_v2, %v6390_v24 }
 0x1ca   :  { %v5099_v49 = vpop.f32.mrf.mxu0 }
 0x1cb   :  { %v6545_v29 = vadd.f32 %v5099_v49, %v6393_v52 }
 0x1cc   :  { %v1737_v19 = vpop.f32.mrf.mxu0 }
 0x1cd   :  { %v6548_v50 = vadd.f32 %v1737_v19, %v6400_v11 }
 0x1ce   :  { %v5100_v41 = vpop.f32.mrf.mxu0 }
 0x1cf   :  { %v6553_v27 = vadd.f32 %v5100_v41, %v6404_v4 }
 0x1d0   :  { %v1740_v18 = vpop.f32.mrf.mxu0 }
 0x1d1   :  { %v6556_v24 = vadd.f32 %v1740_v18, %v6411_v17 }
 0x1d2   :  { %v5103_v2 = vpop.f32.mrf.mxu0 }
 0x1d3   :  { %v6561_v52 = vadd.f32 %v5103_v2, %v6414_v43 }
 0x1d4   :  { %v1753_v49 = vpop.f32.mrf.mxu0 }
 0x1d5   :  { %7306 = vst [vmem:[#allocation4_spill] sm:$0xff] %v6561_v52  ;;  %v6564_v11 = vadd.f32 %v1753_v49, %v6425_v31  ;;  %v6582_v31 = vpop.f32.mrf.mxu1 }
 0x1d6   :  { %v6566_v19 = vpop.f32.mrf.mxu0 }
 0x1d7   :  { %7307 = vst [vmem:[#allocation13_spill] sm:$0xff] %v6564_v11  ;;  %7308 = vst [vmem:[#allocation14_spill] sm:$0xff] %v6566_v19  ;;  %v2044_v11 = vadd.f32 %v6461_v21, %v6459_v53  ;;  %v2043_v21 = vadd.f32 %v6486_v63, %v6479_v38  ;;  %v2046_v38 = vadd.f32 %v6498_v48, %v6488_v14 }
 0x1d8   :  { %v6570_v4 = vpop.f32.mrf.mxu0  ;;  %v2049_v14 = vadd.f32 %v6508_v55, %v6493_v51 }
 0x1d9   :  { %7309 = vst [vmem:[#allocation15_spill] sm:$0xff] %v6570_v4  ;;  %v6591_v4 = vld [vmem:[%s7239_s4] ss:$0 sm:$0xff] }
 0x1da   :  { %v5107_v41 = vpop.f32.mrf.mxu0 }
 0x1db   :  { %v6575_v17 = vadd.f32 %v5107_v41, %v6439_v59  ;;  %v2042_v41 = vadd.f32 %v6465_v47, %v6463_v34 }
 0x1dc   :  { %v1769_v18 = vpop.f32.mrf.mxu0 }
 0x1dd   :  { %7310 = vst [vmem:[#allocation16_spill] sm:$0xff] %v6575_v17  ;;  %v6578_v43 = vadd.f32 %v1769_v18, %v6445_v6  ;;  %v6595_v6 = vpop.f32.mrf.mxu1 }
 0x1de   :  { %v6580_v2 = vpop.f32.mrf.mxu0 }
 0x1df   :  { %7311 = vst [vmem:[#allocation17_spill] sm:$0xff] %v6578_v43  ;;  %7312 = vst [vmem:[#allocation18_spill] sm:$0xff] %v6580_v2  ;;  %v2045_v2 = vadd.f32 %v6476_v33, %v6474_v45  ;;  %v6602_v19 = vpop.f32.mrf.mxu1 }
 0x1e0   :  { %v6584_v49 = vpop.f32.mrf.mxu0 }
 0x1e1   :  { %7313 = vst [vmem:[#allocation19_spill] sm:$0xff] %v6584_v49 }
 0x1e2   :  { %v5175_v59 = vpop.f32.mrf.mxu0 }
 0x1e3   :  { %v2302_v18 = vadd.f32 %v5175_v59, %v2044_v11  ;;  %v2048_v11 = vadd.f32 %v6490_v46, %v6484_v42 }
 0x1e4   :  { %v2173_v43 = vpop.f32.mrf.mxu0 }
 0x1e5   :  { %v2338_v49 = vadd.f32 %v6591_v4, %v2302_v18  ;;  %v2300_v17 = vadd.f32 %v2173_v43, %v2042_v41  ;;  %v7314_v43 = vld [vmem:[#allocation2_spill] sm:$0xff]  ;;  %v7315_v41 = vld [vmem:[#allocation3_spill] sm:$0xff] }
 0x1e6   :  { %v5176_v53 = vpop.f32.mrf.mxu0  ;;  %v1018_v18 = vadd.f32 %v7315_v41, %v7314_v43 }
 0x1e7   :  { %v2370_v52 = vmax.f32 %v2338_v49, 0.0  ;;  %v2336_v34 = vadd.f32 %v6591_v4, %v2300_v17  ;;  %v2303_v47 = vadd.f32 %v5176_v53, %v2045_v2  ;;  %v6615_v17 = vpop.f32.mrf.mxu1 }
 0x1e8   :  { %v2176_v16 = vpop.f32.mrf.mxu0 }
 0x1e9   :  { %v2368_v59 = vmax.f32 %v2336_v34, 0.0  ;;  %v2339_v45 = vadd.f32 %v6591_v4, %v2303_v47  ;;  %v2301_v33 = vadd.f32 %v2176_v16, %v2043_v21  ;;  %v6613_v63 = vsel %vm2400_vm0, %v2370_v52, -inf }
 0x1ea   :  { %v5179_v49 = vpop.f32.mrf.mxu0  ;;  %v1277_v16 = vadd.f32 %v6330_v56, %v1018_v18 }
 0x1eb   :  { %v6618_v2 = vsel %vm2400_vm0, %v2368_v59, -inf  ;;  %v2371_v42 = vmax.f32 %v2339_v45, 0.0  ;;  %v2337_v46 = vadd.f32 %v6591_v4, %v2301_v33  ;;  %v2306_v53 = vadd.f32 %v5179_v49, %v2048_v11  ;;  %v6634_v33 = vpop.f32.mrf.mxu1 }
 0x1ec   :  { %v2403_v21 = vmax.f32 %v6618_v2, %v6613_v63  ;;  %v2189_v34 = vpop.f32.mrf.mxu0  ;;  %v1537_v59 = vadd.f32 %v6328_v25, %v6324_v57  ;;  %v2047_v45 = vadd.f32 %v6512_v39, %v6496_v58  ;;  %v1535_v18 = vadd.f32 %v6332_v28, %v1277_v16 }
 0x1ed   :  { %v2369_v48 = vmax.f32 %v2337_v46, 0.0  ;;  %v2342_v52 = vadd.f32 %v6591_v4, %v2306_v53  ;;  %v2304_v47 = vadd.f32 %v2189_v34, %v2046_v38  ;;  %v6632_v11 = vsel %vm2400_vm0, %v2371_v42, -inf }
 0x1ee   :  { %v5180_v56 = vpop.f32.mrf.mxu0  ;;  %v2052_v57 = vadd.f32 %v6522_v40, %v6501_v0  ;;  %v1795_v39 = vadd.f32 %v6506_v32, %v1537_v59  ;;  %v2050_v46 = vadd.f32 %v6526_v3, %v6504_v37  ;;  %v1793_v53 = vadd.f32 %v6510_v62, %v1535_v18  ;;  %v6653_v0 = vpop.f32.mrf.mxu1 }
 0x1ef   :  { %v6637_v43 = vsel %vm2400_vm0, %v2369_v48, -inf  ;;  %v2374_v51 = vmax.f32 %v2342_v52, 0.0  ;;  %v2340_v55 = vadd.f32 %v6591_v4, %v2304_v47  ;;  %v2307_v41 = vadd.f32 %v5180_v56, %v2049_v14 }
 0x1f0   :  { %v2406_v25 = vmax.f32 %v6637_v43, %v6632_v11  ;;  %v2192_v58 = vpop.f32.mrf.mxu0  ;;  %v2053_v37 = vadd.f32 %v6534_v36, %v1795_v39  ;;  %v1541_v59 = vadd.f32 %v6351_v15, %v6347_v61  ;;  %v2056_v61 = vadd.f32 %v6550_v10, %v6515_v1 }
 0x1f1   :  { %v2372_v38 = vmax.f32 %v2340_v55, 0.0  ;;  %v2343_v49 = vadd.f32 %v6591_v4, %v2307_v41  ;;  %v2305_v42 = vadd.f32 %v2192_v58, %v2047_v45  ;;  %v6651_v28 = vsel %vm2400_vm0, %v2374_v51, -inf  ;;  %v6669_v55 = vpop.f32.mrf.mxu1 }
 0x1f2   :  { %v5183_v16 = vpop.f32.mrf.mxu0  ;;  %v2051_v45 = vadd.f32 %v6542_v26, %v1793_v53  ;;  %v1539_v58 = vadd.f32 %v6357_v20, %v6355_v9  ;;  %v1799_v39 = vadd.f32 %v6520_v8, %v1541_v59  ;;  %v2060_v63 = vadd.f32 %v6582_v31, %v6529_v22 }
 0x1f3   :  { %v6656_v40 = vsel %vm2400_vm0, %v2372_v38, -inf  ;;  %v2375_v34 = vmax.f32 %v2343_v49, 0.0  ;;  %v2341_v32 = vadd.f32 %v6591_v4, %v2305_v42  ;;  %v2310_v14 = vadd.f32 %v5183_v16, %v2052_v57  ;;  %v6687_v16 = vpop.f32.mrf.mxu1 }
 0x1f4   :  { %v2409_v48 = vmax.f32 %v6656_v40, %v6651_v28  ;;  %v2205_v52 = vpop.f32.mrf.mxu0  ;;  %v1797_v53 = vadd.f32 %v6524_v54, %v1539_v58  ;;  %v2058_v2 = vadd.f32 %v6595_v6, %v6532_v44  ;;  %v2061_v11 = vadd.f32 %v6602_v19, %v6537_v12 }
 0x1f5   :  { %v2373_v62 = vmax.f32 %v2341_v32, 0.0  ;;  %v2346_v3 = vadd.f32 %v6591_v4, %v2310_v14  ;;  %v2308_v47 = vadd.f32 %v2205_v52, %v2050_v46  ;;  %v6667_v56 = vsel %vm2400_vm0, %v2375_v34, -inf }
 0x1f6   :  { %v5184_v51 = vpop.f32.mrf.mxu0  ;;  %v2054_v46 = vadd.f32 %v6558_v5, %v6518_v13  ;;  %v2057_v52 = vadd.f32 %v6568_v35, %v1799_v39  ;;  %v2055_v54 = vadd.f32 %v6572_v60, %v1797_v53  ;;  %v2064_v40 = vadd.f32 %v6634_v33, %v6545_v29 }
 0x1f7   :  { %v6672_v41 = vsel %vm2400_vm0, %v2373_v62, -inf  ;;  %v2378_v18 = vmax.f32 %v2346_v3, 0.0  ;;  %v2344_v36 = vadd.f32 %v6591_v4, %v2308_v47  ;;  %v2311_v57 = vadd.f32 %v5184_v51, %v2053_v37 }
 0x1f8   :  { %v2412_v15 = vmax.f32 %v6672_v41, %v6667_v56  ;;  %v2208_v26 = vpop.f32.mrf.mxu0  ;;  %v2449_v62 = vsel %vm2400_vm0, %v2403_v21, -inf  ;;  %v2065_v56 = vadd.f32 %v6669_v55, %v6553_v27  ;;  %v2063_v27 = vadd.f32 %v6687_v16, %v6556_v24  ;;  %v7318_v16 = vld [vmem:[#allocation4_spill] sm:$0xff] }
 0x1f9   :  { %v2376_v38 = vmax.f32 %v2344_v36, 0.0  ;;  %v2347_v49 = vadd.f32 %v6591_v4, %v2311_v57  ;;  %v2309_v42 = vadd.f32 %v2208_v26, %v2051_v45  ;;  %v2414_v9 = vsel %vm2400_vm0, %v2378_v18, -inf  ;;  %v6700_v45 = vpop.f32.mrf.mxu1 }
 0x1fa   :  { %v5187_v20 = vpop.f32.mrf.mxu0  ;;  %v2452_v26 = vsel %vm2400_vm0, %v2406_v25, -inf }
 0x1fb   :  { %v2413_v10 = vsel %vm2400_vm0, %v2376_v38, -inf  ;;  %v2379_v1 = vmax.f32 %v2347_v49, 0.0  ;;  %v2345_v34 = vadd.f32 %v6591_v4, %v2309_v42  ;;  %v2314_v8 = vadd.f32 %v5187_v20, %v2056_v61 }
 0x1fc   :  { %v2415_v32 = vmax.f32 %v2413_v10, %v2414_v9  ;;  %v2221_v14 = vpop.f32.mrf.mxu0 }
 0x1fd   :  { %v2377_v37 = vmax.f32 %v2345_v34, 0.0  ;;  %v2350_v5 = vadd.f32 %v6591_v4, %v2314_v8  ;;  %v2312_v13 = vadd.f32 %v2221_v14, %v2054_v46  ;;  %v2417_v47 = vsel %vm2400_vm0, %v2379_v1, -inf  ;;  %v6715_v46 = vpop.f32.mrf.mxu1 }
 0x1fe   :  { %v2450_v3 = vsel %vm2400_vm0, %v2415_v32, -inf  ;;  %v5188_v59 = vpop.f32.mrf.mxu0  ;;  %v2059_v34 = vadd.f32 %v6615_v17, %v6540_v7  ;;  %v2455_v8 = vsel %vm2400_vm0, %v2409_v48, -inf  ;;  %v2062_v48 = vadd.f32 %v6653_v0, %v6548_v50 }
 0x1ff   :  { %v2451_v51 = vmax.f32 %v2449_v62, %v2450_v3  ;;  %v2416_v35 = vsel %vm2400_vm0, %v2377_v37, -inf  ;;  %v2382_v18 = vmax.f32 %v2350_v5, 0.0  ;;  %v2348_v36 = vadd.f32 %v6591_v4, %v2312_v13  ;;  %v6732_v14 = vpop.f32.mrf.mxu1 }
 0x200   :  { %v2418_v57 = vmax.f32 %v2416_v35, %v2417_v47  ;;  %v2315_v60 = vadd.f32 %v5188_v59, %v2057_v52  ;;  %v2224_v58 = vpop.f32.mrf.mxu0  ;;  %v2458_v3 = vsel %vm2400_vm0, %v2412_v15, -inf }
 0x201   :  { %v2380_v21 = vmax.f32 %v2348_v36, 0.0  ;;  %v2313_v61 = vadd.f32 %v2224_v58, %v2055_v54  ;;  %v2420_v38 = vsel %vm2400_vm0, %v2382_v18, -inf  ;;  %v2014_v18 = vpop.f32.mrf.mxu1 }
 0x202   :  { %v2453_v39 = vsel %vm2400_vm0, %v2418_v57, -inf  ;;  %v2351_v49 = vadd.f32 %v6591_v4, %v2315_v60  ;;  %v5191_v42 = vpop.f32.mrf.mxu0 }
 0x203   :  { %v2454_v22 = vmax.f32 %v2452_v26, %v2453_v39  ;;  %v2419_v31 = vsel %vm2400_vm0, %v2380_v21, -inf  ;;  %v2349_v44 = vadd.f32 %v6591_v4, %v2313_v61  ;;  %v2318_v6 = vadd.f32 %v5191_v42, %v2060_v63  ;;  %v5155_v26 = vpop.f32.mrf.mxu1 }
 0x204   :  { %v2421_v43 = vmax.f32 %v2419_v31, %v2420_v38  ;;  %v2383_v25 = vmax.f32 %v2351_v49, 0.0  ;;  %v2237_v53 = vpop.f32.mrf.mxu0  ;;  %v1553_v21 = vadd.f32 %v6427_v30, %v6423_v23  ;;  %v7316_v23 = vld [vmem:[#allocation6_spill] sm:$0xff]  ;;  %v7317_v30 = vld [vmem:[#allocation7_spill] sm:$0xff] }
 0x205   :  { %v2381_v9 = vmax.f32 %v2349_v44, 0.0  ;;  %v2354_v20 = vadd.f32 %v6591_v4, %v2318_v6  ;;  %v2316_v10 = vadd.f32 %v2237_v53, %v2058_v2  ;;  %v6722_v1 = vpack.c.bf16 %v2454_v22, %v2451_v51  ;;  %v5555_v2 = vld [vmem:[%s7238_s2 + $0xd0] sm:$0xff]  }
 0x206   :  { %v2456_v32 = vsel %vm2400_vm0, %v2421_v43, -inf  ;;  %v2423_v12 = vsel %vm2400_vm0, %v2383_v25, -inf  ;;  %v5192_v19 = vpop.f32.mrf.mxu0  ;;  %v1551_v24 = vadd.f32 %v7317_v30, %v7316_v23  ;;  %v2068_v22 = vadd.f32 %v6700_v45, %v7318_v16  ;;  %v7321_v43 = vld [vmem:[#allocation14_spill] sm:$0xff]  ;;  %v7322_v45 = vld [vmem:[#allocation13_spill] sm:$0xff]  ;;  %v5550_v16 = vld [vmem:[%s7238_s2 + $0x48] sm:$0xff]  }
 0x207   :  { %v2457_v52 = vmax.f32 %v2455_v8, %v2456_v32  ;;  %v2422_v37 = vsel %vm2400_vm0, %v2381_v9, -inf  ;;  %v2386_v5 = vmax.f32 %v2354_v20, 0.0  ;;  %v2352_v13 = vadd.f32 %v6591_v4, %v2316_v10  ;;  %5217 = vmatprep.mubr.msk.bf16.mxu1 %vm2400_vm0, %v6722_v1  ;;  %5277 = vmatprep.mubr.msk.bf16.mxu0 %vm2400_vm0, %v6722_v1  ;;  %v5557_v10 = vld [vmem:[%s7238_s2 + $0xc8] sm:$0xff]  }
 0x208   :  { %v2424_v7 = vmax.f32 %v2422_v37, %v2423_v12  ;;  %v2319_v17 = vadd.f32 %v5192_v19, %v2061_v11  ;;  %v2240_v28 = vpop.f32.mrf.mxu0  ;;  %v7319_v6 = vmov 0.0|0.0   ;;  %v7320_v11 = vld [vmem:[#allocation12_spill] sm:$0xff]  ;;  %v1811_v25 = vadd.f32 %v7321_v43, %v1553_v21  ;;  %v7323_v8 = vld [vmem:[#allocation15_spill] sm:$0xff] }
 0x209   :  { %v2384_v54 = vmax.f32 %v2352_v13, 0.0  ;;  %v2317_v62 = vadd.f32 %v2240_v28, %v2059_v34  ;;  %v6750_v59 = vsel %vm2400_vm0, %v2386_v5, -inf  ;;  %v2066_v34 = vadd.f32 %v6715_v46, %v7322_v45 }
 0x20a   :  { %v2459_v47 = vsel %vm2400_vm0, %v2424_v7, -inf  ;;  %v2355_v51 = vadd.f32 %v6591_v4, %v2319_v17  ;;  %v5195_v35 = vpop.f32.mrf.mxu0  ;;  %v1809_v32 = vadd.f32 %v7323_v8, %v1551_v24  ;;  %v2069_v46 = vadd.f32 %v6732_v14, %v1811_v25  ;;  %v5559_v14 = vld [vmem:[%s7238_s2 + $0xc0] sm:$0xff]  }
 0x20b   :  { %v2460_v29 = vmax.f32 %v2458_v3, %v2459_v47  ;;  %v6754_v33 = vsel %vm2400_vm0, %v2384_v54, -inf  ;;  %v2353_v50 = vadd.f32 %v6591_v4, %v2317_v62  ;;  %v2322_v0 = vadd.f32 %v5195_v35, %v2064_v40  ;;  %v5549_v62 = vld [vmem:[%s7238_s2 + $0x50] sm:$0xff]   ;;  %v7325_v47 = vld [vmem:[#allocation9_spill] sm:$0xff] }
 0x20c   :  { %v2427_v41 = vmax.f32 %v6754_v33, %v6750_v59  ;;  %v2387_v15 = vmax.f32 %v2355_v51, 0.0  ;;  %v2253_v36 = vpop.f32.mrf.mxu0  ;;  %v7324_v3 = vld [vmem:[#allocation8_spill] sm:$0xff]  ;;  %v2067_v35 = vadd.f32 %v2014_v18, %v1809_v32  ;;  %v7327_v18 = vld [vmem:[#allocation11_spill] sm:$0xff] }
 0x20d   :  { %v6761_v57 = vpack.c.bf16 %v2460_v29, %v2457_v52  ;;  %v2385_v60 = vmax.f32 %v2353_v50, 0.0  ;;  %v2358_v58 = vadd.f32 %v6591_v4, %v2322_v0  ;;  %v2320_v63 = vadd.f32 %v2253_v36, %v2062_v48  ;;  %v2027_v52 = vpop.f32.mrf.mxu1 }
 0x20e   :  { %v6772_v55 = vsel %vm2400_vm0, %v2387_v15, -inf  ;;  %v5196_v61 = vpop.f32.mrf.mxu0  ;;  %v1557_v51 = vadd.f32 %v7325_v47, %v7324_v3 }
 0x20f   :  { %v6775_v39 = vsel %vm2400_vm0, %v2385_v60, -inf  ;;  %v2390_v38 = vmax.f32 %v2358_v58, 0.0  ;;  %v2356_v49 = vadd.f32 %v6591_v4, %v2320_v63  ;;  %v2323_v42 = vadd.f32 %v5196_v61, %v2065_v56  ;;  %5218 = vmatmul.mubr.msk.bf16.gmra.mxu1 %vm2400_vm0, %v6761_v57  ;;  %5278 = vmatmul.mubr.msk.bf16.vlgmr.msra.gmra.mxu0 %vm2400_vm0, %v6761_v57  ;;  %v5156_v0 = vpop.f32.mrf.mxu1  ;;  %v7326_v58 = vld [vmem:[#allocation10_spill] sm:$0xff] }
 0x210   :  { %v2430_v31 = vmax.f32 %v6775_v39, %v6772_v55  ;;  %v2256_v44 = vpop.f32.mrf.mxu0  ;;  %5229 = vmatprep.mubr.bf16.mxu1 %v7319_v6  ;;  %5302 = vmatpush3.bf16.msra.mxu0 %v7320_v11  ;;  %v1555_v63 = vadd.f32 %v7327_v18, %v7326_v58  ;;  %v5554_v55 = vld [vmem:[%s7238_s2 + $0x70] sm:$0xff]  }
 0x211   :  { %v2388_v53 = vmax.f32 %v2356_v49, 0.0  ;;  %v2359_v9 = vadd.f32 %v6591_v4, %v2323_v42  ;;  %v2321_v20 = vadd.f32 %v2256_v44, %v2063_v27  ;;  %5303 = vmatprep.subr.bf16.mxu0 %v5555_v2  ;;  %v6799_v12 = vsel %vm2400_vm0, %v2390_v38, -inf  ;;  %v7329_v38 = vld [vmem:[#allocation5_spill] sm:$0xff]  ;;  %v7330_v49 = vld [vmem:[#allocation18_spill] sm:$0xff]  ;;  %v7332_v44 = vld [vmem:[#allocation19_spill] sm:$0xff] }
 0x212   :  { %v5199_v19 = vpop.f32.mrf.mxu0  ;;  %v1815_v42 = vadd.f32 %v7330_v49, %v1557_v51  ;;  %v1813_v11 = vadd.f32 %v7332_v44, %v1555_v63  ;;  %v5570_v44 = vld [vmem:[%s7238_s2 + $0x100] sm:$0xff]  }
 0x213   :  { %v6802_v37 = vsel %vm2400_vm0, %v2388_v53, -inf  ;;  %v2391_v5 = vmax.f32 %v2359_v9, 0.0  ;;  %v2357_v13 = vadd.f32 %v6591_v4, %v2321_v20  ;;  %v2326_v7 = vadd.f32 %v5199_v19, %v2068_v22  ;;  %v6843_v53 = vld [vmem:[%s7238_s2 + $0x118] sm:$0xff]   ;;  %v2030_v9 = vpop.f32.mrf.mxu1 }
 0x214   :  { %v2433_v17 = vmax.f32 %v6802_v37, %v6799_v12  ;;  %v2269_v28 = vpop.f32.mrf.mxu0  ;;  %5304 = vmatpush3.bf16.msra.mxu0 %v5555_v2  ;;  %v7328_v2 = vld [vmem:[#allocation16_spill] sm:$0xff]  ;;  %v2073_v19 = vadd.f32 %v5156_v0, %v1815_v42  ;;  %v2464_v0 = vsel %vm2400_vm0, %v2430_v31, -inf  ;;  %v5556_v12 = vld [vmem:[%s7238_s2 + $0x68] sm:$0xff]  }
 0x215   :  { %v2389_v40 = vmax.f32 %v2357_v13, 0.0  ;;  %v2362_v48 = vadd.f32 %v6591_v4, %v2326_v7  ;;  %v2324_v54 = vadd.f32 %v2269_v28, %v2066_v34  ;;  %5305 = vmatprep.subr.bf16.mxu0 %v5557_v10  ;;  %v6815_v29 = vsel %vm2400_vm0, %v2391_v5, -inf  ;;  %v5551_v7 = vld [vmem:[%s7238_s2 + $0x40] sm:$0xff]  }
 0x216   :  { %v5200_v50 = vpop.f32.mrf.mxu0  ;;  %v2072_v21 = vadd.f32 %v5155_v26, %v7328_v2  ;;  %v7331_v26 = vld [vmem:[#allocation17_spill] sm:$0xff]  ;;  %v2071_v28 = vadd.f32 %v2030_v9, %v1813_v11  ;;  %v2467_v39 = vsel %vm2400_vm0, %v2433_v17, -inf }
 0x217   :  { %v6821_v56 = vsel %vm2400_vm0, %v2389_v40, -inf  ;;  %v2394_v15 = vmax.f32 %v2362_v48, 0.0  ;;  %v2360_v36 = vadd.f32 %v6591_v4, %v2324_v54  ;;  %v2327_v60 = vadd.f32 %v5200_v50, %v2069_v46  ;;  %5230 = vmatmul.mubr.bf16.vlgmr.msra.gmra.mxu1 %v7319_v6  ;;  %v5565_v11 = vld [vmem:[%s7238_s2 + $0xf8] sm:$0xff]  }
 0x218   :  { %v2436_v27 = vmax.f32 %v6821_v56, %v6815_v29  ;;  %v2272_v61 = vpop.f32.mrf.mxu0  ;;  %5238 = vmatpush3.bf16.msra.mxu1 %v7329_v38  ;;  %5233 = vmatprep.mubr.bf16.mxu1 %v7319_v6  ;;  %v2070_v22 = vadd.f32 %v2027_v52, %v7331_v26  ;;  %v2461_v46 = vsel %vm2400_vm0, %v2427_v41, -inf  ;;  %v5560_v29 = vld [vmem:[%s7238_s2 + $0xb8] sm:$0xff]   ;;  %v5561_v56 = vld [vmem:[%s7238_s2 + $0xb0] sm:$0xff]   ;;  %v5562_v26 = vld [vmem:[%s7238_s2 + $0xa8] sm:$0xff]  }
 0x219   :  { %v2392_v23 = vmax.f32 %v2360_v36, 0.0  ;;  %v2363_v30 = vadd.f32 %v6591_v4, %v2327_v60  ;;  %v2325_v24 = vadd.f32 %v2272_v61, %v2067_v35  ;;  %5239 = vmatprep.subr.bf16.mxu1 %v5549_v62  ;;  %5306 = vmatpush3.bf16.msra.mxu0 %v5557_v10  ;;  %v2438_v43 = vsel %vm2400_vm0, %v2394_v15, -inf }
 0x21a   :  { %v5203_v25 = vpop.f32.mrf.mxu0  ;;  %5307 = vmatprep.subr.bf16.mxu0 %v5559_v14  ;;  %v2470_v37 = vsel %vm2400_vm0, %v2436_v27, -inf  ;;  %v5566_v27 = vld [vmem:[%s7238_s2 + $0x110] sm:$0xff]  }
 0x21b   :  { %v2437_v20 = vsel %vm2400_vm0, %v2392_v23, -inf  ;;  %v2395_v45 = vmax.f32 %v2363_v30, 0.0  ;;  %v2361_v34 = vadd.f32 %v6591_v4, %v2325_v24  ;;  %v2330_v10 = vadd.f32 %v5203_v25, %v2072_v21  ;;  %v5571_v25 = vld [vmem:[%s7238_s2 + $0xe0] sm:$0xff]  }
 0x21c   :  { %v2439_v8 = vmax.f32 %v2437_v20, %v2438_v43  ;;  %v2285_v32 = vpop.f32.mrf.mxu0  ;;  %5240 = vmatpush3.bf16.msra.mxu1 %v5549_v62  ;;  %v5569_v43 = vld [vmem:[%s7238_s2 + $0xe8] sm:$0xff]   ;;  %v3473_v20 = vld [vmem:[%s7240_s3 + $0x30] sm:$0xff] }
 0x21d   :  { %v2393_v52 = vmax.f32 %v2361_v34, 0.0  ;;  %v2366_v5 = vadd.f32 %v6591_v4, %v2330_v10  ;;  %v2328_v13 = vadd.f32 %v2285_v32, %v2070_v22  ;;  %5241 = vmatprep.subr.bf16.mxu1 %v5550_v16  ;;  %5308 = vmatpush3.bf16.msra.mxu0 %v5559_v14  ;;  %v2441_v48 = vsel %vm2400_vm0, %v2395_v45, -inf  ;;  %v5552_v14 = vld [vmem:[%s7238_s2 + $0x78] sm:$0xff]   ;;  %v5568_v22 = vld [vmem:[%s7238_s2 + $0x108] sm:$0xff]  }
 0x21e   :  { %v2462_v40 = vsel %vm2400_vm0, %v2439_v8, -inf  ;;  %v5204_v54 = vpop.f32.mrf.mxu0  ;;  %5333 = vmatprep.subr.bf16.mxu0 %v6843_v53  ;;  %v6975_v34 = vand.u32 4294901760, %v3473_v20 }
 0x21f   :  { %v2463_v62 = vmax.f32 %v2461_v46, %v2462_v40  ;;  %v2440_v3 = vsel %vm2400_vm0, %v2393_v52, -inf  ;;  %v2398_v47 = vmax.f32 %v2366_v5, 0.0  ;;  %v2364_v51 = vadd.f32 %v6591_v4, %v2328_v13  ;;  %5234 = vmatmul.mubr.msk.bf16.gmra.mxu1 %vm2400_vm0, %v6722_v1 }
 0x220   :  { %v2442_v35 = vmax.f32 %v2440_v3, %v2441_v48  ;;  %v2331_v59 = vadd.f32 %v5204_v54, %v2073_v19  ;;  %v2288_v33 = vpop.f32.mrf.mxu0  ;;  %5242 = vmatpush3.bf16.msra.mxu1 %v5550_v16  ;;  %5245 = vmatprep.mubr.bf16.mxu1 %v7319_v6  ;;  %v5558_v16 = vld [vmem:[%s7238_s2 + $0x60] sm:$0xff]   ;;  %7335 = vst [vmem:[#allocation6_spill] sm:$0xff] %v6975_v34  ;;  %v3469_v3 = vld [vmem:[%s7240_s3 + $0x10] sm:$0xff] }
 0x221   :  { %v2396_v41 = vmax.f32 %v2364_v51, 0.0  ;;  %v2329_v50 = vadd.f32 %v2288_v33, %v2071_v28  ;;  %5243 = vmatprep.subr.bf16.mxu1 %v5551_v7  ;;  %v2444_v58 = vsel %vm2400_vm0, %v2398_v47, -inf  ;;  %v6986_v8 = vsub.f32 %v3473_v20, %v6975_v34  ;;  %v3471_v19 = vld [vmem:[%s7240_s3 + $0x20] sm:$0xff]  ;;  %v3470_v28 = vld [vmem:[%s7240_s3 + $0x18] sm:$0xff] }
 0x222   :  { %v2465_v15 = vsel %vm2400_vm0, %v2442_v35, -inf  ;;  %v2367_v36 = vadd.f32 %v6591_v4, %v2331_v59  ;;  %v7030_v59 = vand.u32 4294901760, %v3469_v3 }
 0x223   :  { %v2466_v60 = vmax.f32 %v2464_v0, %v2465_v15  ;;  %v2443_v18 = vsel %vm2400_vm0, %v2396_v41, -inf  ;;  %v2365_v63 = vadd.f32 %v6591_v4, %v2329_v50  ;;  %7337 = vst [vmem:[#allocation4_spill] sm:$0xff] %v6986_v8  ;;  %v6998_v5 = vand.u32 4294901760, %v6986_v8  ;;  %v3468_v41 = vld [vmem:[%s7240_s3 + $0x8] sm:$0xff] }
 0x224   :  { %v2445_v2 = vmax.f32 %v2443_v18, %v2444_v58  ;;  %v2399_v21 = vmax.f32 %v2367_v36, 0.0  ;;  %5244 = vmatpush3.bf16.msra.mxu1 %v5551_v7  ;;  %v7003_v7 = vand.u32 4294901760, %v3471_v19  ;;  %7346 = vst [vmem:[#allocation16_spill] sm:$0xff] %v7030_v59  ;;  %v7042_v0 = vsub.f32 %v3469_v3, %v7030_v59 }
 0x225   :  { %v2397_v61 = vmax.f32 %v2365_v63, 0.0  ;;  %5253 = vmatprep.subr.bf16.mxu1 %v5552_v14  ;;  %v6875_v38 = vpack.c.bf16 %v2466_v60, %v2463_v62  ;;  %7339 = vst [vmem:[#allocation14_spill] sm:$0xff] %v6998_v5  ;;  %v3605_v40 = vsub.f32 %v6986_v8, %v6998_v5  ;;  %v7019_v62 = vand.u32 4294901760, %v3470_v28  ;;  %v3467_v60 = vld [vmem:[%s7240_s3] sm:$0xff] }
 0x226   :  { %v2468_v31 = vsel %vm2400_vm0, %v2445_v2, -inf  ;;  %v2447_v4 = vsel %vm2400_vm0, %v2399_v21, -inf  ;;  %7341 = vst [vmem:[#allocation15_spill] sm:$0xff] %v7003_v7  ;;  %v7016_v54 = vsub.f32 %v3471_v19, %v7003_v7  ;;  %7348 = vst [vmem:[#allocation18_spill] sm:$0xff] %v7042_v0  ;;  %v7044_v15 = vand.u32 4294901760, %v3468_v41 }
 0x227   :  { %v2469_v49 = vmax.f32 %v2467_v39, %v2468_v31  ;;  %v2446_v42 = vsel %vm2400_vm0, %v2397_v61, -inf  ;;  %5246 = vmatmul.mubr.bf16.vlgmr.msra.gmra.mxu1 %v7319_v6  ;;  %5281 = vmatprep.mubr.msk.bf16.mxu0 %vm2400_vm0, %v6875_v38  ;;  %7344 = vst [vmem:[#allocation10_spill] sm:$0xff] %v7019_v62  ;;  %v3606_v47 = vand.u32 4294901760, %v3605_v40  ;;  %v7033_v33 = vsub.f32 %v3470_v28, %v7019_v62 }
 0x228   :  { %v2448_v23 = vmax.f32 %v2446_v42, %v2447_v4  ;;  %5249 = vmatprep.mubr.msk.bf16.mxu1 %vm2400_vm0, %v6761_v57  ;;  %5254 = vmatpush3.bf16.msra.mxu1 %v5552_v14  ;;  %7343 = vst [vmem:[#allocation9_spill] sm:$0xff] %v7016_v54  ;;  %v7028_v35 = vand.u32 4294901760, %v7016_v54  ;;  %7349 = vst [vmem:[#allocation17_spill] sm:$0xff] %v7044_v15  ;;  %v7055_v18 = vand.u32 4294901760, %v7042_v0  ;;  %v7060_v2 = vand.u32 4294901760, %v3467_v60 }
 0x229   :  { %5255 = vmatprep.subr.bf16.mxu1 %v5554_v55  ;;  %7347 = vst [vmem:[#allocation5_spill] sm:$0xff] %v7033_v33  ;;  %v7048_v36 = vand.u32 4294901760, %v7033_v33  ;;  %v7058_v63 = vsub.f32 %v3468_v41, %v7044_v15 }
 0x22a   :  { %v2471_v17 = vsel %vm2400_vm0, %v2448_v23, -inf  ;;  %7345 = vst [vmem:[#allocation11_spill] sm:$0xff] %v7028_v35  ;;  %v3619_v14 = vsub.f32 %v7016_v54, %v7028_v35  ;;  %7351 = vst [vmem:[#allocation20_spill] sm:$0xff] %v7055_v18  ;;  %v3633_v61 = vsub.f32 %v7042_v0, %v7055_v18 }
 0x22b   :  { %v2472_v30 = vmax.f32 %v2470_v37, %v2471_v17  ;;  %7350 = vst [vmem:[#allocation19_spill] sm:$0xff] %v7048_v36  ;;  %7352 = vst [vmem:[#allocation21_spill] sm:$0xff] %v7058_v63  ;;  %v3626_v21 = vsub.f32 %v7033_v33, %v7048_v36 }
 0x22c   :  { %5256 = vmatpush3.bf16.msra.mxu1 %v5554_v55  ;;  %v3620_v58 = vand.u32 4294901760, %v3619_v14  ;;  %7353 = vst [vmem:[#allocation22_spill] sm:$0xff] %v7060_v2  ;;  %v7072_v55 = vsub.f32 %v3467_v60, %v7060_v2  ;;  %v3634_v31 = vand.u32 4294901760, %v3633_v61 }
 0x22d   :  { %v2895_v24 = vpack.c.bf16 %v2472_v30, %v2469_v49  ;;  %5257 = vmatprep.subr.bf16.mxu1 %v5556_v12  ;;  %v3627_v39 = vand.u32 4294901760, %v3626_v21 }
 0x22e   :  { %7355 = vst [vmem:[#allocation24_spill] sm:$0xff] %v7072_v55  ;;  %v7079_v4 = vand.u32 4294901760, %v7072_v55 }
 0x22f   :  { %5250 = vmatmul.mubr.bf16.gmra.mxu1 %v7319_v6  ;;  %5282 = vmatmul.mubr.msk.bf16.gmra.mxu0 %vm2400_vm0, %v2895_v24 }
 0x230   :  { %5258 = vmatpush3.bf16.msra.mxu1 %v5556_v12  ;;  %5261 = vmatprep.mubr.bf16.mxu1 %v7319_v6  ;;  %7356 = vst [vmem:[#allocation25_spill] sm:$0xff] %v7079_v4  ;;  %v3647_v23 = vsub.f32 %v7072_v55, %v7079_v4 }
 0x231   :  { %5259 = vmatprep.subr.bf16.mxu1 %v5558_v16  ;;  %5309 = vmatprep.mubr.bf16.mxu0 %v7319_v6 }
 0x232   :  { %v3648_v12 = vand.u32 4294901760, %v3647_v23 }
 0x234   :  { %5260 = vmatpush3.bf16.msra.mxu1 %v5558_v16 }
 0x235   :  { %5285 = vmatprep.subr.bf16.mxu1 %v5560_v29 }
 0x237   :  { %5262 = vmatmul.mubr.msk.bf16.vlgmr.msra.gmra.mxu1 %vm2400_vm0, %v6722_v1  ;;  %5310 = vmatmul.mubr.msk.bf16.vlgmr.msra.gmra.mxu0 %vm2400_vm0, %v6875_v38  ;;  %v5563_v1 = vld [vmem:[%s7238_s2 + $0xa0] sm:$0xff]  }
 0x238   :  { %5286 = vmatpush3.bf16.msra.mxu1 %v5560_v29  ;;  %5265 = vmatprep.mubr.bf16.mxu1 %v7319_v6 }
 0x239   :  { %5287 = vmatprep.subr.bf16.mxu1 %v5561_v56  ;;  %5313 = vmatprep.mubr.bf16.mxu0 %v7319_v6 }
 0x23a   :  { %5334 = vmatpush3.bf16.msra.mxu0 %v6843_v53  ;;  %v3474_v53 = vld [vmem:[%s7240_s3 + $0x38] sm:$0xff] }
 0x23b   :  { %5335 = vmatprep.subr.bf16.mxu0 %v5566_v27  ;;  %v6967_v9 = vand.u32 4294901760, %v3474_v53 }
 0x23c   :  { %5288 = vmatpush3.bf16.msra.mxu1 %v5561_v56  ;;  %v5215_v37 = vpop.f32.mrf.mxu1 }
 0x23d   :  { %5289 = vmatprep.subr.bf16.mxu1 %v5562_v26  ;;  %7333 = vst [vmem:[#allocation2_spill] sm:$0xff] %v6967_v9  ;;  %v6973_v45 = vsub.f32 %v3474_v53, %v6967_v9 }
 0x23e   :  { %5336 = vmatpush3.bf16.msra.mxu0 %v5566_v27  ;;  %v2559_v17 = vpop.f32.mrf.mxu1 }
 0x23f   :  { %5266 = vmatmul.mubr.msk.bf16.gmra.mxu1 %vm2400_vm0, %v6875_v38  ;;  %5314 = vmatmul.mubr.bf16.gmra.mxu0 %v7319_v6  ;;  %7334 = vst [vmem:[#allocation3_spill] sm:$0xff] %v6973_v45  ;;  %v6983_v10 = vand.u32 4294901760, %v6973_v45 }
 0x240   :  { %5290 = vmatpush3.bf16.msra.mxu1 %v5562_v26  ;;  %5293 = vmatprep.mubr.msk.bf16.mxu1 %vm2400_vm0, %v6761_v57  ;;  %v5567_v57 = vld [vmem:[%s7238_s2 + $0xf0] sm:$0xff]   ;;  %v5216_v30 = vpop.f32.mrf.mxu1 }
 0x241   :  { %5341 = vmatprep.mubr.msk.bf16.mxu0 %vm2400_vm0, %v2895_v24  ;;  %5291 = vmatprep.subr.bf16.mxu1 %v5563_v1  ;;  %7336 = vst [vmem:[#allocation7_spill] sm:$0xff] %v6983_v10  ;;  %v3598_v52 = vsub.f32 %v6973_v45, %v6983_v10 }
 0x242   :  { %5337 = vmatprep.subr.bf16.mxu0 %v5568_v22 }
 0x243   :  { %5338 = vmatpush3.bf16.msra.mxu0 %v5568_v22  ;;  %v3599_v46 = vand.u32 4294901760, %v3598_v52 }
 0x244   :  { %5292 = vmatpush3.bf16.msra.mxu1 %v5563_v1  ;;  %5339 = vmatprep.subr.bf16.mxu0 %v5570_v44 }
 0x245   :  { %5317 = vmatprep.subr.bf16.mxu1 %v5565_v11 }
 0x247   :  { %5294 = vmatmul.mubr.bf16.vlgmr.msra.gmra.mxu1 %v7319_v6  ;;  %5340 = vmatpush3.bf16.msra.mxu0 %v5570_v44 }
 0x248   :  { %5297 = vmatprep.mubr.msk.bf16.mxu1 %vm2400_vm0, %v2895_v24  ;;  %5318 = vmatpush3.bf16.msra.mxu1 %v5565_v11 }
 0x249   :  { %5319 = vmatprep.subr.bf16.mxu1 %v5567_v57  ;;  %5368 = vmatprep.subr.mxu0 %v3599_v46 }
 0x24a   :  { %5342 = vmatmul.mubr.bf16.vlgmr.msra.gmra.mxu0 %v7319_v6 }
 0x24b   :  { %5345 = vmatprep.mubr.bf16.mxu0 %v7319_v6  ;;  %5369 = vmatpush3.msra.mxu0 %v3599_v46 }
 0x24c   :  { %5320 = vmatpush3.bf16.msra.mxu1 %v5567_v57  ;;  %5370 = vmatprep.subr.mxu0 %v3606_v47 }
 0x24d   :  { %5321 = vmatprep.subr.bf16.mxu1 %v5569_v43  ;;  %5371 = vmatpush3.msra.mxu0 %v3606_v47 }
 0x24f   :  { %5298 = vmatmul.mubr.bf16.gmra.mxu1 %v7319_v6 }
 0x250   :  { %5322 = vmatpush3.bf16.msra.mxu1 %v5569_v43  ;;  %5325 = vmatprep.mubr.msk.bf16.mxu1 %vm2400_vm0, %v6875_v38  ;;  %v7069_v38 = vand.u32 4294901760, %v7058_v63 }
 0x251   :  { %5323 = vmatprep.subr.bf16.mxu1 %v5571_v25 }
 0x252   :  { %5346 = vmatmul.mubr.bf16.gmra.mxu0 %v7319_v6  ;;  %7354 = vst [vmem:[#allocation23_spill] sm:$0xff] %v7069_v38  ;;  %v3640_v49 = vsub.f32 %v7058_v63, %v7069_v38 }
 0x254   :  { %5324 = vmatpush3.bf16.msra.mxu1 %v5571_v25  ;;  %v3641_v42 = vand.u32 4294901760, %v3640_v49 }
 0x255   :  { %5349 = vmatprep.subr.mxu1 %v6967_v9 }
 0x257   :  { %5326 = vmatmul.mubr.msk.bf16.vlgmr.msra.gmra.mxu1 %vm2400_vm0, %v2895_v24  ;;  %v2562_v24 = vpop.f32.mrf.mxu1 }
 0x258   :  { %5329 = vmatprep.mubr.bf16.mxu1 %v7319_v6  ;;  %5350 = vmatpush3.msra.mxu1 %v6967_v9 }
 0x259   :  { %5351 = vmatprep.subr.mxu1 %v6975_v34 }
 0x25a   :  { %5352 = vmatpush3.msra.mxu1 %v6975_v34 }
 0x25f   :  { %5330 = vmatmul.mubr.bf16.gmra.mxu1 %v7319_v6  ;;  %v3472_v6 = vld [vmem:[%s7240_s3 + $0x28] sm:$0xff] }
 0x260   :  { %v6988_v32 = vand.u32 4294901760, %v3472_v6 }
 0x262   :  { %7338 = vst [vmem:[#allocation12_spill] sm:$0xff] %v6988_v32  ;;  %v7001_v13 = vsub.f32 %v3472_v6, %v6988_v32  ;;  %5353 = vmatprep.subr.mxu1 %v6988_v32 }
 0x263   :  { %5354 = vmatpush3.msra.mxu1 %v6988_v32 }
 0x264   :  { %7340 = vst [vmem:[#allocation13_spill] sm:$0xff] %v7001_v13  ;;  %v7013_v48 = vand.u32 4294901760, %v7001_v13  ;;  %5355 = vmatprep.subr.mxu1 %v7003_v7 }
 0x265   :  { %5356 = vmatpush3.msra.mxu1 %v7003_v7 }
 0x266   :  { %7342 = vst [vmem:[#allocation8_spill] sm:$0xff] %v7013_v48  ;;  %v3612_v51 = vsub.f32 %v7001_v13, %v7013_v48  ;;  %5357 = vmatprep.subr.mxu1 %v7019_v62 }
 0x267   :  { %5358 = vmatpush3.msra.mxu1 %v7019_v62 }
 0x268   :  { %v3613_v50 = vand.u32 4294901760, %v3612_v51  ;;  %5359 = vmatprep.subr.mxu1 %v7030_v59 }
 0x269   :  { %5360 = vmatpush3.msra.mxu1 %v7030_v59 }
 0x26a   :  { %5372 = vmatprep.subr.mxu0 %v3613_v50  ;;  %5361 = vmatprep.subr.mxu1 %v7044_v15 }
 0x26b   :  { %5373 = vmatpush3.msra.mxu0 %v3613_v50  ;;  %5362 = vmatpush3.msra.mxu1 %v7044_v15 }
 0x26c   :  { %5374 = vmatprep.subr.mxu0 %v3620_v58  ;;  %5363 = vmatprep.subr.mxu1 %v7060_v2 }
 0x26d   :  { %5375 = vmatpush3.msra.mxu0 %v3620_v58  ;;  %5364 = vmatpush3.msra.mxu1 %v7060_v2 }
 0x26e   :  { %5376 = vmatprep.subr.mxu0 %v3627_v39  ;;  %5387 = vmatprep.subr.mxu1 %v6973_v45 }
 0x26f   :  { %5377 = vmatpush3.msra.mxu0 %v3627_v39 }
 0x270   :  { %5378 = vmatprep.subr.mxu0 %v3634_v31 }
 0x271   :  { %5379 = vmatpush3.msra.mxu0 %v3634_v31 }
 0x272   :  { %5380 = vmatprep.subr.mxu0 %v3641_v42 }
 0x273   :  { %5381 = vmatpush3.msra.mxu0 %v3641_v42 }
 0x274   :  { %5382 = vmatprep.subr.mxu0 %v3648_v12 }
 0x275   :  { %5383 = vmatpush3.msra.mxu0 %v3648_v12 }
 0x276   :  { %5406 = vmatprep.subr.mxu0 %v6967_v9 }
 0x2cf   :  { %v7086_v16 = vpop.f32.mrf.mxu1  ;;  %v5279_v57 = vpop.f32.mrf.mxu0 }
 0x2d1   :  { %v7088_v29 = vpop.f32.mrf.mxu1  ;;  %v2966_v53 = vpop.f32.mrf.mxu0 }
 0x2d3   :  { %v7090_v56 = vpop.f32.mrf.mxu1  ;;  %v5280_v19 = vpop.f32.mrf.mxu0 }
 0x2d5   :  { %v7092_v27 = vpop.f32.mrf.mxu1  ;;  %v7096_v46 = vpop.f32.mrf.mxu0 }
 0x2d7   :  { %v5231_v26 = vpop.f32.mrf.mxu1 }
 0x2d8   :  { %v2657_v63 = vadd.f32 %v5231_v26, %v5215_v37 }
 0x2d9   :  { %v2648_v1 = vpop.f32.mrf.mxu1 }
 0x2da   :  { %v2649_v33 = vadd.f32 %v2648_v1, %v2559_v17 }
 0x2db   :  { %v5232_v22 = vpop.f32.mrf.mxu1 }
 0x2dc   :  { %v2660_v13 = vadd.f32 %v5232_v22, %v5216_v30 }
 0x2dd   :  { %v2651_v44 = vpop.f32.mrf.mxu1 }
 0x2de   :  { %v2652_v62 = vadd.f32 %v2651_v44, %v2562_v24 }
 0x2df   :  { %v5235_v11 = vpop.f32.mrf.mxu1 }
 0x2e1   :  { %v2664_v43 = vpop.f32.mrf.mxu1 }
 0x2e2   :  { %v2665_v17 = vadd.f32 %v2664_v43, %v7088_v29 }
 0x2e3   :  { %v5236_v25 = vpop.f32.mrf.mxu1 }
 0x2e5   :  { %v7094_v20 = vpop.f32.mrf.mxu1 }
 0x2e7   :  { %v5247_v6 = vpop.f32.mrf.mxu1 }
 0x2e8   :  { %v2779_v2 = vadd.f32 %v5247_v6, %v2657_v63 }
 0x2e9   :  { %v2746_v52 = vpop.f32.mrf.mxu1 }
 0x2ea   :  { %v2777_v59 = vadd.f32 %v2746_v52, %v2649_v33  ;;  %v2676_v33 = vadd.f32 %v5236_v25, %v7090_v56 }
 0x2eb   :  { %v5248_v28 = vpop.f32.mrf.mxu1 }
 0x2ec   :  { %v2780_v7 = vadd.f32 %v5248_v28, %v2660_v13 }
 0x2ed   :  { %v2749_v40 = vpop.f32.mrf.mxu1 }
 0x2ef   :  { %v5251_v3 = vpop.f32.mrf.mxu1  ;;  %v7098_v47 = vpop.f32.mrf.mxu0 }
 0x2f1   :  { %v2762_v51 = vpop.f32.mrf.mxu1  ;;  %v7100_v41 = vpop.f32.mrf.mxu0 }
 0x2f2   :  { %v2781_v13 = vadd.f32 %v2762_v51, %v2665_v17 }
 0x2f3   :  { %v5252_v50 = vpop.f32.mrf.mxu1  ;;  %v7102_v14 = vpop.f32.mrf.mxu0 }
 0x2f5   :  { %v2765_v60 = vpop.f32.mrf.mxu1  ;;  %v7104_v58 = vpop.f32.mrf.mxu0 }
 0x2f7   :  { %v5263_v21 = vpop.f32.mrf.mxu1  ;;  %v5311_v61 = vpop.f32.mrf.mxu0 }
 0x2f8   :  { %v2889_v8 = vadd.f32 %v5263_v21, %v2779_v2 }
 0x2f9   :  { %v2856_v39 = vpop.f32.mrf.mxu1  ;;  %v3178_v31 = vpop.f32.mrf.mxu0 }
 0x2fa   :  { %v2887_v32 = vadd.f32 %v2856_v39, %v2777_v59 }
 0x2fb   :  { %v5264_v49 = vpop.f32.mrf.mxu1  ;;  %v7106_v42 = vpop.f32.mrf.mxu0 }
 0x2fc   :  { %v2997_v1 = vadd.f32 %v2966_v53, %v2887_v32 }
 0x2fd   :  { %v2859_v23 = vpop.f32.mrf.mxu1  ;;  %v7108_v12 = vpop.f32.mrf.mxu0 }
 0x2ff   :  { %v5267_v4 = vpop.f32.mrf.mxu1  ;;  %v7110_v38 = vpop.f32.mrf.mxu0 }
 0x300   :  { %7357 = vst [vmem:[#allocation26_spill] sm:$0xff] %v7110_v38  ;;  %v2999_v38 = vadd.f32 %v5279_v57, %v2889_v8  ;;  %v2784_v8 = vadd.f32 %v5252_v50, %v2676_v33 }
 0x301   :  { %v2872_v18 = vpop.f32.mrf.mxu1  ;;  %v7112_v36 = vpop.f32.mrf.mxu0 }
 0x302   :  { %7358 = vst [vmem:[#allocation27_spill] sm:$0xff] %v7112_v36  ;;  %v2890_v36 = vadd.f32 %v5264_v49, %v2780_v7  ;;  %v2668_v7 = vadd.f32 %v7094_v20, %v7092_v27  ;;  %v2891_v44 = vadd.f32 %v2872_v18, %v2781_v13 }
 0x303   :  { %v5268_v35 = vpop.f32.mrf.mxu1  ;;  %v7114_v48 = vpop.f32.mrf.mxu0 }
 0x304   :  { %7359 = vst [vmem:[#allocation28_spill] sm:$0xff] %v7114_v48  ;;  %v2778_v48 = vadd.f32 %v2749_v40, %v2652_v62  ;;  %v3000_v22 = vadd.f32 %v5280_v19, %v2890_v36  ;;  %v2894_v32 = vadd.f32 %v5268_v35, %v2784_v8  ;;  %v3001_v27 = vadd.f32 %v7100_v41, %v2891_v44 }
 0x305   :  { %v2875_v5 = vpop.f32.mrf.mxu1  ;;  %v7116_v55 = vpop.f32.mrf.mxu0 }
 0x306   :  { %7360 = vst [vmem:[#allocation29_spill] sm:$0xff] %v7116_v55  ;;  %v2673_v55 = vadd.f32 %v5235_v11, %v7086_v16  ;;  %v2888_v63 = vadd.f32 %v2859_v23, %v2778_v48  ;;  %v3004_v53 = vadd.f32 %v7102_v14, %v2894_v32 }
 0x307   :  { %v5295_v10 = vpop.f32.mrf.mxu1 }
 0x308   :  { %v3105_v26 = vadd.f32 %v5295_v10, %v2999_v38  ;;  %v2783_v2 = vadd.f32 %v5251_v3, %v2673_v55  ;;  %v2998_v48 = vadd.f32 %v7096_v46, %v2888_v63  ;;  %v2782_v55 = vadd.f32 %v2765_v60, %v2668_v7 }
 0x309   :  { %v3072_v0 = vpop.f32.mrf.mxu1  ;;  %v7362_v39 = vld [vmem:[#allocation27_spill] sm:$0xff] }
 0x30a   :  { %v5343_v15 = vpop.f32.mrf.mxu0  ;;  %v3103_v59 = vadd.f32 %v3072_v0, %v2997_v1  ;;  %v2893_v62 = vadd.f32 %v5267_v4, %v2783_v2  ;;  %v3211_v10 = vadd.f32 %v5311_v61, %v3105_v26  ;;  %v2892_v25 = vadd.f32 %v2875_v5, %v2782_v55 }
 0x30b   :  { %v5296_v54 = vpop.f32.mrf.mxu1 }
 0x30c   :  { %v3390_v9 = vpop.f32.mrf.mxu0  ;;  %v3106_v11 = vadd.f32 %v5296_v54, %v3000_v22  ;;  %v3209_v43 = vadd.f32 %v3178_v31, %v3103_v59  ;;  %v3003_v0 = vadd.f32 %v7098_v47, %v2893_v62  ;;  %v3002_v3 = vadd.f32 %v7104_v58, %v2892_v25 }
 0x30d   :  { %v3075_v45 = vpop.f32.mrf.mxu1  ;;  %v7364_v13 = vld [vmem:[#allocation29_spill] sm:$0xff] }
 0x30e   :  { %v5344_v24 = vpop.f32.mrf.mxu0  ;;  %v3104_v56 = vadd.f32 %v3075_v45, %v2998_v48  ;;  %v3212_v18 = vadd.f32 %v7106_v42, %v3106_v11  ;;  %v4421_v45 = vld [vmem:[%s7239_s4 + $0x1] ss:$0 sm:$0xff] }
 0x30f   :  { %v5299_v34 = vpop.f32.mrf.mxu1 }
 0x310   :  { %v3393_v29 = vpop.f32.mrf.mxu0  ;;  %v3109_v54 = vadd.f32 %v5299_v34, %v3003_v0  ;;  %v3210_v5 = vadd.f32 %v7108_v12, %v3104_v56 }
 0x311   :  { %v3088_v37 = vpop.f32.mrf.mxu1 }
 0x312   :  { %v5347_v6 = vpop.f32.mrf.mxu0  ;;  %v3107_v19 = vadd.f32 %v3088_v37, %v3001_v27  ;;  %v7363_v37 = vld [vmem:[#allocation28_spill] sm:$0xff] }
 0x313   :  { %v5300_v30 = vpop.f32.mrf.mxu1 }
 0x314   :  { %v3110_v40 = vadd.f32 %v5300_v30, %v3004_v53  ;;  %v3406_v41 = vpop.f32.mrf.mxu0  ;;  %v3213_v31 = vadd.f32 %v7362_v39, %v3107_v19 }
 0x315   :  { %v3091_v16 = vpop.f32.mrf.mxu1 }
 0x316   :  { %v3108_v60 = vadd.f32 %v3091_v16, %v3002_v3  ;;  %v3216_v17 = vadd.f32 %v7363_v37, %v3110_v40  ;;  %v5348_v26 = vpop.f32.mrf.mxu0  ;;  %v7373_v37 = vld [vmem:[#allocation13_spill] sm:$0xff] }
 0x317   :  { %v5327_v38 = vpop.f32.mrf.mxu1 }
 0x318   :  { %v3317_v57 = vadd.f32 %v5327_v38, %v3211_v10  ;;  %v3214_v59 = vadd.f32 %v7364_v13, %v3108_v60  ;;  %v3409_v10 = vpop.f32.mrf.mxu0  ;;  %v7366_v60 = vld [vmem:[#allocation6_spill] sm:$0xff] }
 0x319   :  { %v3284_v36 = vpop.f32.mrf.mxu1  ;;  %v7382_v13 = vld [vmem:[#allocation14_spill] sm:$0xff] }
 0x31a   :  { %v3315_v4 = vadd.f32 %v3284_v36, %v3209_v43  ;;  %v3423_v20 = vadd.f32 %v5343_v15, %v3317_v57  ;;  %v7361_v15 = vld [vmem:[#allocation26_spill] sm:$0xff] }
 0x31b   :  { %v5328_v35 = vpop.f32.mrf.mxu1  ;;  %v3215_v50 = vadd.f32 %v7361_v15, %v3109_v54 }
 0x31c   :  { %v3421_v52 = vadd.f32 %v3390_v9, %v3315_v4  ;;  %v3318_v28 = vadd.f32 %v5328_v35, %v3212_v18  ;;  %v3435_v51 = vadd.f32 %v4421_v45, %v3423_v20 }
 0x31d   :  { %v3287_v46 = vpop.f32.mrf.mxu1 }
 0x31e   :  { %v3433_v47 = vadd.f32 %v4421_v45, %v3421_v52  ;;  %v3316_v34 = vadd.f32 %v3287_v46, %v3210_v5  ;;  %v3424_v21 = vadd.f32 %v5344_v24, %v3318_v28  ;;  %v3443_v58 = vmax.f32 %v3435_v51, 0.0 }
 0x31f   :  { %v5331_v14 = vpop.f32.mrf.mxu1 }
 0x320   :  { %v3422_v61 = vadd.f32 %v3393_v29, %v3316_v34  ;;  %v3321_v9 = vadd.f32 %v5331_v14, %v3215_v50  ;;  %v3441_v42 = vmax.f32 %v3433_v47, 0.0  ;;  %v3436_v33 = vadd.f32 %v4421_v45, %v3424_v21  ;;  %v7365_v50 = vld [vmem:[#allocation2_spill] sm:$0xff] }
 0x321   :  { %v3300_v49 = vpop.f32.mrf.mxu1  ;;  %v3450_v11 = vsel %vm2400_vm0, %v3443_v58, -inf  ;;  %v7375_v58 = vld [vmem:[#allocation9_spill] sm:$0xff] }
 0x322   :  { %v3434_v23 = vadd.f32 %v4421_v45, %v3422_v61  ;;  %v3319_v12 = vadd.f32 %v3300_v49, %v3213_v31  ;;  %v3427_v63 = vadd.f32 %v5347_v6, %v3321_v9  ;;  %v3449_v8 = vsel %vm2400_vm0, %v3441_v42, -inf  ;;  %v7367_v61 = vld [vmem:[#allocation12_spill] sm:$0xff]  ;;  %v7368_v31 = vld [vmem:[#allocation15_spill] sm:$0xff]  ;;  %v7369_v49 = vld [vmem:[#allocation10_spill] sm:$0xff] }
 0x323   :  { %v5332_v1 = vpop.f32.mrf.mxu1  ;;  %v3444_v32 = vmax.f32 %v3436_v33, 0.0  ;;  %v3451_v56 = vmax.f32 %v3449_v8, %v3450_v11  ;;  %v7370_v42 = vld [vmem:[#allocation3_spill] sm:$0xff]  ;;  %v7379_v33 = vld [vmem:[#allocation21_spill] sm:$0xff] }
 0x324   :  { %v3425_v2 = vadd.f32 %v3406_v41, %v3319_v12  ;;  %v3322_v30 = vadd.f32 %v5332_v1, %v3216_v17  ;;  %v3442_v24 = vmax.f32 %v3434_v23, 0.0  ;;  %v3439_v22 = vadd.f32 %v4421_v45, %v3427_v63  ;;  %v7371_v23 = vld [vmem:[#allocation4_spill] sm:$0xff]  ;;  %v7374_v17 = vld [vmem:[#allocation17_spill] sm:$0xff]  ;;  %v7376_v63 = vld [vmem:[#allocation22_spill] sm:$0xff] }
 0x325   :  { %v3303_v7 = vpop.f32.mrf.mxu1  ;;  %v3453_v4 = vsel %vm2400_vm0, %v3444_v32, -inf  ;;  %v3461_v54 = vsel %vm2400_vm0, %v3451_v56, -inf  ;;  %v7372_v12 = vld [vmem:[#allocation16_spill] sm:$0xff]  ;;  %v7378_v1 = vld [vmem:[#allocation18_spill] sm:$0xff]  ;;  %v7387_v8 = vld [vmem:[#allocation23_spill] sm:$0xff] }
 0x326   :  { %v3437_v62 = vadd.f32 %v4421_v45, %v3425_v2  ;;  %v3428_v16 = vadd.f32 %v5348_v26, %v3322_v30  ;;  %v3320_v44 = vadd.f32 %v3303_v7, %v3214_v59  ;;  %v3447_v48 = vmax.f32 %v3439_v22, 0.0  ;;  %v7377_v26 = vld [vmem:[#allocation5_spill] sm:$0xff]  ;;  %v7380_v2 = vld [vmem:[#allocation24_spill] sm:$0xff]  ;;  %v7381_v30 = vld [vmem:[#allocation7_spill] sm:$0xff] }
 0x327   :  { %v3452_v57 = vsel %vm2400_vm0, %v3442_v24, -inf  ;;  %v7383_v59 = vld [vmem:[#allocation8_spill] sm:$0xff]  ;;  %v7384_v24 = vld [vmem:[#allocation11_spill] sm:$0xff] }
 0x328   :  { %v3445_v38 = vmax.f32 %v3437_v62, 0.0  ;;  %v3440_v29 = vadd.f32 %v4421_v45, %v3428_v16  ;;  %v3426_v55 = vadd.f32 %v3409_v10, %v3320_v44  ;;  %v3456_v43 = vsel %vm2400_vm0, %v3447_v48, -inf  ;;  %v7385_v22 = vld [vmem:[#allocation19_spill] sm:$0xff]  ;;  %v7386_v7 = vld [vmem:[#allocation20_spill] sm:$0xff]  ;;  %v7388_v62 = vld [vmem:[#allocation25_spill] sm:$0xff] }
 0x329   :  { %v3454_v53 = vmax.f32 %v3452_v57, %v3453_v4  ;;  %v4422_v44 = vld [vmem:[%s7239_s4 + $0x2] ss:$0 sm:$0xff] }
 0x32a   :  { %v3455_v0 = vsel %vm2400_vm0, %v3445_v38, -inf  ;;  %v3448_v36 = vmax.f32 %v3440_v29, 0.0  ;;  %v3438_v25 = vadd.f32 %v4421_v45, %v3426_v55 }
 0x32b   :  { %v3457_v27 = vmax.f32 %v3455_v0, %v3456_v43  ;;  %v3464_v5 = vsel %vm2400_vm0, %v3454_v53, -inf }
 0x32c   :  { %v3446_v18 = vmax.f32 %v3438_v25, 0.0  ;;  %v3459_v35 = vsel %vm2400_vm0, %v3448_v36, -inf }
 0x32d   :  { %v3462_v20 = vsel %vm2400_vm0, %v3457_v27, -inf }
 0x32e   :  { %v3458_v6 = vsel %vm2400_vm0, %v3446_v18, -inf  ;;  %v3463_v19 = vmax.f32 %v3461_v54, %v3462_v20 }
 0x32f   :  { %v3460_v52 = vmax.f32 %v3458_v6, %v3459_v35 }
 0x330   :  { %v3480_v28 = vsel %vm2400_vm0, %v3463_v19, 0 }
 0x331   :  { %v3465_v45 = vsel %vm2400_vm0, %v3460_v52, -inf  ;;  %v3558_v46 = vand.u32 4294901760, %v3480_v28 }
 0x332   :  { %v3466_v40 = vmax.f32 %v3464_v5, %v3465_v45  ;;  %v4423_v45 = vld [vmem:[%s7239_s4 + $0x3] ss:$0 sm:$0xff] }
 0x333   :  { %5384 = vmatprep.mubr.f32.mxu0 %v3558_v46  ;;  %v3559_v3 = vsub.f32 %v3480_v28, %v3558_v46 }
 0x334   :  { %v3483_v47 = vsel %vm2400_vm0, %v3466_v40, 0 }
 0x335   :  { %v7151_v34 = vand.u32 4294901760, %v3483_v47  ;;  %v3560_v51 = vand.u32 4294901760, %v3559_v3 }
 0x337   :  { %v3569_v41 = vsub.f32 %v3483_v47, %v7151_v34  ;;  %5385 = vmatmul.mubr.f32.vlgmr.msra.gmra.mxu0 %v7151_v34  ;;  %v3561_v15 = vsub.f32 %v3559_v3, %v3560_v51 }
 0x338   :  { %5407 = vmatpush3.msra.mxu0 %v7365_v50  ;;  %5422 = vmatprep.mubr.f32.mxu0 %v3560_v51 }
 0x339   :  { %v3570_v14 = vand.u32 4294901760, %v3569_v41  ;;  %5408 = vmatprep.subr.mxu0 %v7366_v60  ;;  %v3562_v21 = vand.u32 4294901760, %v3561_v15 }
 0x33a   :  { %5409 = vmatpush3.msra.mxu0 %v7366_v60 }
 0x33b   :  { %5410 = vmatprep.subr.mxu0 %v7367_v61  ;;  %5365 = vmatprep.mubr.f32.mxu1 %v3562_v21  ;;  %v3571_v39 = vsub.f32 %v3569_v41, %v3570_v14 }
 0x33c   :  { %5411 = vmatpush3.msra.mxu0 %v7367_v61 }
 0x33d   :  { %5412 = vmatprep.subr.mxu0 %v7368_v31  ;;  %v3572_v9 = vand.u32 4294901760, %v3571_v39 }
 0x33e   :  { %5413 = vmatpush3.msra.mxu0 %v7368_v31 }
 0x33f   :  { %5414 = vmatprep.subr.mxu0 %v7369_v49  ;;  %5366 = vmatmul.mubr.f32.vlgmr.msra.gmra.mxu1 %v3572_v9 }
 0x340   :  { %5388 = vmatpush3.msra.mxu1 %v7370_v42  ;;  %5415 = vmatpush3.msra.mxu0 %v7369_v49 }
 0x341   :  { %5389 = vmatprep.subr.mxu1 %v7371_v23  ;;  %5403 = vmatprep.mubr.f32.mxu1 %v3559_v3 }
 0x342   :  { %5416 = vmatprep.subr.mxu0 %v7372_v12  ;;  %5390 = vmatpush3.msra.mxu1 %v7371_v23 }
 0x343   :  { %5417 = vmatpush3.msra.mxu0 %v7372_v12  ;;  %5391 = vmatprep.subr.mxu1 %v7373_v37 }
 0x344   :  { %5418 = vmatprep.subr.mxu0 %v7374_v17  ;;  %5392 = vmatpush3.msra.mxu1 %v7373_v37 }
 0x345   :  { %5419 = vmatpush3.msra.mxu0 %v7374_v17  ;;  %5393 = vmatprep.subr.mxu1 %v7375_v58 }
 0x346   :  { %5420 = vmatprep.subr.mxu0 %v7376_v63  ;;  %5394 = vmatpush3.msra.mxu1 %v7375_v58 }
 0x347   :  { %5421 = vmatpush3.msra.mxu0 %v7376_v63  ;;  %5395 = vmatprep.subr.mxu1 %v7377_v26 }
 0x348   :  { %5423 = vmatmul.mubr.f32.vlgmr.msra.gmra.mxu0 %v3570_v14  ;;  %5444 = vmatprep.subr.mxu0 %v7365_v50 }
 0x349   :  { %5396 = vmatpush3.msra.mxu1 %v7377_v26  ;;  %5445 = vmatpush3.msra.mxu0 %v7365_v50 }
 0x34a   :  { %5460 = vmatprep.mubr.f32.mxu0 %v3558_v46  ;;  %5397 = vmatprep.subr.mxu1 %v7378_v1 }
 0x34b   :  { %5446 = vmatprep.subr.mxu0 %v7366_v60  ;;  %5398 = vmatpush3.msra.mxu1 %v7378_v1 }
 0x34c   :  { %5447 = vmatpush3.msra.mxu0 %v7366_v60  ;;  %5399 = vmatprep.subr.mxu1 %v7379_v33 }
 0x34d   :  { %5448 = vmatprep.subr.mxu0 %v7367_v61  ;;  %5400 = vmatpush3.msra.mxu1 %v7379_v33 }
 0x34e   :  { %5449 = vmatpush3.msra.mxu0 %v7367_v61  ;;  %5401 = vmatprep.subr.mxu1 %v7380_v2 }
 0x34f   :  { %5450 = vmatprep.subr.mxu0 %v7368_v31  ;;  %5402 = vmatpush3.msra.mxu1 %v7380_v2 }
 0x350   :  { %5451 = vmatpush3.msra.mxu0 %v7368_v31  ;;  %5404 = vmatmul.mubr.f32.vlgmr.msra.gmra.mxu1 %v3569_v41 }
 0x351   :  { %5425 = vmatprep.subr.mxu1 %v7381_v30  ;;  %5452 = vmatprep.subr.mxu0 %v7369_v49 }
 0x352   :  { %5426 = vmatpush3.msra.mxu1 %v7381_v30  ;;  %5441 = vmatprep.mubr.f32.mxu1 %v3558_v46 }
 0x353   :  { %5453 = vmatpush3.msra.mxu0 %v7369_v49  ;;  %5427 = vmatprep.subr.mxu1 %v7382_v13 }
 0x354   :  { %5454 = vmatprep.subr.mxu0 %v7372_v12  ;;  %5428 = vmatpush3.msra.mxu1 %v7382_v13 }
 0x355   :  { %5455 = vmatpush3.msra.mxu0 %v7372_v12  ;;  %5429 = vmatprep.subr.mxu1 %v7383_v59 }
 0x356   :  { %5456 = vmatprep.subr.mxu0 %v7374_v17  ;;  %5430 = vmatpush3.msra.mxu1 %v7383_v59 }
 0x357   :  { %5457 = vmatpush3.msra.mxu0 %v7374_v17  ;;  %5431 = vmatprep.subr.mxu1 %v7384_v24 }
 0x358   :  { %5458 = vmatprep.subr.mxu0 %v7376_v63  ;;  %5432 = vmatpush3.msra.mxu1 %v7384_v24 }
 0x359   :  { %5459 = vmatpush3.msra.mxu0 %v7376_v63  ;;  %5433 = vmatprep.subr.mxu1 %v7385_v22 }
 0x35a   :  { %5461 = vmatmul.mubr.f32.vlgmr.msra.gmra.mxu0 %v7151_v34  ;;  %5434 = vmatpush3.msra.mxu1 %v7385_v22 }
 0x35b   :  { %5435 = vmatprep.subr.mxu1 %v7386_v7 }
 0x35c   :  { %5436 = vmatpush3.msra.mxu1 %v7386_v7 }
 0x35d   :  { %5437 = vmatprep.subr.mxu1 %v7387_v8 }
 0x35e   :  { %5438 = vmatpush3.msra.mxu1 %v7387_v8 }
 0x35f   :  { %5439 = vmatprep.subr.mxu1 %v7388_v62 }
 0x360   :  { %5440 = vmatpush3.msra.mxu1 %v7388_v62 }
 0x361   :  { %5442 = vmatmul.mubr.f32.vlgmr.msra.gmra.mxu1 %v7151_v34  ;;  %v4424_v34 = vld [vmem:[%s7239_s4 + $0x4] ss:$0 sm:$0xff] }
 0x3f7   :  { %v5386_v11 = vpop.f32.mrf.mxu0 }
 0x3f9   :  { %v3685_v29 = vpop.f32.mrf.mxu0 }
 0x3ff   :  { %v5367_v16 = vpop.f32.mrf.mxu1 }
 0x400   :  { %v3575_v10 = vadd.f32 %v5367_v16, %v4422_v44 }
 0x401   :  { %v3564_v48 = vpop.f32.mrf.mxu1 }
 0x402   :  { %v3565_v38 = vadd.f32 %v4422_v44, %v3564_v48  ;;  %v3692_v55 = vadd.f32 %v5386_v11, %v3575_v10 }
 0x404   :  { %v3686_v0 = vadd.f32 %v3685_v29, %v3565_v38 }
 0x408   :  { %v5424_v56 = vpop.f32.mrf.mxu0 }
 0x40a   :  { %v3867_v25 = vpop.f32.mrf.mxu0 }
 0x410   :  { %v5405_v32 = vpop.f32.mrf.mxu1 }
 0x411   :  { %v3787_v43 = vadd.f32 %v5405_v32, %v3692_v55 }
 0x412   :  { %v3779_v57 = vpop.f32.mrf.mxu1 }
 0x413   :  { %v3780_v36 = vadd.f32 %v3779_v57, %v3686_v0  ;;  %v3876_v27 = vadd.f32 %v5424_v56, %v3787_v43 }
 0x415   :  { %v3868_v53 = vadd.f32 %v3867_v25, %v3780_v36 }
 0x41a   :  { %v5462_v4 = vpop.f32.mrf.mxu0 }
 0x41c   :  { %v4055_v19 = vpop.f32.mrf.mxu0 }
 0x421   :  { %v5443_v18 = vpop.f32.mrf.mxu1 }
 0x422   :  { %v3977_v54 = vadd.f32 %v5443_v18, %v3876_v27 }
 0x423   :  { %v3970_v20 = vpop.f32.mrf.mxu1 }
 0x424   :  { %v4062_v35 = vadd.f32 %v5462_v4, %v3977_v54  ;;  %v3971_v6 = vadd.f32 %v3970_v20, %v3868_v53 }
 0x426   :  { %v4056_v52 = vadd.f32 %v4055_v19, %v3971_v6  ;;  %v4066_v28 = vmax.f32 %v4062_v35, 0.0 }
 0x428   :  { %v4065_v5 = vmax.f32 %v4056_v52, 0.0  ;;  %v4072_v3 = vmul.f32 %v4423_v45, %v4066_v28 }
 0x42a   :  { %v4071_v46 = vmul.f32 %v4423_v45, %v4065_v5  ;;  %v4076_v47 = vsel %vm2400_vm0, %v4072_v3, 0.0 }
 0x42c   :  { %v4073_v40 = vsel %vm2400_vm0, %v4071_v46, 0.0 }
 0x42d   :  { %4074 = vadd.xlane.f32.xlu0 %v4073_v40 }
 0x431   :  { %4077 = vadd.xlane.f32.xlu0 %v4076_v47 }
 0x4b6   :  { %v4075_v51 = vpop.xlane.xlu0 %4074 }
 0x4b7   :  { %v4083_v41 = vadd.f32 %v4424_v34, %v4075_v51 }
 0x4b9   :  { %v4085_v15 = vsub.f32 0.0, %v4083_v41 }
 0x4ba   :  { %v4078_v50 = vpop.xlane.xlu0 %4077 }
 0x4bb   :  { %v4087_v14 = vmul.f32 1.442695, %v4085_v15  ;;  %v4084_v60 = vadd.f32 %v4424_v34, %v4078_v50 }
 0x4bd   :  { %5572 = vpow2.f32 %v4087_v14  ;;  %v4086_v21 = vsub.f32 0.0, %v4084_v60 }
 0x4bf   :  { %v4089_v61 = vmul.f32 1.442695, %v4086_v21 }
 0x4c1   :  { %5574 = vpow2.f32 %v4089_v61 }
 0x4ca   :  { %v5573_v39 = vpop.eup %5572 }
 0x4cb   :  { %v4091_v31 = vadd.f32 1.0, %v5573_v39 }
 0x4cd   :  { %5576 = vrcp.f32 %v4091_v31 }
 0x4ce   :  { %v5575_v9 = vpop.eup %5574 }
 0x4cf   :  { %v4092_v49 = vadd.f32 1.0, %v5575_v9 }
 0x4d1   :  { %5578 = vrcp.f32 %v4092_v49 }
 0x4da   :  { %v5577_v42 = vpop.eup %5576 }
 0x4db   :  { %4098 = vst.msk [vmem:[%s7241_s5] sm:$0xff] %vm4097_vm1, %v5577_v42 }
 0x4de   :  { %v5579_v23 = vpop.eup %5578 }
 0x4df   :  { %4099 = vst.msk [vmem:[%s7241_s5 + $0x8] sm:$0xff] %vm4097_vm1, %v5579_v23 }

</bundles_post_ra>
